<compile_context>
chip_gen: v6e
topology: v6e:2x2x1
jax: 0.10.0
libtpu: 0.0.40
codegen_flags: <defaults>
</compile_context>

<pallas_src>
import jax
import jax.numpy as jnp
from jax.experimental import pallas as pl
from jax.experimental.pallas import tpu as pltpu


# TODO(synk): raise to ~1-2k on v7x / 2-4k on v6e-v5e at production point counts
#             (npoint 4k-16k); 64 here exercises the multi-tile path at toy sizes.
_NPOINT_TILE_TARGET = 64
# Target rows per MLP matmul inside the sample-chunk loop.
_ROWS_TARGET = 512
# Explicit scoped-VMEM limit (>= default on all gens, < v7x 64 MiB physical).
_VMEM_LIMIT_BYTES = 48 * 1024 * 1024


def _round_up(x, m):
    return ((x + m - 1) // m) * m


def _interleave(ws, bs):
    out = []
    for w, b in zip(ws, bs):
        out.append(w)
        out.append(b)
    return out


def _choose_npoint_tile(npoint, target=_NPOINT_TILE_TARGET):
    """Largest multiple-of-8 divisor of npoint that is <= target (else npoint itself)."""
    if npoint <= target:
        return npoint
    for t in range(min(npoint, target), 7, -1):
        if npoint % t == 0 and t % 8 == 0:
            return t
    return npoint


def _choose_sample_chunk(nsample, tile_m, rows_target=_ROWS_TARGET):
    """Sample-chunk size so chunk*tile_m ~ rows_target and chunk divides nsample."""
    c = max(1, min(nsample, rows_target // max(tile_m, 1)))
    while nsample % c:
        c -= 1
    return c


# ----------------------------------------------------------------------------- #
# Fused Pallas SA kernel:
#   point-MLP chain + incremental max-pool over nsample + (optional) confidence head
# ----------------------------------------------------------------------------- #
def make_sa_kernel(tile_m, chunk, n_chunks, cin_pad, cout, cout_store, n_mlp, n_conf):
    """refs = [g (nsample, tile_m, cin_pad), (w,b)*n_mlp, (cw,cb)*n_conf, out_feat, (out_cls)]."""

    def kernel(*refs):
        g_ref = refs[0]
        nw = n_mlp + n_conf
        out_feat_ref = refs[1 + 2 * nw]
        out_cls_ref = refs[2 + 2 * nw] if n_conf else None

        # Hoist the (tiny) weight / bias loads out of the chunk loop.
        ws = [refs[1 + 2 * li][...] for li in range(n_mlp)]
        bs = [refs[2 + 2 * li][...] for li in range(n_mlp)]

        # Incremental max-pool over nsample: only a (chunk*tile_m, *) activation slab and a
        # (tile_m, cout) f32 running max are ever live (no nsample-sized f32 pre-pool buffer).
        acc = jnp.full((tile_m, cout), -jnp.inf, dtype=jnp.float32)
        for ci in range(n_chunks):  # small static trip count, fully visible to the scheduler
            h = g_ref[pl.ds(ci * chunk, chunk), :, :].reshape(chunk * tile_m, cin_pad)
            # Hidden point-MLP layers: bf16 matmul (f32 acc) + bias + ReLU.
            for li in range(n_mlp - 1):
                z = jnp.dot(h, ws[li], preferred_element_type=jnp.float32) + bs[li]
                h = jnp.maximum(z, 0.0).astype(jnp.bfloat16)
            # Last point-MLP layer: matmul only (bias+ReLU deferred past the pooling).
            z = jnp.dot(h, ws[n_mlp - 1], preferred_element_type=jnp.float32)
            acc = jnp.maximum(acc, jnp.max(z.reshape(chunk, tile_m, cout), axis=0))

        # Per-channel bias and ReLU are monotone -> commute with max (exact).
        pooled = jnp.maximum(acc + bs[n_mlp - 1], 0.0)          # (tile_m, cout) f32
        feat = pooled.astype(jnp.bfloat16)
        if cout_store > cout:                                    # pad the SMALL pooled tile only
            feat = jnp.concatenate(
                [feat, jnp.zeros((tile_m, cout_store - cout), jnp.bfloat16)], axis=-1)
        out_feat_ref[...] = feat                                 # lane-dense bf16 store

        # Fused confidence head (ReLU between layers, plain affine on the last; the last conf
        # weight/bias are zero-padded to 128 logits outside the kernel -> lane-dense store).
        if n_conf:
            c = pooled.astype(jnp.bfloat16)
            zc = None
            for li in range(n_conf):
                cw = refs[1 + 2 * (n_mlp + li)][...]
                cb = refs[2 + 2 * (n_mlp + li)][...]
                zc = jnp.dot(c, cw, preferred_element_type=jnp.float32) + cb
                if li + 1 < n_conf:
                    c = jnp.maximum(zc, 0.0).astype(jnp.bfloat16)
            out_cls_ref[...] = zc                                # (tile_m, 128) f32

    return kernel


def sa_layer(grouped, weights, biases, conf_w, conf_b):
    """grouped: (B, nsample, npoint, Cin) sample-major (bf16 or f32)
       -> ((B, npoint, Cout) bf16, (B, npoint, ncls) f32 | None)."""
    B, nsample, npoint, cin = grouped.shape
    weights, biases = list(weights), list(biases)
    conf_w, conf_b = list(conf_w), list(conf_b)
    n_mlp, n_conf = len(weights), len(conf_w)

    # Pad Cin to a multiple of 8 (zero cols in g / zero rows in W0) -> aligned loads.
    cin_pad = _round_up(cin, 8)
    if cin_pad != cin:
        grouped = jnp.pad(grouped, ((0, 0), (0, 0), (0, 0), (0, cin_pad - cin)))
        weights[0] = jnp.pad(weights[0], ((0, cin_pad - cin), (0, 0)))

    # Last point-MLP weight stays at natural cout (keeps the pre-pool slab small);
    # the pooled tile is lane-padded to 128 in-kernel right before the store.
    cout = weights[-1].shape[-1]
    cout_store = _round_up(cout, 128)

    # Confidence logits are tiny: pad the LAST conf weight/bias to 128 columns instead
    # (negligible extra MACs, lane-dense store, sliced back outside).
    ncls = conf_w[-1].shape[-1] if n_conf else 0
    ncls_store = _round_up(ncls, 128) if n_conf else 0
    if n_conf and ncls_store != ncls:
        conf_w[-1] = jnp.pad(conf_w[-1], ((0, 0), (0, ncls_store - ncls)))
        conf_b[-1] = jnp.pad(conf_b[-1], ((0, 0), (0, ncls_store - ncls)))

    # Tiling: 2-D grid over (batch, npoint tiles); sample-chunked pooling inside the kernel.
    tile_m = _choose_npoint_tile(npoint)
    n_tiles = npoint // tile_m
    chunk = _choose_sample_chunk(nsample, tile_m)
    n_chunks = nsample // chunk

    # bf16 activations/weights on the MXU (f32 accumulate); bias/ReLU/max stay in f32.
    g = grouped.astype(jnp.bfloat16)
    all_w = [w.astype(jnp.bfloat16) for w in weights + conf_w]
    all_b = [b.astype(jnp.float32) for b in biases + conf_b]

    kernel = make_sa_kernel(tile_m, chunk, n_chunks, cin_pad, cout, cout_store, n_mlp, n_conf)

    # TODO(synk): at production point counts, pass the neighbor indices via
    #             PrefetchScalarGridSpec and DMA-gather rows in-kernel so the nsample-times
    #             grouped blow-up never materializes in HBM; consider pl.Buffered(3) on the
    #             grouped input if xprof still shows its fetch exposed.
    in_specs = [pl.BlockSpec((None, nsample, tile_m, cin_pad), lambda b, t: (b, 0, t, 0))]
    for w, bia in zip(all_w, all_b):
        # Weights / biases are grid-invariant and tiny; full-array blocks (fetched once).
        in_specs.append(pl.BlockSpec(w.shape, lambda b, t: (0, 0)))
        in_specs.append(pl.BlockSpec(bia.shape, lambda b, t: (0, 0)))

    feat_shape = jax.ShapeDtypeStruct((B, npoint, cout_store), jnp.bfloat16)
    feat_spec = pl.BlockSpec((None, tile_m, cout_store), lambda b, t: (b, t, 0))
    if n_conf:
        cls_shape = jax.ShapeDtypeStruct((B, npoint, ncls_store), jnp.float32)
        cls_spec = pl.BlockSpec((None, tile_m, ncls_store), lambda b, t: (b, t, 0))
        out_shape, out_specs = (feat_shape, cls_shape), (feat_spec, cls_spec)
    else:
        out_shape, out_specs = feat_shape, feat_spec

    flops = (2 * B * nsample * npoint
             * sum(int(w.shape[0]) * int(w.shape[1]) for w in weights)
             + 2 * B * npoint * sum(int(w.shape[0]) * int(w.shape[1]) for w in conf_w))
    bytes_accessed = (int(g.size) * 2
                      + sum(int(w.size) * 2 for w in all_w)
                      + sum(int(b.size) * 4 for b in all_b)
                      + B * npoint * cout_store * 2
                      + (B * npoint * ncls_store * 4 if n_conf else 0))

    outs = pl.pallas_call(
        kernel,
        out_shape=out_shape,
        grid=(B, n_tiles),
        in_specs=in_specs,
        out_specs=out_specs,
        compiler_params=pltpu.CompilerParams(
            dimension_semantics=("parallel", "parallel"),
            vmem_limit_bytes=_VMEM_LIMIT_BYTES,
        ),
        cost_estimate=pl.CostEstimate(
            flops=int(flops), transcendentals=0, bytes_accessed=int(bytes_accessed)),
    )(g, *_interleave(all_w, all_b))

    if n_conf:
        feat_pad, cls_pad = outs
        return feat_pad[:, :, :cout], cls_pad[:, :, :ncls]
    return outs[:, :, :cout], None


# ----------------------------------------------------------------------------- #
# JAX glue: sampling / grouping (deterministic stand-ins for the CUDA ops)
# ----------------------------------------------------------------------------- #
def ball_query_and_group(xyz, new_xyz, features_nlc, radius, nsample):
    """xyz:(B,N,3), new_xyz:(B,M,3), features_nlc:(B,N,C)|None -> (B,nsample,M,3+C) bf16,
    gathered directly in sample-major layout (no relayout of the big grouped tensor)."""
    B, N, _ = xyz.shape
    # TODO(synk): O(M*N) dense ball query; replace with a bucketed / in-kernel DMA-gather
    #             approach at production point counts.
    d2 = jnp.sum((new_xyz[:, :, None, :] - xyz[:, None, :, :]) ** 2, axis=-1)   # (B,M,N)
    within = d2 <= radius * radius
    arange = jnp.arange(N, dtype=jnp.int32)
    # first `nsample` in-radius indices in point-index order (mimics ball_query)
    sort_key = jnp.where(within, arange[None, None, :], N + arange[None, None, :])
    order = jnp.argsort(sort_key, axis=-1)[..., :nsample]                        # (B,M,S)
    valid = jnp.take_along_axis(within, order, axis=-1)
    idx = jnp.where(valid, order, order[..., :1])                                # repeat first hit
    idx_sm = jnp.transpose(idx, (0, 2, 1))                                        # tiny (B,S,M)

    batch_ids = jnp.arange(B)[:, None, None]
    grouped_xyz = xyz[batch_ids, idx_sm] - new_xyz[:, None, :, :]                 # (B,S,M,3) rel.
    grouped_xyz = grouped_xyz.astype(jnp.bfloat16)
    if features_nlc is None:
        return grouped_xyz
    grouped_feat = features_nlc[batch_ids, idx_sm].astype(jnp.bfloat16)           # (B,S,M,C)
    return jnp.concatenate([grouped_xyz, grouped_feat], axis=-1)                  # use_xyz=True


def sa_module_forward(xyz, features_nlc, layer_params, npoint, radius, nsample):
    """One PointnetSAModuleMSG_WithSampling (single radius group), conf head fused.
    features are CHANNEL-LAST (B, N, C) in and out (no per-layer transpose round-trip)."""
    # TODO(synk): FPS / ctr-aware / D-FPS sampling replaced by deterministic first-K sampling.
    new_xyz = xyz[:, :npoint, :]
    grouped = ball_query_and_group(xyz, new_xyz, features_nlc, radius, nsample)   # (B,S,M,Cin)
    new_feat_nlc, li_cls_pred = sa_layer(
        grouped, layer_params["w"], layer_params["b"],
        layer_params["conf_w"], layer_params["conf_b"],
    )                                                                             # (B,M,Cout) bf16
    return new_xyz, new_feat_nlc, li_cls_pred


# ----------------------------------------------------------------------------- #
# PFE forward (mirrors the torch module's forward)
# ----------------------------------------------------------------------------- #
def pfe_forward(batch_dict, params, cfg):
    B = batch_dict["batch_size"]
    points = batch_dict["points"]

    # TODO(synk): real pcdet batches are ragged; this assumes equal points per batch element.
    batch_idx = points[:, 0]
    xyz = points[:, 1:4].reshape(B, -1, 3)
    N = xyz.shape[1]
    if points.shape[-1] > 4:
        feats_nlc = points[:, 4:].reshape(B, N, -1)                 # internal: channel-last
        features_cf = jnp.transpose(feats_nlc, (0, 2, 1))           # batch_dict copy: (B,C,N)
    else:
        feats_nlc, features_cf = None, None

    batch_dict["xyz"] = xyz
    batch_dict["features"] = features_cf

    enc_xyz = [xyz]
    enc_feats_nlc = [feats_nlc]                                     # channel-last between layers
    encoder_features = [features_cf]                                # torch-style (B,C,N) copies
    sa_ins_preds = []
    encoder_coords = [jnp.concatenate([batch_idx.reshape(B, -1, 1), xyz], axis=-1)]

    for i in range(len(cfg["NPOINT_LIST"])):
        xyz_input = enc_xyz[cfg["LAYER_INPUT"][i]]
        feat_input = enc_feats_nlc[cfg["LAYER_INPUT"][i]]
        # CTR_INDEX is -1 for all layers here -> ctr_xyz = None
        li_xyz, li_feat_nlc, li_cls_pred = sa_module_forward(
            xyz_input, feat_input, params[i],
            cfg["NPOINT_LIST"][i], cfg["RADIUS_LIST"][i], cfg["NSAMPLE_LIST"][i],
        )
        enc_xyz.append(li_xyz)
        enc_feats_nlc.append(li_feat_nlc)
        # only here do we build the channel-first copy the torch module exposes
        encoder_features.append(jnp.transpose(li_feat_nlc, (0, 2, 1)).astype(jnp.float32))

        li_batch_idx = batch_idx.reshape(B, -1)[:, : li_xyz.shape[1]]
        encoder_coords.append(
            jnp.concatenate([li_batch_idx[..., None], li_xyz.reshape(B, -1, 3)], axis=-1))
        if li_cls_pred is not None:
            li_cls_batch_idx = batch_idx.reshape(B, -1)[:, : li_cls_pred.shape[1]]
            sa_ins_preds.append(
                jnp.concatenate(
                    [li_cls_batch_idx[..., None],
                     li_cls_pred.reshape(B, -1, li_cls_pred.shape[-1])], axis=-1))
        else:
            sa_ins_preds.append([])

    batch_dict["encoder_xyz"] = enc_xyz
    batch_dict["encoder_coords"] = encoder_coords
    batch_dict["sa_ins_preds"] = sa_ins_preds
    batch_dict["encoder_features"] = encoder_features
    return batch_dict


# ----------------------------------------------------------------------------- #
# Deterministic parameter init (BN folded into bias; 1x1 conv == dense over channels)
# TODO(synk): a real BatchNorm fold also rescales W by gamma/sqrt(var+eps); random init here.
# ----------------------------------------------------------------------------- #
def _dense_init(key, cin, cout, scale=0.1):
    kw, kb = jax.random.split(key)
    w = jax.random.normal(kw, (cin, cout), jnp.float32) * scale
    b = jax.random.normal(kb, (1, cout), jnp.float32) * scale
    return w, b


def init_params(key, cfg, num_class):
    params = []
    channel_out_list = [1]  # channel_in = 1 (intensity), as in the torch __init__
    for k in range(len(cfg["NPOINT_LIST"])):
        channel_in = channel_out_list[cfg["LAYER_INPUT"][k]]
        mlp = [channel_in + 3] + list(cfg["MLPS"][k])     # use_xyz=True adds 3 coord channels
        ws, bs = [], []
        for li in range(len(mlp) - 1):
            key, sub = jax.random.split(key)
            w, b = _dense_init(sub, mlp[li], mlp[li + 1])
            ws.append(w)
            bs.append(b)
        layer = {"w": ws, "b": bs, "conf_w": [], "conf_b": []}
        channel_out = mlp[-1]
        conf = cfg["CONFIDENCE_MLPS"][k]
        if conf:
            conf_mlp = [channel_out] + list(conf) + [num_class]
            for li in range(len(conf_mlp) - 1):
                key, sub = jax.random.split(key)
                w, b = _dense_init(sub, conf_mlp[li], conf_mlp[li + 1])
                layer["conf_w"].append(w)
                layer["conf_b"].append(b)
        params.append(layer)
        channel_out_list.append(channel_out)
    return params


# ----------------------------------------------------------------------------- #
if __name__ == "__main__":
    SA_CONFIG = dict(
        NPOINT_LIST=[128, 64],
        NSAMPLE_LIST=[16, 16],
        RADIUS_LIST=[1.0, 2.0],
        MLPS=[[16, 16, 32], [32, 32, 64]],
        LAYER_TYPE=["SA_Layer", "SA_Layer"],
        CTR_INDEX=[-1, -1],
        LAYER_INPUT=[0, 1],
        CONFIDENCE_MLPS=[[], [32]],
    )
    num_class = 3
    B, N = 2, 256

    key = jax.random.PRNGKey(0)
    k_xyz, k_int, k_par = jax.random.split(key, 3)
    xyz = jax.random.uniform(k_xyz, (B, N, 3), jnp.float32, minval=-2.0, maxval=2.0)
    intensity = jax.random.uniform(k_int, (B, N, 1), jnp.float32)
    batch_idx = jnp.repeat(jnp.arange(B, dtype=jnp.float32), N)[:, None]
    points = jnp.concatenate(
        [batch_idx, xyz.reshape(B * N, 3), intensity.reshape(B * N, 1)], axis=-1
    )  # (B*N, 5): [batch_idx, x, y, z, intensity]

    params = init_params(k_par, SA_CONFIG, num_class)

    batch_dict = {"batch_size": B, "points": points}
    out = pfe_forward(batch_dict, params, SA_CONFIG)

    last_feat = out["encoder_features"][-1]          # (B, 64, 64)  channel-first, as in torch
    last_cls = out["sa_ins_preds"][-1]               # (B, 64, 1 + num_class)
    jax.block_until_ready(last_feat)
    jax.block_until_ready(last_cls)
    assert last_feat.shape == (B, 64, 64)
    assert last_cls.shape == (B, 64, 1 + num_class)
    assert bool(jnp.all(jnp.isfinite(last_feat)))
    assert bool(jnp.all(jnp.isfinite(last_cls)))
    print("KERNEL_OK")
</pallas_src>

<mosaic_0001>
module attributes {stable_mosaic.version = 11 : i64} {
  func.func @kernel(%arg0: i32, %arg1: i32, %arg2: memref<1x16x64x8xbf16, #tpu.memory_space<vmem>>, %arg3: memref<8x16xbf16, #tpu.memory_space<vmem>>, %arg4: memref<1x16xf32, #tpu.memory_space<vmem>>, %arg5: memref<16x16xbf16, #tpu.memory_space<vmem>>, %arg6: memref<1x16xf32, #tpu.memory_space<vmem>>, %arg7: memref<16x32xbf16, #tpu.memory_space<vmem>>, %arg8: memref<1x32xf32, #tpu.memory_space<vmem>>, %arg9: memref<1x64x128xbf16, #tpu.memory_space<vmem>>) attributes {dimension_semantics = [#tpu.dimension_semantics<parallel>, #tpu.dimension_semantics<parallel>], iteration_bounds = array<i64: 2, 2>, scalar_prefetch = 0 : i64, scratch_operands = 0 : i64, tpu.core_type = #tpu.core_type<tc>, window_params = [{transform_indices = @transform_0, window_bounds = array<i64: 1, 16, 64, 8>}, {pipeline_mode = #tpu.pipeline_mode<synchronous>, transform_indices = @transform_1, window_bounds = array<i64: 8, 16>}, {pipeline_mode = #tpu.pipeline_mode<synchronous>, transform_indices = @transform_2, window_bounds = array<i64: 1, 16>}, {pipeline_mode = #tpu.pipeline_mode<synchronous>, transform_indices = @transform_3, window_bounds = array<i64: 16, 16>}, {pipeline_mode = #tpu.pipeline_mode<synchronous>, transform_indices = @transform_4, window_bounds = array<i64: 1, 16>}, {pipeline_mode = #tpu.pipeline_mode<synchronous>, transform_indices = @transform_5, window_bounds = array<i64: 16, 32>}, {pipeline_mode = #tpu.pipeline_mode<synchronous>, transform_indices = @transform_6, window_bounds = array<i64: 1, 32>}, {transform_indices = @transform_7, window_bounds = array<i64: 1, 64, 128>}]} {
    %c0 = arith.constant 0 : index
    %c0_0 = arith.constant 0 : index
    %0 = vector.load %arg3[%c0, %c0_0] : memref<8x16xbf16, #tpu.memory_space<vmem>>, vector<8x16xbf16>
    %c0_1 = arith.constant 0 : index
    %c0_2 = arith.constant 0 : index
    %1 = vector.load %arg5[%c0_1, %c0_2] : memref<16x16xbf16, #tpu.memory_space<vmem>>, vector<16x16xbf16>
    %c0_3 = arith.constant 0 : index
    %c0_4 = arith.constant 0 : index
    %2 = vector.load %arg7[%c0_3, %c0_4] : memref<16x32xbf16, #tpu.memory_space<vmem>>, vector<16x32xbf16>
    %c0_5 = arith.constant 0 : index
    %c0_6 = arith.constant 0 : index
    %3 = vector.load %arg4[%c0_5, %c0_6] : memref<1x16xf32, #tpu.memory_space<vmem>>, vector<1x16xf32>
    %c0_7 = arith.constant 0 : index
    %c0_8 = arith.constant 0 : index
    %4 = vector.load %arg6[%c0_7, %c0_8] : memref<1x16xf32, #tpu.memory_space<vmem>>, vector<1x16xf32>
    %c0_9 = arith.constant 0 : index
    %c0_10 = arith.constant 0 : index
    %5 = vector.load %arg8[%c0_9, %c0_10] : memref<1x32xf32, #tpu.memory_space<vmem>>, vector<1x32xf32>
    %cst = arith.constant 0xFF800000 : f32
    %6 = vector.broadcast %cst : f32 to vector<64x32xf32>
    %c0_11 = arith.constant 0 : index
    %c0_12 = arith.constant 0 : index
    %c0_13 = arith.constant 0 : index
    %c0_14 = arith.constant 0 : index
    %7 = vector.load %arg2[%c0_11, %c0_12, %c0_13, %c0_14] : memref<1x16x64x8xbf16, #tpu.memory_space<vmem>>, vector<1x8x64x8xbf16>
    %8 = vector.shape_cast %7 : vector<1x8x64x8xbf16> to vector<8x64x8xbf16>
    %9 = vector.shape_cast %8 : vector<8x64x8xbf16> to vector<512x8xbf16>
    %cst_15 = arith.constant dense<0.000000e+00> : vector<512x16xf32>
    %10 = tpu.matmul %9, %0, %cst_15 {dimension_numbers = #tpu.dot_dimension_numbers<[1], [0], [0], [1], [0, 0, 1, 1], [], []>} : vector<512x8xbf16>, vector<8x16xbf16>, vector<512x16xf32> -> vector<512x16xf32>
    %11 = vector.broadcast %3 : vector<1x16xf32> to vector<512x16xf32>
    %12 = arith.addf %10, %11 : vector<512x16xf32>
    %cst_16 = arith.constant 0.000000e+00 : f32
    %13 = vector.broadcast %cst_16 : f32 to vector<512x16xf32>
    %14 = arith.maximumf %12, %13 : vector<512x16xf32>
    %15 = arith.truncf %14 : vector<512x16xf32> to vector<512x16xbf16>
    %cst_17 = arith.constant dense<0.000000e+00> : vector<512x16xf32>
    %16 = tpu.matmul %15, %1, %cst_17 {dimension_numbers = #tpu.dot_dimension_numbers<[1], [0], [0], [1], [0, 0, 1, 1], [], []>} : vector<512x16xbf16>, vector<16x16xbf16>, vector<512x16xf32> -> vector<512x16xf32>
    %17 = vector.broadcast %4 : vector<1x16xf32> to vector<512x16xf32>
    %18 = arith.addf %16, %17 : vector<512x16xf32>
    %cst_18 = arith.constant 0.000000e+00 : f32
    %19 = vector.broadcast %cst_18 : f32 to vector<512x16xf32>
    %20 = arith.maximumf %18, %19 : vector<512x16xf32>
    %21 = arith.truncf %20 : vector<512x16xf32> to vector<512x16xbf16>
    %cst_19 = arith.constant dense<0.000000e+00> : vector<512x32xf32>
    %22 = tpu.matmul %21, %2, %cst_19 {dimension_numbers = #tpu.dot_dimension_numbers<[1], [0], [0], [1], [0, 0, 1, 1], [], []>} : vector<512x16xbf16>, vector<16x32xbf16>, vector<512x32xf32> -> vector<512x32xf32>
    %23 = vector.shape_cast %22 : vector<512x32xf32> to vector<8x64x32xf32>
    %cst_20 = arith.constant dense<0xFF800000> : vector<64x32xf32>
    %24 = vector.multi_reduction <maximumf>, %23, %cst_20 [0] : vector<8x64x32xf32> to vector<64x32xf32>
    %25 = arith.maximumf %6, %24 : vector<64x32xf32>
    %c0_21 = arith.constant 0 : index
    %c8 = arith.constant 8 : index
    %c0_22 = arith.constant 0 : index
    %c0_23 = arith.constant 0 : index
    %26 = vector.load %arg2[%c0_21, %c8, %c0_22, %c0_23] : memref<1x16x64x8xbf16, #tpu.memory_space<vmem>>, vector<1x8x64x8xbf16>
    %27 = vector.shape_cast %26 : vector<1x8x64x8xbf16> to vector<8x64x8xbf16>
    %28 = vector.shape_cast %27 : vector<8x64x8xbf16> to vector<512x8xbf16>
    %cst_24 = arith.constant dense<0.000000e+00> : vector<512x16xf32>
    %29 = tpu.matmul %28, %0, %cst_24 {dimension_numbers = #tpu.dot_dimension_numbers<[1], [0], [0], [1], [0, 0, 1, 1], [], []>} : vector<512x8xbf16>, vector<8x16xbf16>, vector<512x16xf32> -> vector<512x16xf32>
    %30 = vector.broadcast %3 : vector<1x16xf32> to vector<512x16xf32>
    %31 = arith.addf %29, %30 : vector<512x16xf32>
    %cst_25 = arith.constant 0.000000e+00 : f32
    %32 = vector.broadcast %cst_25 : f32 to vector<512x16xf32>
    %33 = arith.maximumf %31, %32 : vector<512x16xf32>
    %34 = arith.truncf %33 : vector<512x16xf32> to vector<512x16xbf16>
    %cst_26 = arith.constant dense<0.000000e+00> : vector<512x16xf32>
    %35 = tpu.matmul %34, %1, %cst_26 {dimension_numbers = #tpu.dot_dimension_numbers<[1], [0], [0], [1], [0, 0, 1, 1], [], []>} : vector<512x16xbf16>, vector<16x16xbf16>, vector<512x16xf32> -> vector<512x16xf32>
    %36 = vector.broadcast %4 : vector<1x16xf32> to vector<512x16xf32>
    %37 = arith.addf %35, %36 : vector<512x16xf32>
    %cst_27 = arith.constant 0.000000e+00 : f32
    %38 = vector.broadcast %cst_27 : f32 to vector<512x16xf32>
    %39 = arith.maximumf %37, %38 : vector<512x16xf32>
    %40 = arith.truncf %39 : vector<512x16xf32> to vector<512x16xbf16>
    %cst_28 = arith.constant dense<0.000000e+00> : vector<512x32xf32>
    %41 = tpu.matmul %40, %2, %cst_28 {dimension_numbers = #tpu.dot_dimension_numbers<[1], [0], [0], [1], [0, 0, 1, 1], [], []>} : vector<512x16xbf16>, vector<16x32xbf16>, vector<512x32xf32> -> vector<512x32xf32>
    %42 = vector.shape_cast %41 : vector<512x32xf32> to vector<8x64x32xf32>
    %cst_29 = arith.constant dense<0xFF800000> : vector<64x32xf32>
    %43 = vector.multi_reduction <maximumf>, %42, %cst_29 [0] : vector<8x64x32xf32> to vector<64x32xf32>
    %44 = arith.maximumf %25, %43 : vector<64x32xf32>
    %45 = vector.broadcast %5 : vector<1x32xf32> to vector<64x32xf32>
    %46 = arith.addf %44, %45 : vector<64x32xf32>
    %cst_30 = arith.constant 0.000000e+00 : f32
    %47 = vector.broadcast %cst_30 : f32 to vector<64x32xf32>
    %48 = arith.maximumf %46, %47 : vector<64x32xf32>
    %49 = arith.truncf %48 : vector<64x32xf32> to vector<64x32xbf16>
    %cst_31 = arith.constant 0.000000e+00 : bf16
    %50 = vector.broadcast %cst_31 : bf16 to vector<64x96xbf16>
    %51 = tpu.concatenate %49, %50 in 1 : vector<64x32xbf16>, vector<64x96xbf16> -> vector<64x128xbf16>
    %c0_32 = arith.constant 0 : index
    %c0_33 = arith.constant 0 : index
    %c0_34 = arith.constant 0 : index
    %52 = vector.load %arg9[%c0_32, %c0_33, %c0_34] : memref<1x64x128xbf16, #tpu.memory_space<vmem>>, vector<1x64x128xbf16>
    %53 = vector.shape_cast %52 : vector<1x64x128xbf16> to vector<64x128xbf16>
    %54 = vector.shape_cast %51 : vector<64x128xbf16> to vector<1x64x128xbf16>
    tpu.vector_store %arg9[%c0_32, %c0_33, %c0_34], %54 {strides = array<i32>} : memref<1x64x128xbf16, #tpu.memory_space<vmem>>, vector<1x64x128xbf16>,
    return
  }
  func.func @transform_0(%arg0: i32, %arg1: i32) -> (i32, i32, i32, i32) {
    %c0_i32 = arith.constant 0 : i32
    %c0_i32_0 = arith.constant 0 : i32
    %c0_i32_1 = arith.constant 0 : i32
    return %arg0, %c0_i32, %arg1, %c0_i32_0 : i32, i32, i32, i32
  }
  func.func @transform_1(%arg0: i32, %arg1: i32) -> (i32, i32) {
    %c0_i32 = arith.constant 0 : i32
    %c0_i32_0 = arith.constant 0 : i32
    %c0_i32_1 = arith.constant 0 : i32
    return %c0_i32, %c0_i32_0 : i32, i32
  }
  func.func @transform_2(%arg0: i32, %arg1: i32) -> (i32, i32) {
    %c0_i32 = arith.constant 0 : i32
    %c0_i32_0 = arith.constant 0 : i32
    %c0_i32_1 = arith.constant 0 : i32
    return %c0_i32, %c0_i32_0 : i32, i32
  }
  func.func @transform_3(%arg0: i32, %arg1: i32) -> (i32, i32) {
    %c0_i32 = arith.constant 0 : i32
    %c0_i32_0 = arith.constant 0 : i32
    %c0_i32_1 = arith.constant 0 : i32
    return %c0_i32, %c0_i32_0 : i32, i32
  }
  func.func @transform_4(%arg0: i32, %arg1: i32) -> (i32, i32) {
    %c0_i32 = arith.constant 0 : i32
    %c0_i32_0 = arith.constant 0 : i32
    %c0_i32_1 = arith.constant 0 : i32
    return %c0_i32, %c0_i32_0 : i32, i32
  }
  func.func @transform_5(%arg0: i32, %arg1: i32) -> (i32, i32) {
    %c0_i32 = arith.constant 0 : i32
    %c0_i32_0 = arith.constant 0 : i32
    %c0_i32_1 = arith.constant 0 : i32
    return %c0_i32, %c0_i32_0 : i32, i32
  }
  func.func @transform_6(%arg0: i32, %arg1: i32) -> (i32, i32) {
    %c0_i32 = arith.constant 0 : i32
    %c0_i32_0 = arith.constant 0 : i32
    %c0_i32_1 = arith.constant 0 : i32
    return %c0_i32, %c0_i32_0 : i32, i32
  }
  func.func @transform_7(%arg0: i32, %arg1: i32) -> (i32, i32, i32) {
    %c0_i32 = arith.constant 0 : i32
    %c0_i32_0 = arith.constant 0 : i32
    return %arg0, %arg1, %c0_i32 : i32, i32, i32
  }
}

</mosaic_0001>

<bundles_post_ra>
// kernel: tpu_custom_call.1
= control target key start
LH: loop header
LB: loop body
LE: loop exit
PB: predicated region body
PF: predicated region fallthrough
CT: control target
= control target key end

     0   :  { %12 = vsyncpa [#allocation4], 0  ;;  %s6833_s0 = inlined_call_operand.vmem [shape: bf16[2,16,128,8], index: 0, kind: input, shape index: {}]   ;;  %s6834_s1 = inlined_call_operand.vmem [shape: bf16[8,16], index: 1, kind: input, shape index: {}]   ;;  %s6835_s2 = inlined_call_operand.vmem [shape: f32[1,16], index: 2, kind: input, shape index: {}]   ;;  %s6836_s3 = inlined_call_operand.vmem [shape: bf16[16,16], index: 3, kind: input, shape index: {}]   ;;  %s6837_s4 = inlined_call_operand.vmem [shape: f32[1,16], index: 4, kind: input, shape index: {}]   ;;  %s6838_s5 = inlined_call_operand.vmem [shape: bf16[16,32], index: 5, kind: input, shape index: {}]   ;;  %s6839_s6 = inlined_call_operand.vmem [shape: f32[1,32], index: 6, kind: input, shape index: {}]   ;;  %s6840_s7 = inlined_call_operand.hbm [shape: bf16[2,128,128], index: 7, kind: output, shape index: {}]  }
   0x1   :  { %14 = vsyncpa [#allocation4 + $0x1], 0  ;;  %s5676_s24 = smov 0   ;;  %s5678_s25 = smov 0  }
   0x2   :  { %s5680_s26 = smov 0   ;;  %s5682_s27 = smov 0  }
   0x3   :  { %s5684_s28 = smov 0   ;;  %s5686_s29 = smov 0  }
   0x4   :  { %s5688_s30 = smov 0   ;;  %s5690_s8 = smov 0  }
   0x5 LB: > { %s4452_s9 = sadd.s32 4294967295, %s5631_s8   ;;  %s4453_s10 = sadd.s32 4294967294, %s5631_s8   ;;  %s5631_s8 = sphi %s5690_s8, %s20_s8   ;;  %s5627_s30 = sphi %s5688_s30, %s6861_s30   ;;  %s5623_s29 = sphi %s5686_s29, %s6860_s29   ;;  %s5619_s28 = sphi %s5684_s28, %s6859_s28   ;;  %s5615_s27 = sphi %s5682_s27, %s6858_s27   ;;  %s5611_s26 = sphi %s5680_s26, %s6857_s26   ;;  %s5607_s25 = sphi %s5678_s25, %s6856_s25   ;;  %s5603_s24 = sphi %s5676_s24, %s6855_s24  }
   0x6   : > { %s29_s11 = sadd.s32 1, %s5623_s29  ;;  %s32_s12 = sadd.s32 1, %s5627_s30 }
   0x7   : > { %p30_p0 = scmp.ge.s32.totalorder %s29_s11, 2  ;;  %p48_p1 = scmp.ne.s32.totalorder %s5611_s26, %s5607_s25 }
   0x8   : > { %p49_p2 = scmp.eq.s32.totalorder %s5631_s8, 0  ;;  %p206_p5 = scmp.eq.s32.totalorder %s4452_s9, 3 }
   0x9   : > { %s6863_s11 = smov (%p30_p0, %s29_s11), 0  ;;  %s6865_s12 = smov (!%p30_p0, %s32_s12), %s5627_s30 }
   0xa   : > { %s37_s13 = ssub.s32 %s5623_s29, %s6863_s11  ;;  %p5728_p3 = por %p49_p2, %p48_p1 }
   0xb   : > { %p34_p4 = scmp.ge.s32.totalorder %s6865_s12, 2  ;;  %p211_p6 = scmp.ne.s32.totalorder %s5607_s25, %s5603_s24 }
   0xc   : > { %p212_p7 = scmp.eq.s32.totalorder %s4453_s10, 3  ;;  %p5736_p8 = por %p206_p5, %p48_p1 }
   0xd   : > { %s6867_s12 = smov (%p34_p4, %s6865_s12), 0  ;;  %s41_s19 = sadd.s32 1, %s5611_s26 }
   0xe   : > { %6843 = sst [smem:[#allocation6_spill]] %s6867_s12  ;;  %p5740_p9 = por %p212_p7, %p211_p6 }
   0xf   : > { %s36_s17 = ssub.s32 %s5627_s30, %s6867_s12  ;;  %p4455_p11 = scmp.ge.s32.totalorder %s5631_s8, 4 }
  0x10   : > { %s38_s18 = sor.u32 %s37_s13, %s36_s17 }
  0x11   : > { %p39_p10 = scmp.eq.s32.totalorder %s38_s18, 0  ;;  %246 = sbr.rel (%p4455_p11) target bundleno = 61 (0x3d), region = 40 }
  0x13   : > { %s5748_s20 = scalar_select %p39_p10, %s5611_s26, %s41_s19  }
  0x16   : > { %249 = sbr.rel (!%p5728_p3) target bundleno = 61 (0x3d), region = 44  ;;  %s251_s21 = sand.u32 (%p5728_p3), 1, %s5611_s26  }
  0x17   : > { %s4457_s22 = sshll.u32 (%p5728_p3), %s5623_s29, 3  ;;  %s4456_s23 = sshll.u32 (%p5728_p3), %s251_s21, 9 }
  0x18   : > { %s4458_s9 = sshll.u32 (%p5728_p3), %s5627_s30, 8  ;;  %s5764_s14 = scalar_lea.vmem (%p5728_p3), [#allocation2], %s4456_s23 }
  0x19   : > { %s256_s10 = sadd.s32 (%p5728_p3), %s4458_s9, %s4457_s22 }
  0x1a   : > { %s4459_s12 = sshll.u32 (%p5728_p3), %s256_s10, 2 }
  0x1b   : > { %s5759_s18 = scalar_lea.vmem %s6833_s0, %s4459_s12 }
  0x1c   : > { %v275_v0 = vld [vmem:[%s5759_s18] sm:$0xff]   ;;  %v279_v1 = vld [vmem:[%s5759_s18 + $0x8] sm:$0xff]   ;;  %v283_v2 = vld [vmem:[%s5759_s18 + $0x10] sm:$0xff]  }
  0x1d   : > { %276 = vst [vmem:[%s5764_s14] sm:$0xff] %v275_v0   ;;  %280 = vst [vmem:[%s5764_s14 + $0x8] sm:$0xff] %v279_v1   ;;  %v287_v3 = vld [vmem:[%s5759_s18 + $0x18] sm:$0xff]   ;;  %v291_v4 = vld [vmem:[%s5759_s18 + $0x40] sm:$0xff]  }
  0x1e   : > { %284 = vst [vmem:[%s5764_s14 + $0x10] sm:$0xff] %v283_v2   ;;  %v295_v5 = vld [vmem:[%s5759_s18 + $0x48] sm:$0xff]   ;;  %288 = vst [vmem:[%s5764_s14 + $0x18] sm:$0xff] %v287_v3   ;;  %v299_v6 = vld [vmem:[%s5759_s18 + $0x50] sm:$0xff]  }
  0x1f   : > { %292 = vst [vmem:[%s5764_s14 + $0x20] sm:$0xff] %v291_v4   ;;  %296 = vst [vmem:[%s5764_s14 + $0x28] sm:$0xff] %v295_v5   ;;  %v303_v7 = vld [vmem:[%s5759_s18 + $0x58] sm:$0xff]   ;;  %v307_v8 = vld [vmem:[%s5759_s18 + $0x80] sm:$0xff]  }
  0x20   : > { %300 = vst [vmem:[%s5764_s14 + $0x30] sm:$0xff] %v299_v6   ;;  %304 = vst [vmem:[%s5764_s14 + $0x38] sm:$0xff] %v303_v7   ;;  %v311_v9 = vld [vmem:[%s5759_s18 + $0x88] sm:$0xff]   ;;  %v315_v10 = vld [vmem:[%s5759_s18 + $0x90] sm:$0xff]  }
  0x21   : > { %308 = vst [vmem:[%s5764_s14 + $0x40] sm:$0xff] %v307_v8   ;;  %v319_v11 = vld [vmem:[%s5759_s18 + $0x98] sm:$0xff]   ;;  %312 = vst [vmem:[%s5764_s14 + $0x48] sm:$0xff] %v311_v9   ;;  %v323_v12 = vld [vmem:[%s5759_s18 + $0xc0] sm:$0xff]  }
  0x22   : > { %316 = vst [vmem:[%s5764_s14 + $0x50] sm:$0xff] %v315_v10   ;;  %320 = vst [vmem:[%s5764_s14 + $0x58] sm:$0xff] %v319_v11   ;;  %v327_v13 = vld [vmem:[%s5759_s18 + $0xc8] sm:$0xff]   ;;  %v331_v14 = vld [vmem:[%s5759_s18 + $0xd0] sm:$0xff]  }
  0x23   : > { %324 = vst [vmem:[%s5764_s14 + $0x60] sm:$0xff] %v323_v12   ;;  %328 = vst [vmem:[%s5764_s14 + $0x68] sm:$0xff] %v327_v13   ;;  %v335_v15 = vld [vmem:[%s5759_s18 + $0xd8] sm:$0xff]   ;;  %v339_v16 = vld [vmem:[%s5759_s18 + $0x100] sm:$0xff]  }
  0x24   : > { %332 = vst [vmem:[%s5764_s14 + $0x70] sm:$0xff] %v331_v14   ;;  %v343_v17 = vld [vmem:[%s5759_s18 + $0x108] sm:$0xff]   ;;  %336 = vst [vmem:[%s5764_s14 + $0x78] sm:$0xff] %v335_v15   ;;  %v347_v18 = vld [vmem:[%s5759_s18 + $0x110] sm:$0xff]  }
  0x25   : > { %340 = vst [vmem:[%s5764_s14 + $0x80] sm:$0xff] %v339_v16   ;;  %344 = vst [vmem:[%s5764_s14 + $0x88] sm:$0xff] %v343_v17   ;;  %v351_v19 = vld [vmem:[%s5759_s18 + $0x118] sm:$0xff]   ;;  %v355_v20 = vld [vmem:[%s5759_s18 + $0x140] sm:$0xff]  }
  0x26   : > { %348 = vst [vmem:[%s5764_s14 + $0x90] sm:$0xff] %v347_v18   ;;  %352 = vst [vmem:[%s5764_s14 + $0x98] sm:$0xff] %v351_v19   ;;  %v359_v21 = vld [vmem:[%s5759_s18 + $0x148] sm:$0xff]   ;;  %v363_v22 = vld [vmem:[%s5759_s18 + $0x150] sm:$0xff]  }
  0x27   : > { %356 = vst [vmem:[%s5764_s14 + $0xa0] sm:$0xff] %v355_v20   ;;  %v367_v23 = vld [vmem:[%s5759_s18 + $0x158] sm:$0xff]   ;;  %360 = vst [vmem:[%s5764_s14 + $0xa8] sm:$0xff] %v359_v21   ;;  %v371_v24 = vld [vmem:[%s5759_s18 + $0x180] sm:$0xff]  }
  0x28   : > { %364 = vst [vmem:[%s5764_s14 + $0xb0] sm:$0xff] %v363_v22   ;;  %368 = vst [vmem:[%s5764_s14 + $0xb8] sm:$0xff] %v367_v23   ;;  %v375_v25 = vld [vmem:[%s5759_s18 + $0x188] sm:$0xff]   ;;  %v379_v26 = vld [vmem:[%s5759_s18 + $0x190] sm:$0xff]  }
  0x29   : > { %372 = vst [vmem:[%s5764_s14 + $0xc0] sm:$0xff] %v371_v24   ;;  %376 = vst [vmem:[%s5764_s14 + $0xc8] sm:$0xff] %v375_v25   ;;  %v383_v27 = vld [vmem:[%s5759_s18 + $0x198] sm:$0xff]   ;;  %v387_v28 = vld [vmem:[%s5759_s18 + $0x1c0] sm:$0xff]  }
  0x2a   : > { %380 = vst [vmem:[%s5764_s14 + $0xd0] sm:$0xff] %v379_v26   ;;  %v391_v29 = vld [vmem:[%s5759_s18 + $0x1c8] sm:$0xff]   ;;  %384 = vst [vmem:[%s5764_s14 + $0xd8] sm:$0xff] %v383_v27   ;;  %v395_v30 = vld [vmem:[%s5759_s18 + $0x1d0] sm:$0xff]  }
  0x2b   : > { %388 = vst [vmem:[%s5764_s14 + $0xe0] sm:$0xff] %v387_v28   ;;  %392 = vst [vmem:[%s5764_s14 + $0xe8] sm:$0xff] %v391_v29   ;;  %v399_v31 = vld [vmem:[%s5759_s18 + $0x1d8] sm:$0xff]   ;;  %v403_v32 = vld [vmem:[%s5759_s18 + $0x200] sm:$0xff]  }
  0x2c   : > { %396 = vst [vmem:[%s5764_s14 + $0xf0] sm:$0xff] %v395_v30   ;;  %400 = vst [vmem:[%s5764_s14 + $0xf8] sm:$0xff] %v399_v31   ;;  %v407_v33 = vld [vmem:[%s5759_s18 + $0x208] sm:$0xff]   ;;  %v411_v34 = vld [vmem:[%s5759_s18 + $0x210] sm:$0xff]  }
  0x2d   : > { %404 = vst [vmem:[%s5764_s14 + $0x100] sm:$0xff] %v403_v32   ;;  %v415_v35 = vld [vmem:[%s5759_s18 + $0x218] sm:$0xff]   ;;  %408 = vst [vmem:[%s5764_s14 + $0x108] sm:$0xff] %v407_v33   ;;  %v419_v36 = vld [vmem:[%s5759_s18 + $0x240] sm:$0xff]  }
  0x2e   : > { %412 = vst [vmem:[%s5764_s14 + $0x110] sm:$0xff] %v411_v34   ;;  %416 = vst [vmem:[%s5764_s14 + $0x118] sm:$0xff] %v415_v35   ;;  %v423_v37 = vld [vmem:[%s5759_s18 + $0x248] sm:$0xff]   ;;  %v427_v38 = vld [vmem:[%s5759_s18 + $0x250] sm:$0xff]  }
  0x2f   : > { %420 = vst [vmem:[%s5764_s14 + $0x120] sm:$0xff] %v419_v36   ;;  %424 = vst [vmem:[%s5764_s14 + $0x128] sm:$0xff] %v423_v37   ;;  %v431_v39 = vld [vmem:[%s5759_s18 + $0x258] sm:$0xff]   ;;  %v435_v40 = vld [vmem:[%s5759_s18 + $0x280] sm:$0xff]  }
  0x30   : > { %428 = vst [vmem:[%s5764_s14 + $0x130] sm:$0xff] %v427_v38   ;;  %v439_v41 = vld [vmem:[%s5759_s18 + $0x288] sm:$0xff]   ;;  %432 = vst [vmem:[%s5764_s14 + $0x138] sm:$0xff] %v431_v39   ;;  %v443_v42 = vld [vmem:[%s5759_s18 + $0x290] sm:$0xff]  }
  0x31   : > { %436 = vst [vmem:[%s5764_s14 + $0x140] sm:$0xff] %v435_v40   ;;  %440 = vst [vmem:[%s5764_s14 + $0x148] sm:$0xff] %v439_v41   ;;  %v447_v43 = vld [vmem:[%s5759_s18 + $0x298] sm:$0xff]   ;;  %v451_v44 = vld [vmem:[%s5759_s18 + $0x2c0] sm:$0xff]  }
  0x32   : > { %444 = vst [vmem:[%s5764_s14 + $0x150] sm:$0xff] %v443_v42   ;;  %448 = vst [vmem:[%s5764_s14 + $0x158] sm:$0xff] %v447_v43   ;;  %v455_v45 = vld [vmem:[%s5759_s18 + $0x2c8] sm:$0xff]   ;;  %v459_v46 = vld [vmem:[%s5759_s18 + $0x2d0] sm:$0xff]  }
  0x33   : > { %452 = vst [vmem:[%s5764_s14 + $0x160] sm:$0xff] %v451_v44   ;;  %v463_v47 = vld [vmem:[%s5759_s18 + $0x2d8] sm:$0xff]   ;;  %456 = vst [vmem:[%s5764_s14 + $0x168] sm:$0xff] %v455_v45   ;;  %v467_v48 = vld [vmem:[%s5759_s18 + $0x300] sm:$0xff]  }
  0x34   : > { %460 = vst [vmem:[%s5764_s14 + $0x170] sm:$0xff] %v459_v46   ;;  %464 = vst [vmem:[%s5764_s14 + $0x178] sm:$0xff] %v463_v47   ;;  %v471_v49 = vld [vmem:[%s5759_s18 + $0x308] sm:$0xff]   ;;  %v475_v50 = vld [vmem:[%s5759_s18 + $0x310] sm:$0xff]  }
  0x35   : > { %468 = vst [vmem:[%s5764_s14 + $0x180] sm:$0xff] %v467_v48   ;;  %472 = vst [vmem:[%s5764_s14 + $0x188] sm:$0xff] %v471_v49   ;;  %v479_v51 = vld [vmem:[%s5759_s18 + $0x318] sm:$0xff]   ;;  %v483_v52 = vld [vmem:[%s5759_s18 + $0x340] sm:$0xff]  }
  0x36   : > { %476 = vst [vmem:[%s5764_s14 + $0x190] sm:$0xff] %v475_v50   ;;  %v487_v53 = vld [vmem:[%s5759_s18 + $0x348] sm:$0xff]   ;;  %480 = vst [vmem:[%s5764_s14 + $0x198] sm:$0xff] %v479_v51   ;;  %v491_v54 = vld [vmem:[%s5759_s18 + $0x350] sm:$0xff]  }
  0x37   : > { %484 = vst [vmem:[%s5764_s14 + $0x1a0] sm:$0xff] %v483_v52   ;;  %488 = vst [vmem:[%s5764_s14 + $0x1a8] sm:$0xff] %v487_v53   ;;  %v495_v55 = vld [vmem:[%s5759_s18 + $0x358] sm:$0xff]   ;;  %v499_v56 = vld [vmem:[%s5759_s18 + $0x380] sm:$0xff]  }
  0x38   : > { %492 = vst [vmem:[%s5764_s14 + $0x1b0] sm:$0xff] %v491_v54   ;;  %496 = vst [vmem:[%s5764_s14 + $0x1b8] sm:$0xff] %v495_v55   ;;  %v503_v57 = vld [vmem:[%s5759_s18 + $0x388] sm:$0xff]   ;;  %v507_v58 = vld [vmem:[%s5759_s18 + $0x390] sm:$0xff]  }
  0x39   : > { %500 = vst [vmem:[%s5764_s14 + $0x1c0] sm:$0xff] %v499_v56   ;;  %v511_v59 = vld [vmem:[%s5759_s18 + $0x398] sm:$0xff]   ;;  %504 = vst [vmem:[%s5764_s14 + $0x1c8] sm:$0xff] %v503_v57   ;;  %v515_v60 = vld [vmem:[%s5759_s18 + $0x3c0] sm:$0xff]  }
  0x3a   : > { %508 = vst [vmem:[%s5764_s14 + $0x1d0] sm:$0xff] %v507_v58   ;;  %512 = vst [vmem:[%s5764_s14 + $0x1d8] sm:$0xff] %v511_v59   ;;  %v519_v61 = vld [vmem:[%s5759_s18 + $0x3c8] sm:$0xff]   ;;  %v523_v62 = vld [vmem:[%s5759_s18 + $0x3d0] sm:$0xff]  }
  0x3b   : > { %516 = vst [vmem:[%s5764_s14 + $0x1e0] sm:$0xff] %v515_v60   ;;  %520 = vst [vmem:[%s5764_s14 + $0x1e8] sm:$0xff] %v519_v61   ;;  %v527_v63 = vld [vmem:[%s5759_s18 + $0x3d8] sm:$0xff]  }
  0x3c   : > { %524 = vst [vmem:[%s5764_s14 + $0x1f0] sm:$0xff] %v523_v62   ;;  %528 = vst [vmem:[%s5764_s14 + $0x1f8] sm:$0xff] %v527_v63  }
  0x3d PF: > { %p4460_p12 = scmp.ge.s32.totalorder %s5631_s8, 1  ;;  %p809_p13 = scmp.lt.s32.totalorder %s5631_s8, 5 }
  0x3f   : > { %p810_p0 = pnand %p4460_p12, %p809_p13 }
  0x40   : > { %s5897_s21 = sand.u32 (!%p810_p0), 1, %s5607_s25   ;;  %s4797_s14 = sshll.u32 (!%p810_p0), %s5615_s27, 3 }
  0x41   : > { %813 = sbr.rel (%p810_p0) target bundleno = 1168 (0x490), region = 85  ;;  %s4461_s22 = sshll.u32 (!%p810_p0), %s5897_s21, 9 }
  0x42   : > { %s5905_s23 = scalar_lea.vmem (!%p810_p0), [#allocation2], %s4461_s22  ;;  %s4462_s18 = sshll.u32 (!%p810_p0), %s5897_s21, 5 }
  0x43   : > { %s4798_s12 = sshll.u32 (!%p810_p0), %s5619_s28, 4  ;;  %s846_s19 = scalar_lea.vmem (!%p810_p0), [#allocation3], %s4462_s18 }
  0x44   : > { %s4364_s22 = sadd.s32 (!%p810_p0), %s4798_s12, %s4797_s14  ;;  %s4367_s28 = sshll.u32 (!%p810_p0), %s846_s19, 4  ;;  %s6780_s28 = int_to_ptr.vmem [resolvable:$true] %s4367_s28 }
  0x45   : > { %s4799_s27 = sshll.u32 (!%p810_p0), %s4364_s22, 6  ;;  %s4352_s13 = scalar_lea.sflag (!%p810_p0), [#allocation4], %s5897_s21 }
  0x46   : > { %v850_v0 = vld [vmem:[%s6834_s1] sm:$0xf]  ;;  %vm1185_vm0 = vcmask 1043456   ;;  %vm1088_vm1 = vcmask 64512   ;;  %v5472_v3 = vld [vmem:[%s5905_s23 + $0x8] sm:$0xff]   ;;  %v5473_v4 = vld [vmem:[%s5905_s23 + $0x10] sm:$0xff]   ;;  %s6778_s10 = scalar_lea.hbm %s6840_s7, %s4799_s27 }
  0x47   : > { %5396 = vmatprep.subr.msk.bf16.mxu0 %vm1185_vm0, %v850_v0  ;;  %v5901_v1 = vsel %vm1185_vm0, %v850_v0, 0  ;;  %v5471_v2 = vld [vmem:[%s5905_s23] sm:$0xff]   ;;  %v5474_v5 = vld [vmem:[%s5905_s23 + $0x18] sm:$0xff]   ;;  %v5476_v7 = vld [vmem:[%s5905_s23 + $0x28] sm:$0xff]   ;;  %vm1586_vm2 = vcmask 130048   ;;  %vm2459_vm3 = vcmask 261120  }
  0x48   : > { %5001 = vmatpush3.bf16.msra.mxu0 %v5901_v1  ;;  %5002 = vmatprep.mubr.msk.bf16.mxu0 %vm1088_vm1, %v5471_v2  ;;  %v5475_v6 = vld [vmem:[%s5905_s23 + $0x20] sm:$0xff]   ;;  %v5477_v8 = vld [vmem:[%s5905_s23 + $0x30] sm:$0xff]   ;;  %v5478_v9 = vld [vmem:[%s5905_s23 + $0x38] sm:$0xff]   ;;  %s5539_s17 = scalar_lea.vmem %s6780_s28, 512  ;;  %s5633_s18 = smov [#allocation3]  }
  0x49   : > { %v5479_v10 = vld [vmem:[%s5905_s23 + $0x40] sm:$0xff]   ;;  %v5480_v11 = vld [vmem:[%s5905_s23 + $0x48] sm:$0xff]   ;;  %v5481_v12 = vld [vmem:[%s5905_s23 + $0x50] sm:$0xff]   ;;  %p5540_p1 = scmp.ne.s32.totalorder %s6780_s28, %s5539_s17  ;;  %s5543_s14 = sshll.u32 %s5633_s18, 4  ;;  %s5544_s14 = int_to_ptr.vmem [resolvable:$false] %s5543_s14 }
  0x4a   : > { %v5482_v13 = vld [vmem:[%s5905_s23 + $0x58] sm:$0xff]   ;;  %v5483_v14 = vld [vmem:[%s5905_s23 + $0x60] sm:$0xff]   ;;  %v5484_v15 = vld [vmem:[%s5905_s23 + $0x68] sm:$0xff]   ;;  %s5545_s12 = scalar_lea.vmem %s5544_s14, 1024  ;;  %p5546_p4 = scmp.lt.s32.totalorder %s6780_s28, %s5544_s14 }
  0x4b   : > { %5003 = vmatmul.mubr.msk.bf16.vlgmr.msra.gmra.mxu0 %vm1088_vm1, %v5472_v3  ;;  %v5485_v16 = vld [vmem:[%s5905_s23 + $0x70] sm:$0xff]   ;;  %v5486_v17 = vld [vmem:[%s5905_s23 + $0x78] sm:$0xff]   ;;  %v5487_v18 = vld [vmem:[%s5905_s23 + $0x80] sm:$0xff]   ;;  %p5541_p2 = pnand %p5540_p1, %p5736_p8  ;;  %p5547_p5 = scmp.lt.s32.totalorder %s5545_s12, %s5539_s17 }
  0x4c   : > { %5006 = vmatprep.mubr.msk.bf16.mxu0 %vm1088_vm1, %v5473_v4  ;;  %v5488_v19 = vld [vmem:[%s5905_s23 + $0x88] sm:$0xff]   ;;  %v5489_v20 = vld [vmem:[%s5905_s23 + $0x90] sm:$0xff]   ;;  %v5490_v21 = vld [vmem:[%s5905_s23 + $0x98] sm:$0xff]  }
  0x4d   : > { %v5491_v22 = vld [vmem:[%s5905_s23 + $0xa0] sm:$0xff]   ;;  %v5492_v24 = vld [vmem:[%s5905_s23 + $0xa8] sm:$0xff]   ;;  %v5493_v25 = vld [vmem:[%s5905_s23 + $0xb0] sm:$0xff]   ;;  %p5542_p3 = pneg %p5541_p2  ;;  %p5548_p6 = por %p5547_p5, %p5546_p4 }
  0x4e   : > { %v5951_v23 = vld [vmem:[%s6836_s3] sm:$0xff]   ;;  %v5494_v26 = vld [vmem:[%s5905_s23 + $0xb8] sm:$0xff]   ;;  %v5496_v28 = vld [vmem:[%s5905_s23 + $0xc8] sm:$0xff]  }
  0x4f   : > { %5066 = vmatprep.subr.bf16.mxu1 %v5951_v23  ;;  %v5495_v27 = vld [vmem:[%s5905_s23 + $0xc0] sm:$0xff]   ;;  %v5497_v29 = vld [vmem:[%s5905_s23 + $0xd0] sm:$0xff]   ;;  %v5498_v30 = vld [vmem:[%s5905_s23 + $0xd8] sm:$0xff]   ;;  %p5549_p7 = pnand %p5548_p6, %p5542_p3 }
  0x50   : > { %5067 = vmatpush3.bf16.msra.mxu1 %v5951_v23  ;;  %v5499_v31 = vld [vmem:[%s5905_s23 + $0xe0] sm:$0xff]   ;;  %v5500_v32 = vld [vmem:[%s5905_s23 + $0xe8] sm:$0xff]   ;;  %v5501_v33 = vld [vmem:[%s5905_s23 + $0xf0] sm:$0xff]  }
  0x51   : > { %5397 = vmatprep.subr.msk.bf16.mxu1 %vm1185_vm0, %v850_v0  ;;  %v5502_v34 = vld [vmem:[%s5905_s23 + $0xf8] sm:$0xff]   ;;  %v5982_v35 = vld [vmem:[%s6838_s5] sm:$0xff]  }
  0x52   : > { %5132 = vmatprep.subr.bf16.mxu0 %v5982_v35  ;;  %v5990_v38 = vld [vmem:[%s6835_s2] ss:$0 sm:$0xff] }
  0x53   : > { %5007 = vmatmul.mubr.msk.bf16.gmra.mxu0 %vm1088_vm1, %v5474_v5 }
  0x54   : > { %5010 = vmatprep.mubr.msk.bf16.mxu0 %vm1088_vm1, %v5475_v6  ;;  %5133 = vmatpush3.bf16.msra.mxu0 %v5982_v35 }
  0x55   : > { %5264 = vmatprep.subr.bf16.mxu0 %v5951_v23 }
  0x5b   : > { %5011 = vmatmul.mubr.msk.bf16.gmra.mxu0 %vm1088_vm1, %v5476_v7 }
  0x5c   : > { %5014 = vmatprep.mubr.msk.bf16.mxu0 %vm1088_vm1, %v5477_v8 }
  0x63   : > { %5015 = vmatmul.mubr.msk.bf16.gmra.mxu0 %vm1088_vm1, %v5478_v9 }
  0x64   : > { %5018 = vmatprep.mubr.msk.bf16.mxu0 %vm1088_vm1, %v5479_v10 }
  0x6b   : > { %5019 = vmatmul.mubr.msk.bf16.gmra.mxu0 %vm1088_vm1, %v5480_v11 }
  0x6c   : > { %5022 = vmatprep.mubr.msk.bf16.mxu0 %vm1088_vm1, %v5481_v12 }
  0x73   : > { %5023 = vmatmul.mubr.msk.bf16.gmra.mxu0 %vm1088_vm1, %v5482_v13 }
  0x74   : > { %5026 = vmatprep.mubr.msk.bf16.mxu0 %vm1088_vm1, %v5483_v14 }
  0x7b   : > { %5027 = vmatmul.mubr.msk.bf16.gmra.mxu0 %vm1088_vm1, %v5484_v15 }
  0x7c   : > { %5030 = vmatprep.mubr.msk.bf16.mxu0 %vm1088_vm1, %v5485_v16 }
  0x83   : > { %5031 = vmatmul.mubr.msk.bf16.gmra.mxu0 %vm1088_vm1, %v5486_v17 }
  0x84   : > { %5034 = vmatprep.mubr.msk.bf16.mxu0 %vm1088_vm1, %v5487_v18 }
  0x8b   : > { %5035 = vmatmul.mubr.msk.bf16.gmra.mxu0 %vm1088_vm1, %v5488_v19 }
  0x8c   : > { %5038 = vmatprep.mubr.msk.bf16.mxu0 %vm1088_vm1, %v5489_v20 }
  0x93   : > { %5039 = vmatmul.mubr.msk.bf16.gmra.mxu0 %vm1088_vm1, %v5490_v21 }
  0x94   : > { %5042 = vmatprep.mubr.msk.bf16.mxu0 %vm1088_vm1, %v5491_v22 }
  0x9b   : > { %5043 = vmatmul.mubr.msk.bf16.gmra.mxu0 %vm1088_vm1, %v5492_v24 }
  0x9c   : > { %5046 = vmatprep.mubr.msk.bf16.mxu0 %vm1088_vm1, %v5493_v25 }
  0xa3   : > { %5047 = vmatmul.mubr.msk.bf16.gmra.mxu0 %vm1088_vm1, %v5494_v26 }
  0xa4   : > { %5050 = vmatprep.mubr.msk.bf16.mxu0 %vm1088_vm1, %v5495_v27 }
  0xab   : > { %5051 = vmatmul.mubr.msk.bf16.gmra.mxu0 %vm1088_vm1, %v5496_v28 }
  0xac   : > { %5054 = vmatprep.mubr.msk.bf16.mxu0 %vm1088_vm1, %v5497_v29 }
  0xb3   : > { %5055 = vmatmul.mubr.msk.bf16.gmra.mxu0 %vm1088_vm1, %v5498_v30 }
  0xb4   : > { %5058 = vmatprep.mubr.msk.bf16.mxu0 %vm1088_vm1, %v5499_v31 }
  0xbb   : > { %5059 = vmatmul.mubr.msk.bf16.gmra.mxu0 %vm1088_vm1, %v5500_v32 }
  0xbc   : > { %5062 = vmatprep.mubr.msk.bf16.mxu0 %vm1088_vm1, %v5501_v33 }
  0xc3   : > { %5063 = vmatmul.mubr.msk.bf16.gmra.mxu0 %vm1088_vm1, %v5502_v34 }
 0x10b   : > { %v5004_v36 = vpop.f32.mrf.mxu0 }
 0x10c   : > { %v1232_v42 = vadd.f32 %v5004_v36, %v5990_v38 }
 0x10d   : > { %v1223_v37 = vpop.f32.mrf.mxu0 }
 0x10e   : > { %v1224_v40 = vadd.f32 %v5990_v38, %v1223_v37  ;;  %v1480_v49 = vmax.f32 %v1232_v42, 0.0 }
 0x10f   : > { %v5005_v39 = vpop.f32.mrf.mxu0 }
 0x110   : > { %v1235_v41 = vadd.f32 %v5005_v39, %v5990_v38  ;;  %v1478_v47 = vmax.f32 %v1224_v40, 0.0 }
 0x111   : > { %v1226_v43 = vpop.f32.mrf.mxu0 }
 0x112   : > { %v1227_v44 = vadd.f32 %v5990_v38, %v1226_v43  ;;  %v1481_v45 = vmax.f32 %v1235_v41, 0.0 }
 0x113   : > { %v5008_v46 = vpop.f32.mrf.mxu0 }
 0x114   : > { %v1479_v48 = vmax.f32 %v1227_v44, 0.0  ;;  %v1543_v52 = vpack.c.bf16 %v1481_v45, %v1480_v49  ;;  %v1248_v56 = vadd.f32 %v5008_v46, %v5990_v38 }
 0x115   : > { %v1239_v50 = vpop.f32.mrf.mxu0 }
 0x116   : > { %v1542_v51 = vpack.c.bf16 %v1479_v48, %v1478_v47  ;;  %v1240_v54 = vadd.f32 %v5990_v38, %v1239_v50  ;;  %v1484_v63 = vmax.f32 %v1248_v56, 0.0 }
 0x117   : > { %v5009_v53 = vpop.f32.mrf.mxu0 }
 0x118   : > { %v1251_v55 = vadd.f32 %v5009_v53, %v5990_v38  ;;  %5068 = vmatprep.mubr.msk.bf16.mxu1 %vm1586_vm2, %v1542_v51  ;;  %v1482_v61 = vmax.f32 %v1240_v54, 0.0 }
 0x119   : > { %v1242_v57 = vpop.f32.mrf.mxu0  ;;  %5069 = vmatmul.mubr.msk.bf16.vlgmr.msra.gmra.mxu1 %vm1586_vm2, %v1543_v52 }
 0x11a   : > { %v1243_v58 = vadd.f32 %v5990_v38, %v1242_v57  ;;  %5199 = vmatpush3.bf16.msra.mxu1 %v5901_v1  ;;  %v1485_v59 = vmax.f32 %v1251_v55, 0.0 }
 0x11b   : > { %v5012_v60 = vpop.f32.mrf.mxu0  ;;  %5330 = vmatprep.subr.bf16.mxu1 %v5982_v35 }
 0x11c   : > { %v1483_v62 = vmax.f32 %v1243_v58, 0.0  ;;  %v1545_v3 = vpack.c.bf16 %v1485_v59, %v1484_v63  ;;  %v1264_v7 = vadd.f32 %v5012_v60, %v5990_v38 }
 0x11d   : > { %v1255_v0 = vpop.f32.mrf.mxu0 }
 0x11e   : > { %v1544_v2 = vpack.c.bf16 %v1483_v62, %v1482_v61  ;;  %v1256_v5 = vadd.f32 %v5990_v38, %v1255_v0  ;;  %v1488_v13 = vmax.f32 %v1264_v7, 0.0 }
 0x11f   : > { %v5013_v4 = vpop.f32.mrf.mxu0 }
 0x120   : > { %v1267_v6 = vadd.f32 %v5013_v4, %v5990_v38  ;;  %5072 = vmatprep.mubr.msk.bf16.mxu1 %vm1586_vm2, %v1544_v2  ;;  %v1486_v11 = vmax.f32 %v1256_v5, 0.0 }
 0x121   : > { %v1258_v1 = vpop.f32.mrf.mxu0  ;;  %5073 = vmatmul.mubr.msk.bf16.gmra.mxu1 %vm1586_vm2, %v1545_v3 }
 0x122   : > { %v1259_v8 = vadd.f32 %v5990_v38, %v1258_v1  ;;  %v1489_v9 = vmax.f32 %v1267_v6, 0.0 }
 0x123   : > { %v5016_v10 = vpop.f32.mrf.mxu0 }
 0x124   : > { %v1487_v12 = vmax.f32 %v1259_v8, 0.0  ;;  %v1547_v16 = vpack.c.bf16 %v1489_v9, %v1488_v13  ;;  %v1280_v20 = vadd.f32 %v5016_v10, %v5990_v38 }
 0x125   : > { %v1271_v14 = vpop.f32.mrf.mxu0 }
 0x126   : > { %v1546_v15 = vpack.c.bf16 %v1487_v12, %v1486_v11  ;;  %v1272_v18 = vadd.f32 %v5990_v38, %v1271_v14  ;;  %v1492_v28 = vmax.f32 %v1280_v20, 0.0 }
 0x127   : > { %v5017_v17 = vpop.f32.mrf.mxu0 }
 0x128   : > { %v1283_v19 = vadd.f32 %v5017_v17, %v5990_v38  ;;  %5076 = vmatprep.mubr.msk.bf16.mxu1 %vm1586_vm2, %v1546_v15  ;;  %v1490_v26 = vmax.f32 %v1272_v18, 0.0 }
 0x129   : > { %v1274_v21 = vpop.f32.mrf.mxu0  ;;  %5077 = vmatmul.mubr.msk.bf16.gmra.mxu1 %vm1586_vm2, %v1547_v16 }
 0x12a   : > { %v1275_v22 = vadd.f32 %v5990_v38, %v1274_v21  ;;  %v1493_v24 = vmax.f32 %v1283_v19, 0.0 }
 0x12b   : > { %v5020_v25 = vpop.f32.mrf.mxu0 }
 0x12c   : > { %v1491_v27 = vmax.f32 %v1275_v22, 0.0  ;;  %v1549_v31 = vpack.c.bf16 %v1493_v24, %v1492_v28  ;;  %v1296_v36 = vadd.f32 %v5020_v25, %v5990_v38 }
 0x12d   : > { %v1287_v29 = vpop.f32.mrf.mxu0 }
 0x12e   : > { %v1548_v30 = vpack.c.bf16 %v1491_v27, %v1490_v26  ;;  %v1288_v33 = vadd.f32 %v5990_v38, %v1287_v29  ;;  %v1496_v44 = vmax.f32 %v1296_v36, 0.0 }
 0x12f   : > { %v5021_v32 = vpop.f32.mrf.mxu0 }
 0x130   : > { %v1299_v34 = vadd.f32 %v5021_v32, %v5990_v38  ;;  %5080 = vmatprep.mubr.msk.bf16.mxu1 %vm1586_vm2, %v1548_v30  ;;  %v1494_v42 = vmax.f32 %v1288_v33, 0.0 }
 0x131   : > { %v1290_v37 = vpop.f32.mrf.mxu0  ;;  %5081 = vmatmul.mubr.msk.bf16.gmra.mxu1 %vm1586_vm2, %v1549_v31 }
 0x132   : > { %v1291_v39 = vadd.f32 %v5990_v38, %v1290_v37  ;;  %v1497_v40 = vmax.f32 %v1299_v34, 0.0 }
 0x133   : > { %v5024_v41 = vpop.f32.mrf.mxu0 }
 0x134   : > { %v1495_v43 = vmax.f32 %v1291_v39, 0.0  ;;  %v1551_v47 = vpack.c.bf16 %v1497_v40, %v1496_v44  ;;  %v1312_v51 = vadd.f32 %v5024_v41, %v5990_v38 }
 0x135   : > { %v1303_v45 = vpop.f32.mrf.mxu0 }
 0x136   : > { %v1550_v46 = vpack.c.bf16 %v1495_v43, %v1494_v42  ;;  %v1304_v49 = vadd.f32 %v5990_v38, %v1303_v45  ;;  %v1500_v58 = vmax.f32 %v1312_v51, 0.0 }
 0x137   : > { %v5025_v48 = vpop.f32.mrf.mxu0 }
 0x138   : > { %v1315_v50 = vadd.f32 %v5025_v48, %v5990_v38  ;;  %5084 = vmatprep.mubr.msk.bf16.mxu1 %vm1586_vm2, %v1550_v46  ;;  %v1498_v56 = vmax.f32 %v1304_v49, 0.0 }
 0x139   : > { %v1306_v52 = vpop.f32.mrf.mxu0  ;;  %5085 = vmatmul.mubr.msk.bf16.gmra.mxu1 %vm1586_vm2, %v1551_v47 }
 0x13a   : > { %v1307_v53 = vadd.f32 %v5990_v38, %v1306_v52  ;;  %v1501_v54 = vmax.f32 %v1315_v50, 0.0 }
 0x13b   : > { %v5028_v55 = vpop.f32.mrf.mxu0 }
 0x13c   : > { %v1499_v57 = vmax.f32 %v1307_v53, 0.0  ;;  %v1553_v61 = vpack.c.bf16 %v1501_v54, %v1500_v58  ;;  %v1328_v2 = vadd.f32 %v5028_v55, %v5990_v38 }
 0x13d   : > { %v1319_v59 = vpop.f32.mrf.mxu0 }
 0x13e   : > { %v1552_v60 = vpack.c.bf16 %v1499_v57, %v1498_v56  ;;  %v1320_v63 = vadd.f32 %v5990_v38, %v1319_v59  ;;  %v1504_v8 = vmax.f32 %v1328_v2, 0.0 }
 0x13f   : > { %v5029_v62 = vpop.f32.mrf.mxu0 }
 0x140   : > { %v1331_v0 = vadd.f32 %v5029_v62, %v5990_v38  ;;  %5088 = vmatprep.mubr.msk.bf16.mxu1 %vm1586_vm2, %v1552_v60  ;;  %v1502_v7 = vmax.f32 %v1320_v63, 0.0 }
 0x141   : > { %v1322_v3 = vpop.f32.mrf.mxu0  ;;  %5089 = vmatmul.mubr.msk.bf16.gmra.mxu1 %vm1586_vm2, %v1553_v61 }
 0x142   : > { %v1323_v4 = vadd.f32 %v5990_v38, %v1322_v3  ;;  %v1505_v5 = vmax.f32 %v1331_v0, 0.0 }
 0x143   : > { %v5032_v6 = vpop.f32.mrf.mxu0 }
 0x144   : > { %v1503_v1 = vmax.f32 %v1323_v4, 0.0  ;;  %v1555_v11 = vpack.c.bf16 %v1505_v5, %v1504_v8  ;;  %v1344_v15 = vadd.f32 %v5032_v6, %v5990_v38 }
 0x145   : > { %v1335_v9 = vpop.f32.mrf.mxu0 }
 0x146   : > { %v1554_v10 = vpack.c.bf16 %v1503_v1, %v1502_v7  ;;  %v1336_v13 = vadd.f32 %v5990_v38, %v1335_v9  ;;  %v1508_v22 = vmax.f32 %v1344_v15, 0.0 }
 0x147   : > { %v5033_v12 = vpop.f32.mrf.mxu0 }
 0x148   : > { %v1347_v14 = vadd.f32 %v5033_v12, %v5990_v38  ;;  %5092 = vmatprep.mubr.msk.bf16.mxu1 %vm1586_vm2, %v1554_v10  ;;  %v1506_v20 = vmax.f32 %v1336_v13, 0.0 }
 0x149   : > { %v1338_v16 = vpop.f32.mrf.mxu0  ;;  %5093 = vmatmul.mubr.msk.bf16.gmra.mxu1 %vm1586_vm2, %v1555_v11 }
 0x14a   : > { %v1339_v17 = vadd.f32 %v5990_v38, %v1338_v16  ;;  %v1509_v18 = vmax.f32 %v1347_v14, 0.0 }
 0x14b   : > { %v5036_v19 = vpop.f32.mrf.mxu0 }
 0x14c   : > { %v1507_v21 = vmax.f32 %v1339_v17, 0.0  ;;  %v1557_v26 = vpack.c.bf16 %v1509_v18, %v1508_v22  ;;  %v1360_v30 = vadd.f32 %v5036_v19, %v5990_v38 }
 0x14d   : > { %v1351_v24 = vpop.f32.mrf.mxu0 }
 0x14e   : > { %v1556_v25 = vpack.c.bf16 %v1507_v21, %v1506_v20  ;;  %v1352_v28 = vadd.f32 %v5990_v38, %v1351_v24  ;;  %v1512_v39 = vmax.f32 %v1360_v30, 0.0 }
 0x14f   : > { %v5037_v27 = vpop.f32.mrf.mxu0 }
 0x150   : > { %v1363_v29 = vadd.f32 %v5037_v27, %v5990_v38  ;;  %5096 = vmatprep.mubr.msk.bf16.mxu1 %vm1586_vm2, %v1556_v25  ;;  %v1510_v36 = vmax.f32 %v1352_v28, 0.0 }
 0x151   : > { %v1354_v31 = vpop.f32.mrf.mxu0  ;;  %5097 = vmatmul.mubr.msk.bf16.gmra.mxu1 %vm1586_vm2, %v1557_v26 }
 0x152   : > { %v1355_v32 = vadd.f32 %v5990_v38, %v1354_v31  ;;  %v1513_v33 = vmax.f32 %v1363_v29, 0.0 }
 0x153   : > { %v5040_v34 = vpop.f32.mrf.mxu0 }
 0x154   : > { %v1511_v37 = vmax.f32 %v1355_v32, 0.0  ;;  %v1559_v42 = vpack.c.bf16 %v1513_v33, %v1512_v39  ;;  %v1376_v46 = vadd.f32 %v5040_v34, %v5990_v38 }
 0x155   : > { %v1367_v40 = vpop.f32.mrf.mxu0 }
 0x156   : > { %v1558_v41 = vpack.c.bf16 %v1511_v37, %v1510_v36  ;;  %v1368_v44 = vadd.f32 %v5990_v38, %v1367_v40  ;;  %v1516_v53 = vmax.f32 %v1376_v46, 0.0 }
 0x157   : > { %v5041_v43 = vpop.f32.mrf.mxu0 }
 0x158   : > { %v1379_v45 = vadd.f32 %v5041_v43, %v5990_v38  ;;  %5100 = vmatprep.mubr.msk.bf16.mxu1 %vm1586_vm2, %v1558_v41  ;;  %v1514_v51 = vmax.f32 %v1368_v44, 0.0 }
 0x159   : > { %v1370_v47 = vpop.f32.mrf.mxu0  ;;  %5101 = vmatmul.mubr.msk.bf16.gmra.mxu1 %vm1586_vm2, %v1559_v42 }
 0x15a   : > { %v1371_v48 = vadd.f32 %v5990_v38, %v1370_v47  ;;  %v1517_v49 = vmax.f32 %v1379_v45, 0.0 }
 0x15b   : > { %v5044_v50 = vpop.f32.mrf.mxu0 }
 0x15c   : > { %v1515_v52 = vmax.f32 %v1371_v48, 0.0  ;;  %v1561_v56 = vpack.c.bf16 %v1517_v49, %v1516_v53  ;;  %v1392_v60 = vadd.f32 %v5044_v50, %v5990_v38 }
 0x15d   : > { %v1383_v54 = vpop.f32.mrf.mxu0 }
 0x15e   : > { %v1560_v55 = vpack.c.bf16 %v1515_v52, %v1514_v51  ;;  %v1384_v58 = vadd.f32 %v5990_v38, %v1383_v54  ;;  %v1520_v4 = vmax.f32 %v1392_v60, 0.0 }
 0x15f   : > { %v5045_v57 = vpop.f32.mrf.mxu0 }
 0x160   : > { %v1395_v59 = vadd.f32 %v5045_v57, %v5990_v38  ;;  %5104 = vmatprep.mubr.msk.bf16.mxu1 %vm1586_vm2, %v1560_v55  ;;  %v1518_v2 = vmax.f32 %v1384_v58, 0.0 }
 0x161   : > { %v1386_v61 = vpop.f32.mrf.mxu0  ;;  %5105 = vmatmul.mubr.msk.bf16.gmra.mxu1 %vm1586_vm2, %v1561_v56 }
 0x162   : > { %v1387_v62 = vadd.f32 %v5990_v38, %v1386_v61  ;;  %v1521_v63 = vmax.f32 %v1395_v59, 0.0 }
 0x163   : > { %v5048_v0 = vpop.f32.mrf.mxu0 }
 0x164   : > { %v1519_v3 = vmax.f32 %v1387_v62, 0.0  ;;  %v1563_v7 = vpack.c.bf16 %v1521_v63, %v1520_v4  ;;  %v1408_v10 = vadd.f32 %v5048_v0, %v5990_v38 }
 0x165   : > { %v1399_v5 = vpop.f32.mrf.mxu0 }
 0x166   : > { %v1562_v6 = vpack.c.bf16 %v1519_v3, %v1518_v2  ;;  %v1400_v8 = vadd.f32 %v5990_v38, %v1399_v5  ;;  %v1524_v17 = vmax.f32 %v1408_v10, 0.0 }
 0x167   : > { %v5049_v1 = vpop.f32.mrf.mxu0 }
 0x168   : > { %v1411_v9 = vadd.f32 %v5049_v1, %v5990_v38  ;;  %5108 = vmatprep.mubr.msk.bf16.mxu1 %vm1586_vm2, %v1562_v6  ;;  %v1522_v15 = vmax.f32 %v1400_v8, 0.0 }
 0x169   : > { %v1402_v11 = vpop.f32.mrf.mxu0  ;;  %5109 = vmatmul.mubr.msk.bf16.gmra.mxu1 %vm1586_vm2, %v1563_v7 }
 0x16a   : > { %v1403_v12 = vadd.f32 %v5990_v38, %v1402_v11  ;;  %v1525_v13 = vmax.f32 %v1411_v9, 0.0 }
 0x16b   : > { %v5052_v14 = vpop.f32.mrf.mxu0 }
 0x16c   : > { %v1523_v16 = vmax.f32 %v1403_v12, 0.0  ;;  %v1565_v20 = vpack.c.bf16 %v1525_v13, %v1524_v17  ;;  %v1424_v25 = vadd.f32 %v5052_v14, %v5990_v38  ;;  %v5505_v13 = vld [vmem:[%s5905_s23 + $0x100] sm:$0xff]  }
 0x16d   : > { %v1415_v18 = vpop.f32.mrf.mxu0  ;;  %v5509_v17 = vld [vmem:[%s5905_s23 + $0x120] sm:$0xff]  }
 0x16e   : > { %v1564_v19 = vpack.c.bf16 %v1523_v16, %v1522_v15  ;;  %v1416_v22 = vadd.f32 %v5990_v38, %v1415_v18  ;;  %v1528_v32 = vmax.f32 %v1424_v25, 0.0  ;;  %v5507_v15 = vld [vmem:[%s5905_s23 + $0x110] sm:$0xff]   ;;  %v5508_v16 = vld [vmem:[%s5905_s23 + $0x118] sm:$0xff]   ;;  %v5510_v18 = vld [vmem:[%s5905_s23 + $0x128] sm:$0xff]  }
 0x16f   : > { %v5053_v21 = vpop.f32.mrf.mxu0  ;;  %v5517_v25 = vld [vmem:[%s5905_s23 + $0x160] sm:$0xff]  }
 0x170   : > { %v1427_v24 = vadd.f32 %v5053_v21, %v5990_v38  ;;  %5112 = vmatprep.mubr.msk.bf16.mxu1 %vm1586_vm2, %v1564_v19  ;;  %v1526_v30 = vmax.f32 %v1416_v22, 0.0  ;;  %v5511_v19 = vld [vmem:[%s5905_s23 + $0x130] sm:$0xff]   ;;  %v5513_v21 = vld [vmem:[%s5905_s23 + $0x140] sm:$0xff]  }
 0x171   : > { %v1418_v26 = vpop.f32.mrf.mxu0  ;;  %5113 = vmatmul.mubr.msk.bf16.gmra.mxu1 %vm1586_vm2, %v1565_v20  ;;  %v5512_v20 = vld [vmem:[%s5905_s23 + $0x138] sm:$0xff]   ;;  %v5515_v22 = vld [vmem:[%s5905_s23 + $0x150] sm:$0xff]  }
 0x172   : > { %v1419_v27 = vadd.f32 %v5990_v38, %v1418_v26  ;;  %v1529_v28 = vmax.f32 %v1427_v24, 0.0  ;;  %v5516_v24 = vld [vmem:[%s5905_s23 + $0x158] sm:$0xff]   ;;  %v5518_v26 = vld [vmem:[%s5905_s23 + $0x168] sm:$0xff]  }
 0x173   : > { %v5056_v29 = vpop.f32.mrf.mxu0 }
 0x174   : > { %v1527_v31 = vmax.f32 %v1419_v27, 0.0  ;;  %v1567_v36 = vpack.c.bf16 %v1529_v28, %v1528_v32  ;;  %v1440_v41 = vadd.f32 %v5056_v29, %v5990_v38  ;;  %v5519_v27 = vld [vmem:[%s5905_s23 + $0x170] sm:$0xff]   ;;  %v5520_v28 = vld [vmem:[%s5905_s23 + $0x178] sm:$0xff]   ;;  %v5521_v29 = vld [vmem:[%s5905_s23 + $0x180] sm:$0xff]  }
 0x175   : > { %v1431_v33 = vpop.f32.mrf.mxu0 }
 0x176   : > { %v1566_v34 = vpack.c.bf16 %v1527_v31, %v1526_v30  ;;  %v1432_v39 = vadd.f32 %v5990_v38, %v1431_v33  ;;  %v1532_v48 = vmax.f32 %v1440_v41, 0.0  ;;  %v5522_v30 = vld [vmem:[%s5905_s23 + $0x188] sm:$0xff]   ;;  %v5523_v31 = vld [vmem:[%s5905_s23 + $0x190] sm:$0xff]   ;;  %v5525_v41 = vld [vmem:[%s5905_s23 + $0x1a0] sm:$0xff]  }
 0x177   : > { %v5057_v37 = vpop.f32.mrf.mxu0 }
 0x178   : > { %v1443_v40 = vadd.f32 %v5057_v37, %v5990_v38  ;;  %5116 = vmatprep.mubr.msk.bf16.mxu1 %vm1586_vm2, %v1566_v34  ;;  %v1530_v46 = vmax.f32 %v1432_v39, 0.0  ;;  %v6132_v34 = vld [vmem:[%s6837_s4] ss:$0 sm:$0xff]  ;;  %v5524_v37 = vld [vmem:[%s5905_s23 + $0x198] sm:$0xff]  }
 0x179   : > { %v1434_v42 = vpop.f32.mrf.mxu0  ;;  %5117 = vmatmul.mubr.msk.bf16.gmra.mxu1 %vm1586_vm2, %v1567_v36 }
 0x17a   : > { %v1435_v43 = vadd.f32 %v5990_v38, %v1434_v42  ;;  %v1533_v44 = vmax.f32 %v1443_v40, 0.0 }
 0x17b   : > { %v5060_v45 = vpop.f32.mrf.mxu0 }
 0x17c   : > { %v1531_v47 = vmax.f32 %v1435_v43, 0.0  ;;  %v1569_v51 = vpack.c.bf16 %v1533_v44, %v1532_v48  ;;  %v1456_v55 = vadd.f32 %v5060_v45, %v5990_v38 }
 0x17d   : > { %v1447_v49 = vpop.f32.mrf.mxu0 }
 0x17e   : > { %v1568_v50 = vpack.c.bf16 %v1531_v47, %v1530_v46  ;;  %v1448_v53 = vadd.f32 %v5990_v38, %v1447_v49  ;;  %v1536_v62 = vmax.f32 %v1456_v55, 0.0 }
 0x17f   : > { %v5061_v52 = vpop.f32.mrf.mxu0 }
 0x180   : > { %v1459_v54 = vadd.f32 %v5061_v52, %v5990_v38  ;;  %5120 = vmatprep.mubr.msk.bf16.mxu1 %vm1586_vm2, %v1568_v50  ;;  %v1534_v60 = vmax.f32 %v1448_v53, 0.0 }
 0x181   : > { %v1450_v56 = vpop.f32.mrf.mxu0  ;;  %5121 = vmatmul.mubr.msk.bf16.gmra.mxu1 %vm1586_vm2, %v1569_v51 }
 0x182   : > { %v1451_v57 = vadd.f32 %v5990_v38, %v1450_v56  ;;  %v1537_v58 = vmax.f32 %v1459_v54, 0.0  ;;  %v5526_v54 = vld [vmem:[%s5905_s23 + $0x1a8] sm:$0xff]  }
 0x183   : > { %v5064_v59 = vpop.f32.mrf.mxu0 }
 0x184   : > { %v1535_v61 = vmax.f32 %v1451_v57, 0.0  ;;  %v1571_v2 = vpack.c.bf16 %v1537_v58, %v1536_v62  ;;  %v1472_v6 = vadd.f32 %v5064_v59, %v5990_v38  ;;  %v5527_v57 = vld [vmem:[%s5905_s23 + $0x1b0] sm:$0xff]  }
 0x185   : > { %v1463_v63 = vpop.f32.mrf.mxu0 }
 0x186   : > { %v1570_v0 = vpack.c.bf16 %v1535_v61, %v1534_v60  ;;  %v1464_v4 = vadd.f32 %v5990_v38, %v1463_v63  ;;  %v1540_v11 = vmax.f32 %v1472_v6, 0.0 }
 0x187   : > { %v5065_v3 = vpop.f32.mrf.mxu0 }
 0x188   : > { %v1475_v5 = vadd.f32 %v5065_v3, %v5990_v38  ;;  %5124 = vmatprep.mubr.msk.bf16.mxu1 %vm1586_vm2, %v1570_v0  ;;  %v1538_v9 = vmax.f32 %v1464_v4, 0.0 }
 0x189   : > { %v1466_v7 = vpop.f32.mrf.mxu0  ;;  %5125 = vmatmul.mubr.msk.bf16.gmra.mxu1 %vm1586_vm2, %v1571_v2 }
 0x18a   : > { %v1467_v1 = vadd.f32 %v5990_v38, %v1466_v7  ;;  %v1541_v8 = vmax.f32 %v1475_v5, 0.0  ;;  %v5506_v38 = vld [vmem:[%s5905_s23 + $0x108] sm:$0xff]   ;;  %v5528_v7 = vld [vmem:[%s5905_s23 + $0x1b8] sm:$0xff]  }
 0x18c   : > { %v1539_v10 = vmax.f32 %v1467_v1, 0.0  ;;  %v1573_v14 = vpack.c.bf16 %v1541_v8, %v1540_v11 }
 0x18e   : > { %v1572_v12 = vpack.c.bf16 %v1539_v10, %v1538_v9 }
 0x190   : > { %5128 = vmatprep.mubr.msk.bf16.mxu1 %vm1586_vm2, %v1572_v12 }
 0x191   : > { %5129 = vmatmul.mubr.msk.bf16.gmra.mxu1 %vm1586_vm2, %v1573_v14 }
 0x192   : > { %5200 = vmatprep.mubr.msk.bf16.mxu1 %vm1088_vm1, %v5505_v13 }
 0x199   : > { %5201 = vmatmul.mubr.msk.bf16.vlgmr.msra.gmra.mxu1 %vm1088_vm1, %v5506_v38 }
 0x19a   : > { %5204 = vmatprep.mubr.msk.bf16.mxu1 %vm1088_vm1, %v5507_v15  ;;  %5331 = vmatpush3.bf16.msra.mxu1 %v5982_v35  ;;  %v5514_v35 = vld [vmem:[%s5905_s23 + $0x148] sm:$0xff]  }
 0x1a1   : > { %5205 = vmatmul.mubr.msk.bf16.gmra.mxu1 %vm1088_vm1, %v5508_v16 }
 0x1a2   : > { %5208 = vmatprep.mubr.msk.bf16.mxu1 %vm1088_vm1, %v5509_v17 }
 0x1a9   : > { %5209 = vmatmul.mubr.msk.bf16.gmra.mxu1 %vm1088_vm1, %v5510_v18 }
 0x1aa   : > { %5212 = vmatprep.mubr.msk.bf16.mxu1 %vm1088_vm1, %v5511_v19 }
 0x1b1   : > { %5213 = vmatmul.mubr.msk.bf16.gmra.mxu1 %vm1088_vm1, %v5512_v20  ;;  %v5530_v20 = vld [vmem:[%s5905_s23 + $0x1c8] sm:$0xff]  }
 0x1b2   : > { %5216 = vmatprep.mubr.msk.bf16.mxu1 %vm1088_vm1, %v5513_v21 }
 0x1b9   : > { %5217 = vmatmul.mubr.msk.bf16.gmra.mxu1 %vm1088_vm1, %v5514_v35 }
 0x1ba   : > { %5220 = vmatprep.mubr.msk.bf16.mxu1 %vm1088_vm1, %v5515_v22  ;;  %v5531_v22 = vld [vmem:[%s5905_s23 + $0x1d0] sm:$0xff]  }
 0x1c1   : > { %5221 = vmatmul.mubr.msk.bf16.gmra.mxu1 %vm1088_vm1, %v5516_v24 }
 0x1c2   : > { %5224 = vmatprep.mubr.msk.bf16.mxu1 %vm1088_vm1, %v5517_v25 }
 0x1c9   : > { %5225 = vmatmul.mubr.msk.bf16.gmra.mxu1 %vm1088_vm1, %v5518_v26 }
 0x1ca   : > { %5228 = vmatprep.mubr.msk.bf16.mxu1 %vm1088_vm1, %v5519_v27 }
 0x1d1   : > { %5229 = vmatmul.mubr.msk.bf16.gmra.mxu1 %vm1088_vm1, %v5520_v28 }
 0x1d2   : > { %5232 = vmatprep.mubr.msk.bf16.mxu1 %vm1088_vm1, %v5521_v29 }
 0x1d9   : > { %v5070_v32 = vpop.f32.mrf.mxu1  ;;  %5233 = vmatmul.mubr.msk.bf16.gmra.mxu1 %vm1088_vm1, %v5522_v30 }
 0x1da   : > { %5236 = vmatprep.mubr.msk.bf16.mxu1 %vm1088_vm1, %v5523_v31  ;;  %v1726_v42 = vadd.f32 %v5070_v32, %v6132_v34 }
 0x1db   : > { %v1717_v33 = vpop.f32.mrf.mxu1 }
 0x1dc   : > { %v1718_v39 = vadd.f32 %v6132_v34, %v1717_v33  ;;  %v1974_v49 = vmax.f32 %v1726_v42, 0.0  ;;  %v5533_v42 = vld [vmem:[%s5905_s23 + $0x1e0] sm:$0xff]  }
 0x1dd   : > { %v5071_v36 = vpop.f32.mrf.mxu1 }
 0x1de   : > { %v1729_v40 = vadd.f32 %v5071_v36, %v6132_v34  ;;  %v1972_v47 = vmax.f32 %v1718_v39, 0.0  ;;  %v5532_v39 = vld [vmem:[%s5905_s23 + $0x1d8] sm:$0xff]  }
 0x1df   : > { %v1720_v43 = vpop.f32.mrf.mxu1 }
 0x1e0   : > { %v1721_v44 = vadd.f32 %v6132_v34, %v1720_v43  ;;  %v1975_v45 = vmax.f32 %v1729_v40, 0.0 }
 0x1e1   : > { %v5074_v46 = vpop.f32.mrf.mxu1  ;;  %5237 = vmatmul.mubr.msk.bf16.gmra.mxu1 %vm1088_vm1, %v5524_v37 }
 0x1e2   : > { %v1973_v48 = vmax.f32 %v1721_v44, 0.0  ;;  %5240 = vmatprep.mubr.msk.bf16.mxu1 %vm1088_vm1, %v5525_v41  ;;  %v2037_v52 = vpack.c.bf16 %v1975_v45, %v1974_v49  ;;  %v1742_v58 = vadd.f32 %v5074_v46, %v6132_v34 }
 0x1e3   : > { %v1733_v50 = vpop.f32.mrf.mxu1 }
 0x1e4   : > { %v2036_v51 = vpack.c.bf16 %v1973_v48, %v1972_v47  ;;  %v1734_v55 = vadd.f32 %v6132_v34, %v1733_v50  ;;  %v1978_v2 = vmax.f32 %v1742_v58, 0.0  ;;  %v5535_v58 = vld [vmem:[%s5905_s23 + $0x1f0] sm:$0xff]  }
 0x1e5   : > { %v5075_v53 = vpop.f32.mrf.mxu1 }
 0x1e6   : > { %v1745_v56 = vadd.f32 %v5075_v53, %v6132_v34  ;;  %5134 = vmatprep.mubr.msk.bf16.mxu0 %vm1586_vm2, %v2036_v51  ;;  %v1976_v63 = vmax.f32 %v1734_v55, 0.0  ;;  %v5534_v55 = vld [vmem:[%s5905_s23 + $0x1e8] sm:$0xff]  }
 0x1e7   : > { %v1736_v59 = vpop.f32.mrf.mxu1  ;;  %5135 = vmatmul.mubr.msk.bf16.vlgmr.msra.gmra.mxu0 %vm1586_vm2, %v2037_v52 }
 0x1e8   : > { %v1737_v60 = vadd.f32 %v6132_v34, %v1736_v59  ;;  %5265 = vmatpush3.bf16.msra.mxu0 %v5951_v23  ;;  %v1979_v61 = vmax.f32 %v1745_v56, 0.0  ;;  %v5529_v23 = vld [vmem:[%s5905_s23 + $0x1c0] sm:$0xff]  }
 0x1e9   : > { %v5078_v62 = vpop.f32.mrf.mxu1  ;;  %5241 = vmatmul.mubr.msk.bf16.gmra.mxu1 %vm1088_vm1, %v5526_v54 }
 0x1ea   : > { %v1977_v0 = vmax.f32 %v1737_v60, 0.0  ;;  %5244 = vmatprep.mubr.msk.bf16.mxu1 %vm1088_vm1, %v5527_v57  ;;  %v2039_v5 = vpack.c.bf16 %v1979_v61, %v1978_v2  ;;  %v1758_v9 = vadd.f32 %v5078_v62, %v6132_v34 }
 0x1eb   : > { %v1749_v3 = vpop.f32.mrf.mxu1 }
 0x1ec   : > { %v2038_v4 = vpack.c.bf16 %v1977_v0, %v1976_v63  ;;  %v1750_v1 = vadd.f32 %v6132_v34, %v1749_v3  ;;  %v1982_v15 = vmax.f32 %v1758_v9, 0.0 }
 0x1ed   : > { %v5079_v6 = vpop.f32.mrf.mxu1 }
 0x1ee   : > { %v1761_v8 = vadd.f32 %v5079_v6, %v6132_v34  ;;  %5138 = vmatprep.mubr.msk.bf16.mxu0 %vm1586_vm2, %v2038_v4  ;;  %v1980_v14 = vmax.f32 %v1750_v1, 0.0  ;;  %v5536_v1 = vld [vmem:[%s5905_s23 + $0x1f8] sm:$0xff]  }
 0x1ef   : > { %v1752_v10 = vpop.f32.mrf.mxu1  ;;  %5139 = vmatmul.mubr.msk.bf16.gmra.mxu0 %vm1586_vm2, %v2039_v5 }
 0x1f0   : > { %v1753_v11 = vadd.f32 %v6132_v34, %v1752_v10  ;;  %v1983_v12 = vmax.f32 %v1761_v8, 0.0 }
 0x1f1   : > { %v5082_v13 = vpop.f32.mrf.mxu1  ;;  %5245 = vmatmul.mubr.msk.bf16.gmra.mxu1 %vm1088_vm1, %v5528_v7 }
 0x1f2   : > { %v1981_v38 = vmax.f32 %v1753_v11, 0.0  ;;  %5248 = vmatprep.mubr.msk.bf16.mxu1 %vm1088_vm1, %v5529_v23  ;;  %v2041_v18 = vpack.c.bf16 %v1983_v12, %v1982_v15  ;;  %v1774_v24 = vadd.f32 %v5082_v13, %v6132_v34 }
 0x1f3   : > { %v1765_v16 = vpop.f32.mrf.mxu1 }
 0x1f4   : > { %v2040_v17 = vpack.c.bf16 %v1981_v38, %v1980_v14  ;;  %v1766_v21 = vadd.f32 %v6132_v34, %v1765_v16  ;;  %v1986_v31 = vmax.f32 %v1774_v24, 0.0 }
 0x1f5   : > { %v5083_v19 = vpop.f32.mrf.mxu1 }
 0x1f6   : > { %v1777_v35 = vadd.f32 %v5083_v19, %v6132_v34  ;;  %5142 = vmatprep.mubr.msk.bf16.mxu0 %vm1586_vm2, %v2040_v17  ;;  %v1984_v29 = vmax.f32 %v1766_v21, 0.0 }
 0x1f7   : > { %v1768_v25 = vpop.f32.mrf.mxu1  ;;  %5143 = vmatmul.mubr.msk.bf16.gmra.mxu0 %vm1586_vm2, %v2041_v18 }
 0x1f8   : > { %v1769_v26 = vadd.f32 %v6132_v34, %v1768_v25  ;;  %v1987_v27 = vmax.f32 %v1777_v35, 0.0 }
 0x1f9   : > { %v5086_v28 = vpop.f32.mrf.mxu1  ;;  %5249 = vmatmul.mubr.msk.bf16.gmra.mxu1 %vm1088_vm1, %v5530_v20 }
 0x1fa   : > { %v1985_v30 = vmax.f32 %v1769_v26, 0.0  ;;  %5252 = vmatprep.mubr.msk.bf16.mxu1 %vm1088_vm1, %v5531_v22  ;;  %v2043_v36 = vpack.c.bf16 %v1987_v27, %v1986_v31  ;;  %v1790_v43 = vadd.f32 %v5086_v28, %v6132_v34 }
 0x1fb   : > { %v1781_v32 = vpop.f32.mrf.mxu1 }
 0x1fc   : > { %v2042_v33 = vpack.c.bf16 %v1985_v30, %v1984_v29  ;;  %v1782_v40 = vadd.f32 %v6132_v34, %v1781_v32  ;;  %v1990_v50 = vmax.f32 %v1790_v43, 0.0 }
 0x1fd   : > { %v5087_v37 = vpop.f32.mrf.mxu1 }
 0x1fe   : > { %v1793_v41 = vadd.f32 %v5087_v37, %v6132_v34  ;;  %5146 = vmatprep.mubr.msk.bf16.mxu0 %vm1586_vm2, %v2042_v33  ;;  %v1988_v48 = vmax.f32 %v1782_v40, 0.0 }
 0x1ff   : > { %v1784_v44 = vpop.f32.mrf.mxu1  ;;  %5147 = vmatmul.mubr.msk.bf16.gmra.mxu0 %vm1586_vm2, %v2043_v36 }
 0x200   : > { %v1785_v45 = vadd.f32 %v6132_v34, %v1784_v44  ;;  %v1991_v46 = vmax.f32 %v1793_v41, 0.0 }
 0x201   : > { %v5090_v47 = vpop.f32.mrf.mxu1  ;;  %5253 = vmatmul.mubr.msk.bf16.gmra.mxu1 %vm1088_vm1, %v5532_v39 }
 0x202   : > { %v1989_v49 = vmax.f32 %v1785_v45, 0.0  ;;  %5256 = vmatprep.mubr.msk.bf16.mxu1 %vm1088_vm1, %v5533_v42  ;;  %v2045_v53 = vpack.c.bf16 %v1991_v46, %v1990_v50  ;;  %v1806_v59 = vadd.f32 %v5090_v47, %v6132_v34 }
 0x203   : > { %v1797_v51 = vpop.f32.mrf.mxu1 }
 0x204   : > { %v2044_v52 = vpack.c.bf16 %v1989_v49, %v1988_v48  ;;  %v1798_v56 = vadd.f32 %v6132_v34, %v1797_v51  ;;  %v1994_v3 = vmax.f32 %v1806_v59, 0.0 }
 0x205   : > { %v5091_v54 = vpop.f32.mrf.mxu1 }
 0x206   : > { %v1809_v57 = vadd.f32 %v5091_v54, %v6132_v34  ;;  %5150 = vmatprep.mubr.msk.bf16.mxu0 %vm1586_vm2, %v2044_v52  ;;  %v1992_v0 = vmax.f32 %v1798_v56, 0.0 }
 0x207   : > { %v1800_v60 = vpop.f32.mrf.mxu1  ;;  %5151 = vmatmul.mubr.msk.bf16.gmra.mxu0 %vm1586_vm2, %v2045_v53 }
 0x208   : > { %v1801_v61 = vadd.f32 %v6132_v34, %v1800_v60  ;;  %v1995_v62 = vmax.f32 %v1809_v57, 0.0 }
 0x209   : > { %v5094_v63 = vpop.f32.mrf.mxu1  ;;  %5257 = vmatmul.mubr.msk.bf16.gmra.mxu1 %vm1088_vm1, %v5534_v55 }
 0x20a   : > { %v1993_v2 = vmax.f32 %v1801_v61, 0.0  ;;  %5260 = vmatprep.mubr.msk.bf16.mxu1 %vm1088_vm1, %v5535_v58  ;;  %v2047_v6 = vpack.c.bf16 %v1995_v62, %v1994_v3  ;;  %v1822_v9 = vadd.f32 %v5094_v63, %v6132_v34 }
 0x20b   : > { %v1813_v4 = vpop.f32.mrf.mxu1 }
 0x20c   : > { %v2046_v5 = vpack.c.bf16 %v1993_v2, %v1992_v0  ;;  %v1814_v8 = vadd.f32 %v6132_v34, %v1813_v4  ;;  %v1998_v15 = vmax.f32 %v1822_v9, 0.0 }
 0x20d   : > { %v5095_v7 = vpop.f32.mrf.mxu1 }
 0x20e   : > { %v1825_v23 = vadd.f32 %v5095_v7, %v6132_v34  ;;  %5154 = vmatprep.mubr.msk.bf16.mxu0 %vm1586_vm2, %v2046_v5  ;;  %v1996_v14 = vmax.f32 %v1814_v8, 0.0 }
 0x20f   : > { %v1816_v10 = vpop.f32.mrf.mxu1  ;;  %5155 = vmatmul.mubr.msk.bf16.gmra.mxu0 %vm1586_vm2, %v2047_v6 }
 0x210   : > { %v1817_v11 = vadd.f32 %v6132_v34, %v1816_v10  ;;  %v1999_v12 = vmax.f32 %v1825_v23, 0.0 }
 0x211   : > { %v5098_v13 = vpop.f32.mrf.mxu1  ;;  %5261 = vmatmul.mubr.msk.bf16.gmra.mxu1 %vm1088_vm1, %v5536_v1 }
 0x212   : > { %v1997_v38 = vmax.f32 %v1817_v11, 0.0  ;;  %v2049_v18 = vpack.c.bf16 %v1999_v12, %v1998_v15  ;;  %v1838_v35 = vadd.f32 %v5098_v13, %v6132_v34 }
 0x213   : > { %v1829_v16 = vpop.f32.mrf.mxu1 }
 0x214   : > { %v2048_v17 = vpack.c.bf16 %v1997_v38, %v1996_v14  ;;  %v1830_v20 = vadd.f32 %v6132_v34, %v1829_v16  ;;  %v2002_v29 = vmax.f32 %v1838_v35, 0.0 }
 0x215   : > { %v5099_v19 = vpop.f32.mrf.mxu1 }
 0x216   : > { %v1841_v21 = vadd.f32 %v5099_v19, %v6132_v34  ;;  %5158 = vmatprep.mubr.msk.bf16.mxu0 %vm1586_vm2, %v2048_v17  ;;  %v2000_v27 = vmax.f32 %v1830_v20, 0.0 }
 0x217   : > { %v1832_v22 = vpop.f32.mrf.mxu1  ;;  %5159 = vmatmul.mubr.msk.bf16.gmra.mxu0 %vm1586_vm2, %v2049_v18 }
 0x218   : > { %v1833_v24 = vadd.f32 %v6132_v34, %v1832_v22  ;;  %v2003_v25 = vmax.f32 %v1841_v21, 0.0 }
 0x219   : > { %v5102_v26 = vpop.f32.mrf.mxu1 }
 0x21a   : > { %v2001_v28 = vmax.f32 %v1833_v24, 0.0  ;;  %v2051_v32 = vpack.c.bf16 %v2003_v25, %v2002_v29  ;;  %v1854_v39 = vadd.f32 %v5102_v26, %v6132_v34 }
 0x21b   : > { %v1845_v30 = vpop.f32.mrf.mxu1 }
 0x21c   : > { %v2050_v31 = vpack.c.bf16 %v2001_v28, %v2000_v27  ;;  %v1846_v36 = vadd.f32 %v6132_v34, %v1845_v30  ;;  %v2006_v46 = vmax.f32 %v1854_v39, 0.0 }
 0x21d   : > { %v5103_v33 = vpop.f32.mrf.mxu1 }
 0x21e   : > { %v1857_v37 = vadd.f32 %v5103_v33, %v6132_v34  ;;  %5162 = vmatprep.mubr.msk.bf16.mxu0 %vm1586_vm2, %v2050_v31  ;;  %v2004_v44 = vmax.f32 %v1846_v36, 0.0 }
 0x21f   : > { %v1848_v40 = vpop.f32.mrf.mxu1  ;;  %5163 = vmatmul.mubr.msk.bf16.gmra.mxu0 %vm1586_vm2, %v2051_v32 }
 0x220   : > { %v1849_v41 = vadd.f32 %v6132_v34, %v1848_v40  ;;  %v2007_v42 = vmax.f32 %v1857_v37, 0.0 }
 0x221   : > { %v5106_v43 = vpop.f32.mrf.mxu1 }
 0x222   : > { %v2005_v45 = vmax.f32 %v1849_v41, 0.0  ;;  %v2053_v49 = vpack.c.bf16 %v2007_v42, %v2006_v46  ;;  %v1870_v53 = vadd.f32 %v5106_v43, %v6132_v34 }
 0x223   : > { %v1861_v47 = vpop.f32.mrf.mxu1 }
 0x224   : > { %v2052_v48 = vpack.c.bf16 %v2005_v45, %v2004_v44  ;;  %v1862_v51 = vadd.f32 %v6132_v34, %v1861_v47  ;;  %v2010_v60 = vmax.f32 %v1870_v53, 0.0 }
 0x225   : > { %v5107_v50 = vpop.f32.mrf.mxu1 }
 0x226   : > { %v1873_v52 = vadd.f32 %v5107_v50, %v6132_v34  ;;  %5166 = vmatprep.mubr.msk.bf16.mxu0 %vm1586_vm2, %v2052_v48  ;;  %v2008_v58 = vmax.f32 %v1862_v51, 0.0 }
 0x227   : > { %v1864_v54 = vpop.f32.mrf.mxu1  ;;  %5167 = vmatmul.mubr.msk.bf16.gmra.mxu0 %vm1586_vm2, %v2053_v49 }
 0x228   : > { %v1865_v55 = vadd.f32 %v6132_v34, %v1864_v54  ;;  %v2011_v56 = vmax.f32 %v1873_v52, 0.0 }
 0x229   : > { %v5110_v57 = vpop.f32.mrf.mxu1 }
 0x22a   : > { %v2009_v59 = vmax.f32 %v1865_v55, 0.0  ;;  %v2055_v63 = vpack.c.bf16 %v2011_v56, %v2010_v60  ;;  %v1886_v4 = vadd.f32 %v5110_v57, %v6132_v34 }
 0x22b   : > { %v1877_v61 = vpop.f32.mrf.mxu1 }
 0x22c   : > { %v2054_v62 = vpack.c.bf16 %v2009_v59, %v2008_v58  ;;  %v1878_v2 = vadd.f32 %v6132_v34, %v1877_v61  ;;  %v2014_v9 = vmax.f32 %v1886_v4, 0.0 }
 0x22d   : > { %v5111_v0 = vpop.f32.mrf.mxu1 }
 0x22e   : > { %v1889_v3 = vadd.f32 %v5111_v0, %v6132_v34  ;;  %5170 = vmatprep.mubr.msk.bf16.mxu0 %vm1586_vm2, %v2054_v62  ;;  %v2012_v8 = vmax.f32 %v1878_v2, 0.0 }
 0x22f   : > { %v1880_v5 = vpop.f32.mrf.mxu1  ;;  %5171 = vmatmul.mubr.msk.bf16.gmra.mxu0 %vm1586_vm2, %v2055_v63 }
 0x230   : > { %v1881_v6 = vadd.f32 %v6132_v34, %v1880_v5  ;;  %v2015_v7 = vmax.f32 %v1889_v3, 0.0 }
 0x231   : > { %v5114_v1 = vpop.f32.mrf.mxu1 }
 0x232   : > { %v2013_v23 = vmax.f32 %v1881_v6, 0.0  ;;  %v2057_v12 = vpack.c.bf16 %v2015_v7, %v2014_v9  ;;  %v1902_v15 = vadd.f32 %v5114_v1, %v6132_v34 }
 0x233   : > { %v1893_v10 = vpop.f32.mrf.mxu1 }
 0x234   : > { %v2056_v11 = vpack.c.bf16 %v2013_v23, %v2012_v8  ;;  %v1894_v14 = vadd.f32 %v6132_v34, %v1893_v10  ;;  %v2018_v35 = vmax.f32 %v1902_v15, 0.0 }
 0x235   : > { %v5115_v13 = vpop.f32.mrf.mxu1 }
 0x236   : > { %v1905_v38 = vadd.f32 %v5115_v13, %v6132_v34  ;;  %5174 = vmatprep.mubr.msk.bf16.mxu0 %vm1586_vm2, %v2056_v11  ;;  %v2016_v20 = vmax.f32 %v1894_v14, 0.0 }
 0x237   : > { %v1896_v16 = vpop.f32.mrf.mxu1  ;;  %5175 = vmatmul.mubr.msk.bf16.gmra.mxu0 %vm1586_vm2, %v2057_v12 }
 0x238   : > { %v1897_v17 = vadd.f32 %v6132_v34, %v1896_v16  ;;  %v2019_v18 = vmax.f32 %v1905_v38, 0.0 }
 0x239   : > { %v5118_v19 = vpop.f32.mrf.mxu1 }
 0x23a   : > { %v2017_v21 = vmax.f32 %v1897_v17, 0.0  ;;  %v2059_v25 = vpack.c.bf16 %v2019_v18, %v2018_v35  ;;  %v1918_v29 = vadd.f32 %v5118_v19, %v6132_v34 }
 0x23b   : > { %v1909_v22 = vpop.f32.mrf.mxu1 }
 0x23c   : > { %v2058_v24 = vpack.c.bf16 %v2017_v21, %v2016_v20  ;;  %v1910_v27 = vadd.f32 %v6132_v34, %v1909_v22  ;;  %v2022_v39 = vmax.f32 %v1918_v29, 0.0  ;;  %v6258_v20 = vld [vmem:[%s6835_s2] ss:$0 sm:$0xff] }
 0x23d   : > { %v5119_v26 = vpop.f32.mrf.mxu1 }
 0x23e   : > { %v1921_v28 = vadd.f32 %v5119_v26, %v6132_v34  ;;  %5178 = vmatprep.mubr.msk.bf16.mxu0 %vm1586_vm2, %v2058_v24  ;;  %v2020_v36 = vmax.f32 %v1910_v27, 0.0 }
 0x23f   : > { %v1912_v30 = vpop.f32.mrf.mxu1  ;;  %5179 = vmatmul.mubr.msk.bf16.gmra.mxu0 %vm1586_vm2, %v2059_v25 }
 0x240   : > { %v1913_v31 = vadd.f32 %v6132_v34, %v1912_v30  ;;  %v2023_v32 = vmax.f32 %v1921_v28, 0.0 }
 0x241   : > { %v5122_v33 = vpop.f32.mrf.mxu1 }
 0x242   : > { %v2021_v37 = vmax.f32 %v1913_v31, 0.0  ;;  %v2061_v42 = vpack.c.bf16 %v2023_v32, %v2022_v39  ;;  %v1934_v46 = vadd.f32 %v5122_v33, %v6132_v34 }
 0x243   : > { %v1925_v40 = vpop.f32.mrf.mxu1 }
 0x244   : > { %v2060_v41 = vpack.c.bf16 %v2021_v37, %v2020_v36  ;;  %v1926_v44 = vadd.f32 %v6132_v34, %v1925_v40  ;;  %v2026_v53 = vmax.f32 %v1934_v46, 0.0 }
 0x245   : > { %v5123_v43 = vpop.f32.mrf.mxu1 }
 0x246   : > { %v1937_v45 = vadd.f32 %v5123_v43, %v6132_v34  ;;  %5182 = vmatprep.mubr.msk.bf16.mxu0 %vm1586_vm2, %v2060_v41  ;;  %v2024_v51 = vmax.f32 %v1926_v44, 0.0 }
 0x247   : > { %v1928_v47 = vpop.f32.mrf.mxu1  ;;  %5183 = vmatmul.mubr.msk.bf16.gmra.mxu0 %vm1586_vm2, %v2061_v42 }
 0x248   : > { %v1929_v48 = vadd.f32 %v6132_v34, %v1928_v47  ;;  %v2027_v49 = vmax.f32 %v1937_v45, 0.0 }
 0x249   : > { %v5126_v50 = vpop.f32.mrf.mxu1 }
 0x24a   : > { %v2025_v52 = vmax.f32 %v1929_v48, 0.0  ;;  %v2063_v56 = vpack.c.bf16 %v2027_v49, %v2026_v53  ;;  %v1950_v60 = vadd.f32 %v5126_v50, %v6132_v34 }
 0x24b   : > { %v1941_v54 = vpop.f32.mrf.mxu1 }
 0x24c   : > { %v2062_v55 = vpack.c.bf16 %v2025_v52, %v2024_v51  ;;  %v1942_v58 = vadd.f32 %v6132_v34, %v1941_v54  ;;  %v2030_v4 = vmax.f32 %v1950_v60, 0.0 }
 0x24d   : > { %v5127_v57 = vpop.f32.mrf.mxu1 }
 0x24e   : > { %v1953_v59 = vadd.f32 %v5127_v57, %v6132_v34  ;;  %5186 = vmatprep.mubr.msk.bf16.mxu0 %vm1586_vm2, %v2062_v55  ;;  %v2028_v2 = vmax.f32 %v1942_v58, 0.0 }
 0x24f   : > { %v1944_v61 = vpop.f32.mrf.mxu1  ;;  %5187 = vmatmul.mubr.msk.bf16.gmra.mxu0 %vm1586_vm2, %v2063_v56 }
 0x250   : > { %v1945_v62 = vadd.f32 %v6132_v34, %v1944_v61  ;;  %v2031_v63 = vmax.f32 %v1953_v59, 0.0 }
 0x251   : > { %v5130_v0 = vpop.f32.mrf.mxu1 }
 0x252   : > { %v2029_v3 = vmax.f32 %v1945_v62, 0.0  ;;  %v2065_v7 = vpack.c.bf16 %v2031_v63, %v2030_v4  ;;  %v1966_v9 = vadd.f32 %v5130_v0, %v6132_v34 }
 0x253   : > { %v1957_v5 = vpop.f32.mrf.mxu1 }
 0x254   : > { %v2064_v6 = vpack.c.bf16 %v2029_v3, %v2028_v2  ;;  %v1958_v8 = vadd.f32 %v6132_v34, %v1957_v5  ;;  %v2034_v15 = vmax.f32 %v1966_v9, 0.0 }
 0x255   : > { %v5131_v1 = vpop.f32.mrf.mxu1 }
 0x256   : > { %v1969_v23 = vadd.f32 %v5131_v1, %v6132_v34  ;;  %5190 = vmatprep.mubr.msk.bf16.mxu0 %vm1586_vm2, %v2064_v6  ;;  %v2032_v14 = vmax.f32 %v1958_v8, 0.0 }
 0x257   : > { %v1960_v10 = vpop.f32.mrf.mxu1  ;;  %5191 = vmatmul.mubr.msk.bf16.gmra.mxu0 %vm1586_vm2, %v2065_v7 }
 0x258   : > { %v1961_v11 = vadd.f32 %v6132_v34, %v1960_v10  ;;  %v2035_v12 = vmax.f32 %v1969_v23, 0.0 }
 0x259   : > { %v5202_v13 = vpop.f32.mrf.mxu1 }
 0x25a   : > { %v2033_v38 = vmax.f32 %v1961_v11, 0.0  ;;  %v2067_v18 = vpack.c.bf16 %v2035_v12, %v2034_v15  ;;  %v2944_v34 = vadd.f32 %v6258_v20, %v5202_v13 }
 0x25b   : > { %v2935_v16 = vpop.f32.mrf.mxu1 }
 0x25c   : > { %v2066_v17 = vpack.c.bf16 %v2033_v38, %v2032_v14  ;;  %v2936_v21 = vadd.f32 %v6258_v20, %v2935_v16  ;;  %v3192_v29 = vmax.f32 %v2944_v34, 0.0 }
 0x25d   : > { %v5203_v19 = vpop.f32.mrf.mxu1 }
 0x25e   : > { %v2947_v35 = vadd.f32 %v6258_v20, %v5203_v19  ;;  %5194 = vmatprep.mubr.msk.bf16.mxu0 %vm1586_vm2, %v2066_v17  ;;  %v3190_v27 = vmax.f32 %v2936_v21, 0.0 }
 0x25f   : > { %5195 = vmatmul.mubr.msk.bf16.gmra.mxu0 %vm1586_vm2, %v2067_v18  ;;  %v2938_v22 = vpop.f32.mrf.mxu1 }
 0x260   : > { %v2939_v24 = vadd.f32 %v6258_v20, %v2938_v22  ;;  %v3193_v25 = vmax.f32 %v2947_v35, 0.0 }
 0x261   : > { %v5206_v26 = vpop.f32.mrf.mxu1 }
 0x262   : > { %v3191_v28 = vmax.f32 %v2939_v24, 0.0  ;;  %v3255_v32 = vpack.c.bf16 %v3193_v25, %v3192_v29  ;;  %v2960_v39 = vadd.f32 %v6258_v20, %v5206_v26 }
 0x263   : > { %v2951_v30 = vpop.f32.mrf.mxu1 }
 0x264   : > { %v3254_v31 = vpack.c.bf16 %v3191_v28, %v3190_v27  ;;  %v2952_v36 = vadd.f32 %v6258_v20, %v2951_v30  ;;  %v3196_v46 = vmax.f32 %v2960_v39, 0.0 }
 0x265   : > { %v5207_v33 = vpop.f32.mrf.mxu1 }
 0x266   : > { %v2963_v37 = vadd.f32 %v6258_v20, %v5207_v33  ;;  %5266 = vmatprep.mubr.msk.bf16.mxu0 %vm1586_vm2, %v3254_v31  ;;  %v3194_v44 = vmax.f32 %v2952_v36, 0.0 }
 0x267   : > { %v2954_v40 = vpop.f32.mrf.mxu1  ;;  %5267 = vmatmul.mubr.msk.bf16.vlgmr.msra.gmra.mxu0 %vm1586_vm2, %v3255_v32 }
 0x268   : > { %v2955_v41 = vadd.f32 %v6258_v20, %v2954_v40  ;;  %v3197_v42 = vmax.f32 %v2963_v37, 0.0 }
 0x269   : > { %v5210_v43 = vpop.f32.mrf.mxu1 }
 0x26a   : > { %v3195_v45 = vmax.f32 %v2955_v41, 0.0  ;;  %v3257_v49 = vpack.c.bf16 %v3197_v42, %v3196_v46  ;;  %v2976_v53 = vadd.f32 %v6258_v20, %v5210_v43 }
 0x26b   : > { %v2967_v47 = vpop.f32.mrf.mxu1 }
 0x26c   : > { %v3256_v48 = vpack.c.bf16 %v3195_v45, %v3194_v44  ;;  %v2968_v51 = vadd.f32 %v6258_v20, %v2967_v47  ;;  %v3200_v60 = vmax.f32 %v2976_v53, 0.0 }
 0x26d   : > { %v5211_v50 = vpop.f32.mrf.mxu1 }
 0x26e   : > { %v2979_v52 = vadd.f32 %v6258_v20, %v5211_v50  ;;  %5270 = vmatprep.mubr.msk.bf16.mxu0 %vm1586_vm2, %v3256_v48  ;;  %v3198_v58 = vmax.f32 %v2968_v51, 0.0 }
 0x26f   : > { %v2970_v54 = vpop.f32.mrf.mxu1  ;;  %5271 = vmatmul.mubr.msk.bf16.gmra.mxu0 %vm1586_vm2, %v3257_v49 }
 0x270   : > { %v2971_v55 = vadd.f32 %v6258_v20, %v2970_v54  ;;  %v3201_v56 = vmax.f32 %v2979_v52, 0.0 }
 0x271   : > { %v5214_v57 = vpop.f32.mrf.mxu1 }
 0x272   : > { %v3199_v59 = vmax.f32 %v2971_v55, 0.0  ;;  %v3259_v63 = vpack.c.bf16 %v3201_v56, %v3200_v60  ;;  %v2992_v4 = vadd.f32 %v6258_v20, %v5214_v57 }
 0x273   : > { %v2983_v61 = vpop.f32.mrf.mxu1 }
 0x274   : > { %v3258_v62 = vpack.c.bf16 %v3199_v59, %v3198_v58  ;;  %v2984_v2 = vadd.f32 %v6258_v20, %v2983_v61  ;;  %v3204_v9 = vmax.f32 %v2992_v4, 0.0 }
 0x275   : > { %v5215_v0 = vpop.f32.mrf.mxu1 }
 0x276   : > { %v2995_v3 = vadd.f32 %v6258_v20, %v5215_v0  ;;  %5274 = vmatprep.mubr.msk.bf16.mxu0 %vm1586_vm2, %v3258_v62  ;;  %v3202_v8 = vmax.f32 %v2984_v2, 0.0 }
 0x277   : > { %v2986_v5 = vpop.f32.mrf.mxu1  ;;  %5275 = vmatmul.mubr.msk.bf16.gmra.mxu0 %vm1586_vm2, %v3259_v63 }
 0x278   : > { %v2987_v6 = vadd.f32 %v6258_v20, %v2986_v5  ;;  %v3205_v7 = vmax.f32 %v2995_v3, 0.0 }
 0x279   : > { %v5218_v1 = vpop.f32.mrf.mxu1 }
 0x27a   : > { %v3203_v23 = vmax.f32 %v2987_v6, 0.0  ;;  %v3261_v12 = vpack.c.bf16 %v3205_v7, %v3204_v9  ;;  %v3008_v15 = vadd.f32 %v6258_v20, %v5218_v1 }
 0x27b   : > { %v2999_v10 = vpop.f32.mrf.mxu1 }
 0x27c   : > { %v3260_v11 = vpack.c.bf16 %v3203_v23, %v3202_v8  ;;  %v3000_v14 = vadd.f32 %v6258_v20, %v2999_v10  ;;  %v3208_v34 = vmax.f32 %v3008_v15, 0.0 }
 0x27d   : > { %v5219_v13 = vpop.f32.mrf.mxu1 }
 0x27e   : > { %v3011_v38 = vadd.f32 %v6258_v20, %v5219_v13  ;;  %5278 = vmatprep.mubr.msk.bf16.mxu0 %vm1586_vm2, %v3260_v11  ;;  %v3206_v21 = vmax.f32 %v3000_v14, 0.0 }
 0x27f   : > { %v3002_v16 = vpop.f32.mrf.mxu1  ;;  %5279 = vmatmul.mubr.msk.bf16.gmra.mxu0 %vm1586_vm2, %v3261_v12 }
 0x280   : > { %v3003_v17 = vadd.f32 %v6258_v20, %v3002_v16  ;;  %v3209_v18 = vmax.f32 %v3011_v38, 0.0 }
 0x281   : > { %v5222_v19 = vpop.f32.mrf.mxu1 }
 0x282   : > { %v3207_v35 = vmax.f32 %v3003_v17, 0.0  ;;  %v3263_v25 = vpack.c.bf16 %v3209_v18, %v3208_v34  ;;  %v3024_v29 = vadd.f32 %v6258_v20, %v5222_v19 }
 0x283   : > { %v3015_v22 = vpop.f32.mrf.mxu1 }
 0x284   : > { %v3262_v24 = vpack.c.bf16 %v3207_v35, %v3206_v21  ;;  %v3016_v27 = vadd.f32 %v6258_v20, %v3015_v22  ;;  %v3212_v39 = vmax.f32 %v3024_v29, 0.0 }
 0x285   : > { %v5223_v26 = vpop.f32.mrf.mxu1 }
 0x286   : > { %v3027_v28 = vadd.f32 %v6258_v20, %v5223_v26  ;;  %5282 = vmatprep.mubr.msk.bf16.mxu0 %vm1586_vm2, %v3262_v24  ;;  %v3210_v36 = vmax.f32 %v3016_v27, 0.0 }
 0x287   : > { %v3018_v30 = vpop.f32.mrf.mxu1  ;;  %5283 = vmatmul.mubr.msk.bf16.gmra.mxu0 %vm1586_vm2, %v3263_v25 }
 0x288   : > { %v3019_v31 = vadd.f32 %v6258_v20, %v3018_v30  ;;  %v3213_v32 = vmax.f32 %v3027_v28, 0.0 }
 0x289   : > { %v5226_v33 = vpop.f32.mrf.mxu1 }
 0x28a   : > { %v3211_v37 = vmax.f32 %v3019_v31, 0.0  ;;  %v3265_v42 = vpack.c.bf16 %v3213_v32, %v3212_v39  ;;  %v3040_v46 = vadd.f32 %v6258_v20, %v5226_v33 }
 0x28b   : > { %v3031_v40 = vpop.f32.mrf.mxu1 }
 0x28c   : > { %v3264_v41 = vpack.c.bf16 %v3211_v37, %v3210_v36  ;;  %v3032_v44 = vadd.f32 %v6258_v20, %v3031_v40  ;;  %v3216_v53 = vmax.f32 %v3040_v46, 0.0 }
 0x28d   : > { %v5227_v43 = vpop.f32.mrf.mxu1 }
 0x28e   : > { %v3043_v45 = vadd.f32 %v6258_v20, %v5227_v43  ;;  %5286 = vmatprep.mubr.msk.bf16.mxu0 %vm1586_vm2, %v3264_v41  ;;  %v3214_v51 = vmax.f32 %v3032_v44, 0.0 }
 0x28f   : > { %v3034_v47 = vpop.f32.mrf.mxu1  ;;  %5287 = vmatmul.mubr.msk.bf16.gmra.mxu0 %vm1586_vm2, %v3265_v42 }
 0x290   : > { %v3035_v48 = vadd.f32 %v6258_v20, %v3034_v47  ;;  %v3217_v49 = vmax.f32 %v3043_v45, 0.0 }
 0x291   : > { %v5230_v50 = vpop.f32.mrf.mxu1 }
 0x292   : > { %v3215_v52 = vmax.f32 %v3035_v48, 0.0  ;;  %v3267_v56 = vpack.c.bf16 %v3217_v49, %v3216_v53  ;;  %v3056_v60 = vadd.f32 %v6258_v20, %v5230_v50 }
 0x293   : > { %v3047_v54 = vpop.f32.mrf.mxu1 }
 0x294   : > { %v3266_v55 = vpack.c.bf16 %v3215_v52, %v3214_v51  ;;  %v3048_v58 = vadd.f32 %v6258_v20, %v3047_v54  ;;  %v3220_v4 = vmax.f32 %v3056_v60, 0.0 }
 0x295   : > { %v5231_v57 = vpop.f32.mrf.mxu1 }
 0x296   : > { %v3059_v59 = vadd.f32 %v6258_v20, %v5231_v57  ;;  %5290 = vmatprep.mubr.msk.bf16.mxu0 %vm1586_vm2, %v3266_v55  ;;  %v3218_v2 = vmax.f32 %v3048_v58, 0.0 }
 0x297   : > { %v3050_v61 = vpop.f32.mrf.mxu1  ;;  %5291 = vmatmul.mubr.msk.bf16.gmra.mxu0 %vm1586_vm2, %v3267_v56 }
 0x298   : > { %v3051_v62 = vadd.f32 %v6258_v20, %v3050_v61  ;;  %v3221_v63 = vmax.f32 %v3059_v59, 0.0 }
 0x299   : > { %v5234_v0 = vpop.f32.mrf.mxu1 }
 0x29a   : > { %v3219_v3 = vmax.f32 %v3051_v62, 0.0  ;;  %v3269_v7 = vpack.c.bf16 %v3221_v63, %v3220_v4  ;;  %v3072_v9 = vadd.f32 %v6258_v20, %v5234_v0 }
 0x29b   : > { %v3063_v5 = vpop.f32.mrf.mxu1 }
 0x29c   : > { %v3268_v6 = vpack.c.bf16 %v3219_v3, %v3218_v2  ;;  %v3064_v8 = vadd.f32 %v6258_v20, %v3063_v5  ;;  %v3224_v15 = vmax.f32 %v3072_v9, 0.0 }
 0x29d   : > { %v5235_v1 = vpop.f32.mrf.mxu1 }
 0x29e   : > { %v3075_v23 = vadd.f32 %v6258_v20, %v5235_v1  ;;  %5294 = vmatprep.mubr.msk.bf16.mxu0 %vm1586_vm2, %v3268_v6  ;;  %v3222_v14 = vmax.f32 %v3064_v8, 0.0 }
 0x29f   : > { %v3066_v10 = vpop.f32.mrf.mxu1  ;;  %5295 = vmatmul.mubr.msk.bf16.gmra.mxu0 %vm1586_vm2, %v3269_v7 }
 0x2a0   : > { %v3067_v11 = vadd.f32 %v6258_v20, %v3066_v10  ;;  %v3225_v12 = vmax.f32 %v3075_v23, 0.0 }
 0x2a1   : > { %v5238_v13 = vpop.f32.mrf.mxu1 }
 0x2a2   : > { %v3223_v38 = vmax.f32 %v3067_v11, 0.0  ;;  %v3271_v18 = vpack.c.bf16 %v3225_v12, %v3224_v15  ;;  %v3088_v34 = vadd.f32 %v6258_v20, %v5238_v13 }
 0x2a3   : > { %v3079_v16 = vpop.f32.mrf.mxu1 }
 0x2a4   : > { %v3270_v17 = vpack.c.bf16 %v3223_v38, %v3222_v14  ;;  %v3080_v21 = vadd.f32 %v6258_v20, %v3079_v16  ;;  %v3228_v31 = vmax.f32 %v3088_v34, 0.0 }
 0x2a5   : > { %v5239_v19 = vpop.f32.mrf.mxu1 }
 0x2a6   : > { %v3091_v35 = vadd.f32 %v6258_v20, %v5239_v19  ;;  %5298 = vmatprep.mubr.msk.bf16.mxu0 %vm1586_vm2, %v3270_v17  ;;  %v3226_v29 = vmax.f32 %v3080_v21, 0.0 }
 0x2a7   : > { %v5136_v22 = vpop.f32.mrf.mxu0  ;;  %v3082_v24 = vpop.f32.mrf.mxu1  ;;  %5299 = vmatmul.mubr.msk.bf16.gmra.mxu0 %vm1586_vm2, %v3271_v18 }
 0x2a8   : > { %v3083_v25 = vadd.f32 %v6258_v20, %v3082_v24  ;;  %v3229_v26 = vmax.f32 %v3091_v35, 0.0  ;;  %v6334_v0 = vsel %vm2459_vm3, %v5136_v22, -inf }
 0x2a9   : > { %v2204_v27 = vpop.f32.mrf.mxu0  ;;  %v5242_v28 = vpop.f32.mrf.mxu1 }
 0x2aa   : > { %v3227_v30 = vmax.f32 %v3083_v25, 0.0  ;;  %v3273_v37 = vpack.c.bf16 %v3229_v26, %v3228_v31  ;;  %v3104_v43 = vadd.f32 %v6258_v20, %v5242_v28  ;;  %v6343_v1 = vsel %vm2459_vm3, %v2204_v27, -inf }
 0x2ab   : > { %v5137_v32 = vpop.f32.mrf.mxu0  ;;  %v3095_v33 = vpop.f32.mrf.mxu1 }
 0x2ac   : > { %v3272_v36 = vpack.c.bf16 %v3227_v30, %v3226_v29  ;;  %v3096_v41 = vadd.f32 %v6258_v20, %v3095_v33  ;;  %v3232_v52 = vmax.f32 %v3104_v43, 0.0  ;;  %v6351_v14 = vsel %vm2459_vm3, %v5137_v32, -inf }
 0x2ad   : > { %v2207_v39 = vpop.f32.mrf.mxu0  ;;  %v5243_v40 = vpop.f32.mrf.mxu1 }
 0x2ae   : > { %v3107_v42 = vadd.f32 %v6258_v20, %v5243_v40  ;;  %5302 = vmatprep.mubr.msk.bf16.mxu0 %vm1586_vm2, %v3272_v36  ;;  %v3230_v50 = vmax.f32 %v3096_v41, 0.0  ;;  %v6359_v21 = vsel %vm2459_vm3, %v2207_v39, -inf }
 0x2af   : > { %v5140_v44 = vpop.f32.mrf.mxu0  ;;  %v3098_v45 = vpop.f32.mrf.mxu1  ;;  %5303 = vmatmul.mubr.msk.bf16.gmra.mxu0 %vm1586_vm2, %v3273_v37 }
 0x2b0   : > { %v3099_v46 = vadd.f32 %v6258_v20, %v3098_v45  ;;  %v3233_v47 = vmax.f32 %v3107_v42, 0.0  ;;  %v6372_v28 = vsel %vm2459_vm3, %v5140_v44, -inf }
 0x2b1   : > { %v2220_v48 = vpop.f32.mrf.mxu0  ;;  %v5246_v49 = vpop.f32.mrf.mxu1 }
 0x2b2   : > { %v3231_v51 = vmax.f32 %v3099_v46, 0.0  ;;  %v3275_v56 = vpack.c.bf16 %v3233_v47, %v3232_v52  ;;  %v3120_v61 = vadd.f32 %v6258_v20, %v5246_v49  ;;  %v6381_v37 = vsel %vm2459_vm3, %v2220_v48, -inf }
 0x2b3   : > { %v5141_v53 = vpop.f32.mrf.mxu0  ;;  %v3111_v54 = vpop.f32.mrf.mxu1 }
 0x2b4   : > { %v3274_v55 = vpack.c.bf16 %v3231_v51, %v3230_v50  ;;  %v3112_v59 = vadd.f32 %v6258_v20, %v3111_v54  ;;  %v3236_v10 = vmax.f32 %v3120_v61, 0.0  ;;  %v2565_v46 = vsel %vm2459_vm3, %v5141_v53, -inf }
 0x2b5   : > { %v6326_v57 = vpop.f32.mrf.mxu0  ;;  %v5247_v58 = vpop.f32.mrf.mxu1 }
 0x2b6   : > { %v3123_v60 = vadd.f32 %v6258_v20, %v5247_v58  ;;  %5306 = vmatprep.mubr.msk.bf16.mxu0 %vm1586_vm2, %v3274_v55  ;;  %v3234_v8 = vmax.f32 %v3112_v59, 0.0  ;;  %v6389_v48 = vsel %vm2459_vm3, %v6326_v57, -inf }
 0x2b7   : > { %v5144_v62 = vpop.f32.mrf.mxu0  ;;  %v3114_v63 = vpop.f32.mrf.mxu1  ;;  %5307 = vmatmul.mubr.msk.bf16.gmra.mxu0 %vm1586_vm2, %v3275_v56 }
 0x2b8   : > { %v6337_v2 = vsel %vm2459_vm3, %v5144_v62, -inf  ;;  %v3115_v3 = vadd.f32 %v6258_v20, %v3114_v63  ;;  %v3237_v4 = vmax.f32 %v3123_v60, 0.0 }
 0x2b9   : > { %v2492_v5 = vmax.f32 %v6334_v0, %v6337_v2  ;;  %v2236_v6 = vpop.f32.mrf.mxu0  ;;  %v5250_v7 = vpop.f32.mrf.mxu1 }
 0x2ba   : > { %v3235_v23 = vmax.f32 %v3115_v3, 0.0  ;;  %v6346_v9 = vsel %vm2459_vm3, %v2236_v6, -inf  ;;  %v3277_v16 = vpack.c.bf16 %v3237_v4, %v3236_v10  ;;  %v3136_v24 = vadd.f32 %v6258_v20, %v5250_v7 }
 0x2bb   : > { %v2462_v11 = vmax.f32 %v6343_v1, %v6346_v9  ;;  %v5145_v12 = vpop.f32.mrf.mxu0  ;;  %v3127_v13 = vpop.f32.mrf.mxu1 }
 0x2bc   : > { %v3276_v38 = vpack.c.bf16 %v3235_v23, %v3234_v8  ;;  %v6354_v15 = vsel %vm2459_vm3, %v5145_v12, -inf  ;;  %v3128_v35 = vadd.f32 %v6258_v20, %v3127_v13  ;;  %v3240_v42 = vmax.f32 %v3136_v24, 0.0 }
 0x2bd   : > { %v2507_v17 = vmax.f32 %v6351_v14, %v6354_v15  ;;  %v2239_v18 = vpop.f32.mrf.mxu0  ;;  %v5251_v19 = vpop.f32.mrf.mxu1 }
 0x2be   : > { %v6363_v34 = vsel %vm2459_vm3, %v2239_v18, -inf  ;;  %v3139_v22 = vadd.f32 %v6258_v20, %v5251_v19  ;;  %5310 = vmatprep.mubr.msk.bf16.mxu0 %vm1586_vm2, %v3276_v38  ;;  %v3238_v39 = vmax.f32 %v3128_v35, 0.0 }
 0x2bf   : > { %v2477_v25 = vmax.f32 %v6359_v21, %v6363_v34  ;;  %v5148_v26 = vpop.f32.mrf.mxu0  ;;  %v3130_v27 = vpop.f32.mrf.mxu1  ;;  %5311 = vmatmul.mubr.msk.bf16.gmra.mxu0 %vm1586_vm2, %v3277_v16 }
 0x2c0   : > { %v6375_v29 = vsel %vm2459_vm3, %v5148_v26, -inf  ;;  %v3131_v30 = vadd.f32 %v6258_v20, %v3130_v27  ;;  %v3241_v31 = vmax.f32 %v3139_v22, 0.0 }
 0x2c1   : > { %v2552_v32 = vmax.f32 %v6372_v28, %v6375_v29  ;;  %v2252_v33 = vpop.f32.mrf.mxu0  ;;  %v5254_v36 = vpop.f32.mrf.mxu1 }
 0x2c2   : > { %v3239_v40 = vmax.f32 %v3131_v30, 0.0  ;;  %v2521_v41 = vsel %vm2459_vm3, %v2252_v33, -inf  ;;  %v3279_v50 = vpack.c.bf16 %v3241_v31, %v3240_v42  ;;  %v3152_v53 = vadd.f32 %v6258_v20, %v5254_v36 }
 0x2c3   : > { %v2522_v43 = vmax.f32 %v6381_v37, %v2521_v41  ;;  %v5149_v44 = vpop.f32.mrf.mxu0  ;;  %v3143_v45 = vpop.f32.mrf.mxu1 }
 0x2c4   : > { %v3278_v47 = vpack.c.bf16 %v3239_v40, %v3238_v39  ;;  %v2566_v49 = vsel %vm2459_vm3, %v5149_v44, -inf  ;;  %v3144_v55 = vadd.f32 %v6258_v20, %v3143_v45  ;;  %v3244_v23 = vmax.f32 %v3152_v53, 0.0 }
 0x2c5   : > { %v2567_v51 = vmax.f32 %v2565_v46, %v2566_v49  ;;  %v2255_v52 = vpop.f32.mrf.mxu0  ;;  %v5255_v54 = vpop.f32.mrf.mxu1 }
 0x2c6   : > { %v2536_v56 = vsel %vm2459_vm3, %v2255_v52, -inf  ;;  %v3155_v58 = vadd.f32 %v6258_v20, %v5255_v54  ;;  %5314 = vmatprep.mubr.msk.bf16.mxu0 %vm1586_vm2, %v3278_v47  ;;  %v3242_v7 = vmax.f32 %v3144_v55, 0.0 }
 0x2c7   : > { %v2537_v59 = vmax.f32 %v6389_v48, %v2536_v56  ;;  %v5152_v60 = vpop.f32.mrf.mxu0  ;;  %v3146_v61 = vpop.f32.mrf.mxu1  ;;  %5315 = vmatmul.mubr.msk.bf16.gmra.mxu0 %vm1586_vm2, %v3279_v50 }
 0x2c8   : > { %v2493_v62 = vsel %vm2459_vm3, %v5152_v60, -inf  ;;  %v3147_v57 = vadd.f32 %v6258_v20, %v3146_v61  ;;  %v3245_v63 = vmax.f32 %v3155_v58, 0.0 }
 0x2c9   : > { %v6403_v3 = vmax.f32 %v2492_v5, %v2493_v62  ;;  %v2268_v4 = vpop.f32.mrf.mxu0  ;;  %v5258_v6 = vpop.f32.mrf.mxu1 }
 0x2ca   : > { %v3243_v1 = vmax.f32 %v3147_v57, 0.0  ;;  %v2463_v8 = vsel %vm2459_vm3, %v2268_v4, -inf  ;;  %v3281_v38 = vpack.c.bf16 %v3245_v63, %v3244_v23 }
 0x2cb   : > { %v6406_v9 = vmax.f32 %v2462_v11, %v2463_v8  ;;  %v5153_v10 = vpop.f32.mrf.mxu0  ;;  %v3159_v12 = vpop.f32.mrf.mxu1  ;;  %v3168_v11 = vadd.f32 %v6258_v20, %v5258_v6 }
 0x2cc   : > { %v3280_v13 = vpack.c.bf16 %v3243_v1, %v3242_v7  ;;  %v2508_v14 = vsel %vm2459_vm3, %v5153_v10, -inf  ;;  %v3160_v5 = vadd.f32 %v6258_v20, %v3159_v12 }
 0x2cd   : > { %v6409_v15 = vmax.f32 %v2507_v17, %v2508_v14  ;;  %v2271_v0 = vpop.f32.mrf.mxu0  ;;  %v5259_v2 = vpop.f32.mrf.mxu1  ;;  %v3248_v31 = vmax.f32 %v3168_v11, 0.0 }
 0x2ce   : > { %v2478_v16 = vsel %vm2459_vm3, %v2271_v0, -inf  ;;  %v3171_v18 = vadd.f32 %v6258_v20, %v5259_v2  ;;  %5318 = vmatprep.mubr.msk.bf16.mxu0 %vm1586_vm2, %v3280_v13  ;;  %v3246_v28 = vmax.f32 %v3160_v5, 0.0 }
 0x2cf   : > { %v6416_v19 = vmax.f32 %v2477_v25, %v2478_v16  ;;  %v5156_v21 = vpop.f32.mrf.mxu0  ;;  %v3162_v35 = vpop.f32.mrf.mxu1  ;;  %5319 = vmatmul.mubr.msk.bf16.gmra.mxu0 %vm1586_vm2, %v3281_v38 }
 0x2d0   : > { %v2553_v17 = vsel %vm2459_vm3, %v5156_v21, -inf  ;;  %v3163_v34 = vadd.f32 %v6258_v20, %v3162_v35  ;;  %v3249_v22 = vmax.f32 %v3171_v18, 0.0 }
 0x2d1   : > { %v6421_v24 = vmax.f32 %v2552_v32, %v2553_v17  ;;  %v2284_v26 = vpop.f32.mrf.mxu0  ;;  %v5262_v27 = vpop.f32.mrf.mxu1 }
 0x2d2   : > { %v3247_v29 = vmax.f32 %v3163_v34, 0.0  ;;  %v2523_v30 = vsel %vm2459_vm3, %v2284_v26, -inf  ;;  %v3283_v40 = vpack.c.bf16 %v3249_v22, %v3248_v31 }
 0x2d3   : > { %v6424_v25 = vmax.f32 %v2522_v43, %v2523_v30  ;;  %v5157_v33 = vpop.f32.mrf.mxu0  ;;  %v3175_v36 = vpop.f32.mrf.mxu1  ;;  %v3184_v43 = vadd.f32 %v6258_v20, %v5262_v27 }
 0x2d4   : > { %v3282_v37 = vpack.c.bf16 %v3247_v29, %v3246_v28  ;;  %v2568_v39 = vsel %vm2459_vm3, %v5157_v33, -inf  ;;  %v3176_v44 = vadd.f32 %v6258_v20, %v3175_v36 }
 0x2d5   : > { %v6427_v41 = vmax.f32 %v2567_v51, %v2568_v39  ;;  %v2287_v42 = vpop.f32.mrf.mxu0  ;;  %v5263_v32 = vpop.f32.mrf.mxu1  ;;  %v3252_v60 = vmax.f32 %v3184_v43, 0.0 }
 0x2d6   : > { %v2538_v45 = vsel %vm2459_vm3, %v2287_v42, -inf  ;;  %v3187_v46 = vadd.f32 %v6258_v20, %v5263_v32  ;;  %5322 = vmatprep.mubr.msk.bf16.mxu0 %vm1586_vm2, %v3282_v37  ;;  %v3250_v56 = vmax.f32 %v3176_v44, 0.0 }
 0x2d7   : > { %v2539_v47 = vmax.f32 %v2537_v59, %v2538_v45  ;;  %v5160_v49 = vpop.f32.mrf.mxu0  ;;  %v3178_v50 = vpop.f32.mrf.mxu1  ;;  %5323 = vmatmul.mubr.msk.bf16.gmra.mxu0 %vm1586_vm2, %v3283_v40 }
 0x2d8   : > { %v2495_v51 = vsel %vm2459_vm3, %v5160_v49, -inf  ;;  %v3179_v52 = vadd.f32 %v6258_v20, %v3178_v50  ;;  %v3253_v54 = vmax.f32 %v3187_v46, 0.0 }
 0x2d9   : > { %v2496_v48 = vmax.f32 %v6403_v3, %v2495_v51  ;;  %v2300_v55 = vpop.f32.mrf.mxu0 }
 0x2da   : > { %v3251_v58 = vmax.f32 %v3179_v52, 0.0  ;;  %v2465_v53 = vsel %vm2459_vm3, %v2300_v55, -inf  ;;  %v3285_v63 = vpack.c.bf16 %v3253_v54, %v3252_v60 }
 0x2db   : > { %v2466_v61 = vmax.f32 %v6406_v9, %v2465_v53  ;;  %v5161_v59 = vpop.f32.mrf.mxu0 }
 0x2dc   : > { %v3284_v62 = vpack.c.bf16 %v3251_v58, %v3250_v56  ;;  %v2510_v57 = vsel %vm2459_vm3, %v5161_v59, -inf }
 0x2dd   : > { %v2511_v4 = vmax.f32 %v6409_v15, %v2510_v57  ;;  %v2303_v6 = vpop.f32.mrf.mxu0 }
 0x2de   : > { %v2480_v20 = vsel %vm2459_vm3, %v2303_v6, -inf  ;;  %5326 = vmatprep.mubr.msk.bf16.mxu0 %vm1586_vm2, %v3284_v62 }
 0x2df   : > { %v2481_v3 = vmax.f32 %v6416_v19, %v2480_v20  ;;  %v5164_v7 = vpop.f32.mrf.mxu0  ;;  %5327 = vmatmul.mubr.msk.bf16.gmra.mxu0 %vm1586_vm2, %v3285_v63 }
 0x2e0   : > { %v2555_v1 = vsel %vm2459_vm3, %v5164_v7, -inf }
 0x2e1   : > { %v2556_v8 = vmax.f32 %v6421_v24, %v2555_v1  ;;  %v2316_v23 = vpop.f32.mrf.mxu0 }
 0x2e2   : > { %v2525_v9 = vsel %vm2459_vm3, %v2316_v23, -inf }
 0x2e3   : > { %v2526_v10 = vmax.f32 %v6424_v25, %v2525_v9  ;;  %v5165_v12 = vpop.f32.mrf.mxu0 }
 0x2e4   : > { %v2570_v13 = vsel %vm2459_vm3, %v5165_v12, -inf }
 0x2e5   : > { %v2571_v14 = vmax.f32 %v6427_v41, %v2570_v13  ;;  %v2319_v38 = vpop.f32.mrf.mxu0 }
 0x2e6   : > { %v2540_v15 = vsel %vm2459_vm3, %v2319_v38, -inf }
 0x2e7   : > { %v2541_v0 = vmax.f32 %v2539_v47, %v2540_v15  ;;  %v5168_v2 = vpop.f32.mrf.mxu0 }
 0x2e8   : > { %v2497_v5 = vsel %vm2459_vm3, %v5168_v2, -inf }
 0x2e9   : > { %v2498_v16 = vmax.f32 %v2496_v48, %v2497_v5  ;;  %v2332_v18 = vpop.f32.mrf.mxu0 }
 0x2ea   : > { %v2467_v11 = vsel %vm2459_vm3, %v2332_v18, -inf }
 0x2eb   : > { %v2468_v19 = vmax.f32 %v2466_v61, %v2467_v11  ;;  %v5169_v21 = vpop.f32.mrf.mxu0 }
 0x2ec   : > { %v2512_v35 = vsel %vm2459_vm3, %v5169_v21, -inf }
 0x2ed   : > { %v2513_v17 = vmax.f32 %v2511_v4, %v2512_v35  ;;  %v2335_v34 = vpop.f32.mrf.mxu0 }
 0x2ee   : > { %v2482_v22 = vsel %vm2459_vm3, %v2335_v34, -inf }
 0x2ef   : > { %v2483_v24 = vmax.f32 %v2481_v3, %v2482_v22  ;;  %v5172_v26 = vpop.f32.mrf.mxu0 }
 0x2f0   : > { %v2557_v27 = vsel %vm2459_vm3, %v5172_v26, -inf }
 0x2f1   : > { %v2558_v28 = vmax.f32 %v2556_v8, %v2557_v27  ;;  %v2348_v29 = vpop.f32.mrf.mxu0 }
 0x2f2   : > { %v2527_v30 = vsel %vm2459_vm3, %v2348_v29, -inf }
 0x2f3   : > { %v2528_v31 = vmax.f32 %v2526_v10, %v2527_v30  ;;  %v5173_v25 = vpop.f32.mrf.mxu0 }
 0x2f4   : > { %v2572_v33 = vsel %vm2459_vm3, %v5173_v25, -inf }
 0x2f5   : > { %v2573_v36 = vmax.f32 %v2571_v14, %v2572_v33  ;;  %v2351_v37 = vpop.f32.mrf.mxu0 }
 0x2f6   : > { %v2542_v39 = vsel %vm2459_vm3, %v2351_v37, -inf }
 0x2f7   : > { %v2543_v40 = vmax.f32 %v2541_v0, %v2542_v39  ;;  %v5176_v41 = vpop.f32.mrf.mxu0 }
 0x2f8   : > { %v2499_v42 = vsel %vm2459_vm3, %v5176_v41, -inf }
 0x2f9   : > { %v2500_v32 = vmax.f32 %v2498_v16, %v2499_v42  ;;  %v2364_v44 = vpop.f32.mrf.mxu0 }
 0x2fa   : > { %v2469_v45 = vsel %vm2459_vm3, %v2364_v44, -inf }
 0x2fb   : > { %v2470_v46 = vmax.f32 %v2468_v19, %v2469_v45  ;;  %v5177_v43 = vpop.f32.mrf.mxu0 }
 0x2fc   : > { %v2514_v47 = vsel %vm2459_vm3, %v5177_v43, -inf }
 0x2fd   : > { %v2515_v49 = vmax.f32 %v2513_v17, %v2514_v47  ;;  %v2367_v50 = vpop.f32.mrf.mxu0 }
 0x2fe   : > { %v2484_v51 = vsel %vm2459_vm3, %v2367_v50, -inf }
 0x2ff   : > { %v2485_v52 = vmax.f32 %v2483_v24, %v2484_v51  ;;  %v5180_v54 = vpop.f32.mrf.mxu0 }
 0x300   : > { %v2559_v48 = vsel %vm2459_vm3, %v5180_v54, -inf }
 0x301   : > { %v2560_v55 = vmax.f32 %v2558_v28, %v2559_v48  ;;  %v2380_v56 = vpop.f32.mrf.mxu0 }
 0x302   : > { %v2529_v58 = vsel %vm2459_vm3, %v2380_v56, -inf }
 0x303   : > { %v2530_v53 = vmax.f32 %v2528_v31, %v2529_v58  ;;  %v5181_v60 = vpop.f32.mrf.mxu0 }
 0x304   : > { %v2574_v61 = vsel %vm2459_vm3, %v5181_v60, -inf }
 0x305   : > { %v2575_v59 = vmax.f32 %v2573_v36, %v2574_v61  ;;  %v2383_v62 = vpop.f32.mrf.mxu0 }
 0x306   : > { %v2544_v57 = vsel %vm2459_vm3, %v2383_v62, -inf }
 0x307   : > { %v2545_v63 = vmax.f32 %v2543_v40, %v2544_v57  ;;  %v5184_v4 = vpop.f32.mrf.mxu0 }
 0x308   : > { %v2501_v6 = vsel %vm2459_vm3, %v5184_v4, -inf }
 0x309   : > { %v6470_v20 = vmax.f32 %v2500_v32, %v2501_v6  ;;  %v2396_v3 = vpop.f32.mrf.mxu0 }
 0x30a   : > { %v2471_v7 = vsel %vm2459_vm3, %v2396_v3, -inf }
 0x30b   : > { %v6473_v1 = vmax.f32 %v2470_v46, %v2471_v7  ;;  %v5185_v8 = vpop.f32.mrf.mxu0 }
 0x30c   : > { %v2516_v23 = vsel %vm2459_vm3, %v5185_v8, -inf }
 0x30d   : > { %v6476_v9 = vmax.f32 %v2515_v49, %v2516_v23  ;;  %v2399_v10 = vpop.f32.mrf.mxu0 }
 0x30e   : > { %v2486_v12 = vsel %vm2459_vm3, %v2399_v10, -inf }
 0x30f   : > { %v6479_v13 = vmax.f32 %v2485_v52, %v2486_v12  ;;  %v5188_v14 = vpop.f32.mrf.mxu0  ;;  %v6536_v52 = vld [vmem:[%s6837_s4] ss:$0 sm:$0xff] }
 0x310   : > { %v2561_v38 = vsel %vm2459_vm3, %v5188_v14, -inf }
 0x311   : > { %v6482_v15 = vmax.f32 %v2560_v55, %v2561_v38  ;;  %v2412_v0 = vpop.f32.mrf.mxu0 }
 0x312   : > { %v2531_v2 = vsel %vm2459_vm3, %v2412_v0, -inf }
 0x313   : > { %v6485_v5 = vmax.f32 %v2530_v53, %v2531_v2  ;;  %v5189_v16 = vpop.f32.mrf.mxu0 }
 0x314   : > { %v2576_v18 = vsel %vm2459_vm3, %v5189_v16, -inf }
 0x315   : > { %v6488_v11 = vmax.f32 %v2575_v59, %v2576_v18  ;;  %v2415_v19 = vpop.f32.mrf.mxu0 }
 0x316   : > { %v2546_v21 = vsel %vm2459_vm3, %v2415_v19, -inf }
 0x317   : > { %v6491_v35 = vmax.f32 %v2545_v63, %v2546_v21  ;;  %v5192_v17 = vpop.f32.mrf.mxu0 }
 0x318   : > { %v6494_v34 = vsel %vm2459_vm3, %v5192_v17, -inf }
 0x319   : > { %v2428_v24 = vpop.f32.mrf.mxu0 }
 0x31a   : > { %v6499_v26 = vsel %vm2459_vm3, %v2428_v24, -inf }
 0x31b   : > { %v5193_v28 = vpop.f32.mrf.mxu0 }
 0x31c   : > { %v6504_v29 = vsel %vm2459_vm3, %v5193_v28, -inf }
 0x31d   : > { %v2431_v31 = vpop.f32.mrf.mxu0 }
 0x31e   : > { %v6509_v25 = vsel %vm2459_vm3, %v2431_v31, -inf }
 0x31f   : > { %v5196_v36 = vpop.f32.mrf.mxu0 }
 0x320   : > { %v6514_v37 = vsel %vm2459_vm3, %v5196_v36, -inf }
 0x321   : > { %v2444_v40 = vpop.f32.mrf.mxu0 }
 0x322   : > { %v6519_v41 = vsel %vm2459_vm3, %v2444_v40, -inf }
 0x323   : > { %v5197_v32 = vpop.f32.mrf.mxu0 }
 0x324   : > { %v6524_v44 = vsel %vm2459_vm3, %v5197_v32, -inf }
 0x325   : > { %v2447_v46 = vpop.f32.mrf.mxu0 }
 0x326   : > { %v6529_v43 = vsel %vm2459_vm3, %v2447_v46, -inf }
 0x327   : > { %v5268_v49 = vpop.f32.mrf.mxu0 }
 0x328   : > { %v3425_v55 = vadd.f32 %v6536_v52, %v5268_v49 }
 0x329   : > { %v3416_v50 = vpop.f32.mrf.mxu0 }
 0x32a   : > { %v3417_v54 = vadd.f32 %v6536_v52, %v3416_v50  ;;  %v3673_v62 = vmax.f32 %v3425_v55, 0.0 }
 0x32b   : > { %v5269_v51 = vpop.f32.mrf.mxu0 }
 0x32c   : > { %v3428_v48 = vadd.f32 %v6536_v52, %v5269_v51  ;;  %v3671_v61 = vmax.f32 %v3417_v54, 0.0 }
 0x32d   : > { %v3419_v56 = vpop.f32.mrf.mxu0 }
 0x32e   : > { %v3420_v58 = vadd.f32 %v6536_v52, %v3419_v56  ;;  %v3674_v53 = vmax.f32 %v3428_v48, 0.0 }
 0x32f   : > { %v5272_v60 = vpop.f32.mrf.mxu0 }
 0x330   : > { %v3672_v59 = vmax.f32 %v3420_v58, 0.0  ;;  %v3736_v4 = vpack.c.bf16 %v3674_v53, %v3673_v62  ;;  %v3441_v8 = vadd.f32 %v6536_v52, %v5272_v60 }
 0x331   : > { %v3432_v57 = vpop.f32.mrf.mxu0 }
 0x332   : > { %v3735_v63 = vpack.c.bf16 %v3672_v59, %v3671_v61  ;;  %v3433_v3 = vadd.f32 %v6536_v52, %v3432_v57  ;;  %v3677_v2 = vmax.f32 %v3441_v8, 0.0 }
 0x333   : > { %v5273_v6 = vpop.f32.mrf.mxu0 }
 0x334   : > { %v3444_v7 = vadd.f32 %v6536_v52, %v5273_v6  ;;  %5332 = vmatprep.mubr.msk.bf16.mxu1 %vm1586_vm2, %v3735_v63  ;;  %v3675_v38 = vmax.f32 %v3433_v3, 0.0 }
 0x335   : > { %v3435_v23 = vpop.f32.mrf.mxu0  ;;  %5333 = vmatmul.mubr.msk.bf16.vlgmr.msra.gmra.mxu1 %vm1586_vm2, %v3736_v4 }
 0x336   : > { %v3436_v10 = vadd.f32 %v6536_v52, %v3435_v23  ;;  %v3678_v12 = vmax.f32 %v3444_v7, 0.0 }
 0x337   : > { %v5276_v14 = vpop.f32.mrf.mxu0 }
 0x338   : > { %v3676_v0 = vmax.f32 %v3436_v10, 0.0  ;;  %v3738_v19 = vpack.c.bf16 %v3678_v12, %v3677_v2  ;;  %v3457_v28 = vadd.f32 %v6536_v52, %v5276_v14 }
 0x339   : > { %v3448_v16 = vpop.f32.mrf.mxu0 }
 0x33a   : > { %v3737_v18 = vpack.c.bf16 %v3676_v0, %v3675_v38  ;;  %v3449_v17 = vadd.f32 %v6536_v52, %v3448_v16  ;;  %v3681_v50 = vmax.f32 %v3457_v28, 0.0 }
 0x33b   : > { %v5277_v21 = vpop.f32.mrf.mxu0 }
 0x33c   : > { %v3460_v24 = vadd.f32 %v6536_v52, %v5277_v21  ;;  %5336 = vmatprep.mubr.msk.bf16.mxu1 %vm1586_vm2, %v3737_v18  ;;  %v3679_v46 = vmax.f32 %v3449_v17, 0.0 }
 0x33d   : > { %v3451_v31 = vpop.f32.mrf.mxu0  ;;  %5337 = vmatmul.mubr.msk.bf16.gmra.mxu1 %vm1586_vm2, %v3738_v19 }
 0x33e   : > { %v3452_v36 = vadd.f32 %v6536_v52, %v3451_v31  ;;  %v3682_v40 = vmax.f32 %v3460_v24, 0.0 }
 0x33f   : > { %v5280_v32 = vpop.f32.mrf.mxu0 }
 0x340   : > { %v3680_v49 = vmax.f32 %v3452_v36, 0.0  ;;  %v3740_v48 = vpack.c.bf16 %v3682_v40, %v3681_v50  ;;  %v3473_v53 = vadd.f32 %v6536_v52, %v5280_v32 }
 0x341   : > { %v3464_v51 = vpop.f32.mrf.mxu0 }
 0x342   : > { %v3739_v54 = vpack.c.bf16 %v3680_v49, %v3679_v46  ;;  %v3465_v56 = vadd.f32 %v6536_v52, %v3464_v51  ;;  %v3685_v4 = vmax.f32 %v3473_v53, 0.0 }
 0x343   : > { %v5281_v55 = vpop.f32.mrf.mxu0 }
 0x344   : > { %v3476_v58 = vadd.f32 %v6536_v52, %v5281_v55  ;;  %5340 = vmatprep.mubr.msk.bf16.mxu1 %vm1586_vm2, %v3739_v54  ;;  %v3683_v57 = vmax.f32 %v3465_v56, 0.0 }
 0x345   : > { %v3467_v60 = vpop.f32.mrf.mxu0  ;;  %5341 = vmatmul.mubr.msk.bf16.gmra.mxu1 %vm1586_vm2, %v3740_v48 }
 0x346   : > { %v3468_v61 = vadd.f32 %v6536_v52, %v3467_v60  ;;  %v3686_v59 = vmax.f32 %v3476_v58, 0.0 }
 0x347   : > { %v5284_v62 = vpop.f32.mrf.mxu0 }
 0x348   : > { %v3684_v63 = vmax.f32 %v3468_v61, 0.0  ;;  %v3742_v7 = vpack.c.bf16 %v3686_v59, %v3685_v4  ;;  %v3489_v12 = vadd.f32 %v6536_v52, %v5284_v62 }
 0x349   : > { %v3480_v6 = vpop.f32.mrf.mxu0 }
 0x34a   : > { %v3741_v3 = vpack.c.bf16 %v3684_v63, %v3683_v57  ;;  %v3481_v23 = vadd.f32 %v6536_v52, %v3480_v6  ;;  %v3689_v19 = vmax.f32 %v3489_v12, 0.0 }
 0x34b   : > { %v5285_v8 = vpop.f32.mrf.mxu0 }
 0x34c   : > { %v3492_v10 = vadd.f32 %v6536_v52, %v5285_v8  ;;  %5344 = vmatprep.mubr.msk.bf16.mxu1 %vm1586_vm2, %v3741_v3  ;;  %v3687_v16 = vmax.f32 %v3481_v23, 0.0 }
 0x34d   : > { %v3483_v14 = vpop.f32.mrf.mxu0  ;;  %5345 = vmatmul.mubr.msk.bf16.gmra.mxu1 %vm1586_vm2, %v3742_v7 }
 0x34e   : > { %v3484_v38 = vadd.f32 %v6536_v52, %v3483_v14  ;;  %v3690_v0 = vmax.f32 %v3492_v10, 0.0 }
 0x34f   : > { %v5288_v2 = vpop.f32.mrf.mxu0 }
 0x350   : > { %v3688_v18 = vmax.f32 %v3484_v38, 0.0  ;;  %v3744_v24 = vpack.c.bf16 %v3690_v0, %v3689_v19  ;;  %v3505_v40 = vadd.f32 %v6536_v52, %v5288_v2 }
 0x351   : > { %v3496_v21 = vpop.f32.mrf.mxu0 }
 0x352   : > { %v3743_v17 = vpack.c.bf16 %v3688_v18, %v3687_v16  ;;  %v3497_v31 = vadd.f32 %v6536_v52, %v3496_v21  ;;  %v3693_v48 = vmax.f32 %v3505_v40, 0.0 }
 0x353   : > { %v5289_v28 = vpop.f32.mrf.mxu0 }
 0x354   : > { %v3508_v36 = vadd.f32 %v6536_v52, %v5289_v28  ;;  %5348 = vmatprep.mubr.msk.bf16.mxu1 %vm1586_vm2, %v3743_v17  ;;  %v3691_v51 = vmax.f32 %v3497_v31, 0.0 }
 0x355   : > { %v3499_v32 = vpop.f32.mrf.mxu0  ;;  %5349 = vmatmul.mubr.msk.bf16.gmra.mxu1 %vm1586_vm2, %v3744_v24 }
 0x356   : > { %v3500_v46 = vadd.f32 %v6536_v52, %v3499_v32  ;;  %v3694_v49 = vmax.f32 %v3508_v36, 0.0 }
 0x357   : > { %v5292_v50 = vpop.f32.mrf.mxu0 }
 0x358   : > { %v3692_v54 = vmax.f32 %v3500_v46, 0.0  ;;  %v3746_v58 = vpack.c.bf16 %v3694_v49, %v3693_v48  ;;  %v3521_v59 = vadd.f32 %v6536_v52, %v5292_v50 }
 0x359   : > { %v3512_v55 = vpop.f32.mrf.mxu0 }
 0x35a   : > { %v3745_v56 = vpack.c.bf16 %v3692_v54, %v3691_v51  ;;  %v3513_v60 = vadd.f32 %v6536_v52, %v3512_v55  ;;  %v3697_v7 = vmax.f32 %v3521_v59, 0.0 }
 0x35b   : > { %v5293_v53 = vpop.f32.mrf.mxu0 }
 0x35c   : > { %v3524_v61 = vadd.f32 %v6536_v52, %v5293_v53  ;;  %5352 = vmatprep.mubr.msk.bf16.mxu1 %vm1586_vm2, %v3745_v56  ;;  %v3695_v6 = vmax.f32 %v3513_v60, 0.0 }
 0x35d   : > { %v3515_v62 = vpop.f32.mrf.mxu0  ;;  %5353 = vmatmul.mubr.msk.bf16.gmra.mxu1 %vm1586_vm2, %v3746_v58 }
 0x35e   : > { %v3516_v57 = vadd.f32 %v6536_v52, %v3515_v62  ;;  %v3698_v63 = vmax.f32 %v3524_v61, 0.0 }
 0x35f   : > { %v5296_v4 = vpop.f32.mrf.mxu0 }
 0x360   : > { %v3696_v3 = vmax.f32 %v3516_v57, 0.0  ;;  %v3748_v10 = vpack.c.bf16 %v3698_v63, %v3697_v7  ;;  %v3537_v0 = vadd.f32 %v6536_v52, %v5296_v4 }
 0x361   : > { %v3528_v8 = vpop.f32.mrf.mxu0 }
 0x362   : > { %v3747_v23 = vpack.c.bf16 %v3696_v3, %v3695_v6  ;;  %v3529_v14 = vadd.f32 %v6536_v52, %v3528_v8  ;;  %v3701_v24 = vmax.f32 %v3537_v0, 0.0 }
 0x363   : > { %v5297_v12 = vpop.f32.mrf.mxu0 }
 0x364   : > { %v3540_v38 = vadd.f32 %v6536_v52, %v5297_v12  ;;  %5356 = vmatprep.mubr.msk.bf16.mxu1 %vm1586_vm2, %v3747_v23  ;;  %v3699_v21 = vmax.f32 %v3529_v14, 0.0 }
 0x365   : > { %v3531_v2 = vpop.f32.mrf.mxu0  ;;  %5357 = vmatmul.mubr.msk.bf16.gmra.mxu1 %vm1586_vm2, %v3748_v10 }
 0x366   : > { %v3532_v16 = vadd.f32 %v6536_v52, %v3531_v2  ;;  %v3702_v18 = vmax.f32 %v3540_v38, 0.0 }
 0x367   : > { %v5300_v19 = vpop.f32.mrf.mxu0 }
 0x368   : > { %v3700_v17 = vmax.f32 %v3532_v16, 0.0  ;;  %v3750_v36 = vpack.c.bf16 %v3702_v18, %v3701_v24  ;;  %v3553_v49 = vadd.f32 %v6536_v52, %v5300_v19 }
 0x369   : > { %v3544_v28 = vpop.f32.mrf.mxu0 }
 0x36a   : > { %v3749_v31 = vpack.c.bf16 %v3700_v17, %v3699_v21  ;;  %v3545_v32 = vadd.f32 %v6536_v52, %v3544_v28  ;;  %v3705_v58 = vmax.f32 %v3553_v49, 0.0 }
 0x36b   : > { %v5301_v40 = vpop.f32.mrf.mxu0 }
 0x36c   : > { %v3556_v46 = vadd.f32 %v6536_v52, %v5301_v40  ;;  %5360 = vmatprep.mubr.msk.bf16.mxu1 %vm1586_vm2, %v3749_v31  ;;  %v3703_v55 = vmax.f32 %v3545_v32, 0.0 }
 0x36d   : > { %v3547_v50 = vpop.f32.mrf.mxu0  ;;  %5361 = vmatmul.mubr.msk.bf16.gmra.mxu1 %vm1586_vm2, %v3750_v36 }
 0x36e   : > { %v3548_v51 = vadd.f32 %v6536_v52, %v3547_v50  ;;  %v3706_v54 = vmax.f32 %v3556_v46, 0.0 }
 0x36f   : > { %v5304_v48 = vpop.f32.mrf.mxu0 }
 0x370   : > { %v3704_v56 = vmax.f32 %v3548_v51, 0.0  ;;  %v3752_v61 = vpack.c.bf16 %v3706_v54, %v3705_v58  ;;  %v3569_v63 = vadd.f32 %v6536_v52, %v5304_v48 }
 0x371   : > { %v3560_v53 = vpop.f32.mrf.mxu0 }
 0x372   : > { %v3751_v60 = vpack.c.bf16 %v3704_v56, %v3703_v55  ;;  %v3561_v62 = vadd.f32 %v6536_v52, %v3560_v53  ;;  %v3709_v10 = vmax.f32 %v3569_v63, 0.0 }
 0x373   : > { %v5305_v59 = vpop.f32.mrf.mxu0 }
 0x374   : > { %v3572_v57 = vadd.f32 %v6536_v52, %v5305_v59  ;;  %5364 = vmatprep.mubr.msk.bf16.mxu1 %vm1586_vm2, %v3751_v60  ;;  %v3707_v8 = vmax.f32 %v3561_v62, 0.0 }
 0x375   : > { %v3563_v4 = vpop.f32.mrf.mxu0  ;;  %5365 = vmatmul.mubr.msk.bf16.gmra.mxu1 %vm1586_vm2, %v3752_v61 }
 0x376   : > { %v3564_v6 = vadd.f32 %v6536_v52, %v3563_v4  ;;  %v3710_v3 = vmax.f32 %v3572_v57, 0.0 }
 0x377   : > { %v5308_v7 = vpop.f32.mrf.mxu0 }
 0x378   : > { %v3708_v23 = vmax.f32 %v3564_v6, 0.0  ;;  %v3754_v38 = vpack.c.bf16 %v3710_v3, %v3709_v10  ;;  %v3585_v18 = vadd.f32 %v6536_v52, %v5308_v7 }
 0x379   : > { %v3576_v12 = vpop.f32.mrf.mxu0 }
 0x37a   : > { %v3753_v14 = vpack.c.bf16 %v3708_v23, %v3707_v8  ;;  %v3577_v2 = vadd.f32 %v6536_v52, %v3576_v12  ;;  %v3713_v36 = vmax.f32 %v3585_v18, 0.0 }
 0x37b   : > { %v5309_v0 = vpop.f32.mrf.mxu0 }
 0x37c   : > { %v3588_v16 = vadd.f32 %v6536_v52, %v5309_v0  ;;  %5368 = vmatprep.mubr.msk.bf16.mxu1 %vm1586_vm2, %v3753_v14  ;;  %v3711_v28 = vmax.f32 %v3577_v2, 0.0 }
 0x37d   : > { %v3579_v19 = vpop.f32.mrf.mxu0  ;;  %5369 = vmatmul.mubr.msk.bf16.gmra.mxu1 %vm1586_vm2, %v3754_v38 }
 0x37e   : > { %v3580_v21 = vadd.f32 %v6536_v52, %v3579_v19  ;;  %v3714_v17 = vmax.f32 %v3588_v16, 0.0 }
 0x37f   : > { %v5312_v24 = vpop.f32.mrf.mxu0 }
 0x380   : > { %v3712_v31 = vmax.f32 %v3580_v21, 0.0  ;;  %v3756_v46 = vpack.c.bf16 %v3714_v17, %v3713_v36  ;;  %v3601_v54 = vadd.f32 %v6536_v52, %v5312_v24 }
 0x381   : > { %v3592_v40 = vpop.f32.mrf.mxu0 }
 0x382   : > { %v3755_v32 = vpack.c.bf16 %v3712_v31, %v3711_v28  ;;  %v3593_v50 = vadd.f32 %v6536_v52, %v3592_v40  ;;  %v3717_v61 = vmax.f32 %v3601_v54, 0.0 }
 0x383   : > { %v5313_v49 = vpop.f32.mrf.mxu0 }
 0x384   : > { %v3604_v51 = vadd.f32 %v6536_v52, %v5313_v49  ;;  %5372 = vmatprep.mubr.msk.bf16.mxu1 %vm1586_vm2, %v3755_v32  ;;  %v3715_v53 = vmax.f32 %v3593_v50, 0.0 }
 0x385   : > { %v3595_v48 = vpop.f32.mrf.mxu0  ;;  %5373 = vmatmul.mubr.msk.bf16.gmra.mxu1 %vm1586_vm2, %v3756_v46 }
 0x386   : > { %v3596_v55 = vadd.f32 %v6536_v52, %v3595_v48  ;;  %v3718_v56 = vmax.f32 %v3604_v51, 0.0 }
 0x387   : > { %v5316_v58 = vpop.f32.mrf.mxu0 }
 0x388   : > { %v3716_v60 = vmax.f32 %v3596_v55, 0.0  ;;  %v3758_v57 = vpack.c.bf16 %v3718_v56, %v3717_v61  ;;  %v3617_v3 = vadd.f32 %v6536_v52, %v5316_v58 }
 0x389   : > { %v3608_v59 = vpop.f32.mrf.mxu0 }
 0x38a   : > { %v3757_v62 = vpack.c.bf16 %v3716_v60, %v3715_v53  ;;  %v3609_v4 = vadd.f32 %v6536_v52, %v3608_v59  ;;  %v3721_v38 = vmax.f32 %v3617_v3, 0.0 }
 0x38b   : > { %v5317_v63 = vpop.f32.mrf.mxu0 }
 0x38c   : > { %v3620_v6 = vadd.f32 %v6536_v52, %v5317_v63  ;;  %5376 = vmatprep.mubr.msk.bf16.mxu1 %vm1586_vm2, %v3757_v62  ;;  %v3719_v12 = vmax.f32 %v3609_v4, 0.0 }
 0x38d   : > { %v3611_v7 = vpop.f32.mrf.mxu0  ;;  %5377 = vmatmul.mubr.msk.bf16.gmra.mxu1 %vm1586_vm2, %v3758_v57 }
 0x38e   : > { %v3612_v8 = vadd.f32 %v6536_v52, %v3611_v7  ;;  %v3722_v23 = vmax.f32 %v3620_v6, 0.0 }
 0x38f   : > { %v5320_v10 = vpop.f32.mrf.mxu0 }
 0x390   : > { %v3720_v14 = vmax.f32 %v3612_v8, 0.0  ;;  %v3760_v16 = vpack.c.bf16 %v3722_v23, %v3721_v38  ;;  %v3633_v17 = vadd.f32 %v6536_v52, %v5320_v10 }
 0x391   : > { %v3624_v0 = vpop.f32.mrf.mxu0 }
 0x392   : > { %v3759_v2 = vpack.c.bf16 %v3720_v14, %v3719_v12  ;;  %v3625_v19 = vadd.f32 %v6536_v52, %v3624_v0  ;;  %v3725_v46 = vmax.f32 %v3633_v17, 0.0 }
 0x393   : > { %v5321_v18 = vpop.f32.mrf.mxu0 }
 0x394   : > { %v3636_v21 = vadd.f32 %v6536_v52, %v5321_v18  ;;  %5380 = vmatprep.mubr.msk.bf16.mxu1 %vm1586_vm2, %v3759_v2  ;;  %v3723_v40 = vmax.f32 %v3625_v19, 0.0 }
 0x395   : > { %v3627_v24 = vpop.f32.mrf.mxu0  ;;  %5381 = vmatmul.mubr.msk.bf16.gmra.mxu1 %vm1586_vm2, %v3760_v16 }
 0x396   : > { %v3628_v28 = vadd.f32 %v6536_v52, %v3627_v24  ;;  %v3726_v31 = vmax.f32 %v3636_v21, 0.0 }
 0x397   : > { %v5324_v36 = vpop.f32.mrf.mxu0 }
 0x398   : > { %v3724_v32 = vmax.f32 %v3628_v28, 0.0  ;;  %v3762_v51 = vpack.c.bf16 %v3726_v31, %v3725_v46  ;;  %v3649_v56 = vadd.f32 %v6536_v52, %v5324_v36 }
 0x399   : > { %v3640_v49 = vpop.f32.mrf.mxu0 }
 0x39a   : > { %v3761_v50 = vpack.c.bf16 %v3724_v32, %v3723_v40  ;;  %v3641_v48 = vadd.f32 %v6536_v52, %v3640_v49  ;;  %v3729_v57 = vmax.f32 %v3649_v56, 0.0 }
 0x39b   : > { %v5325_v54 = vpop.f32.mrf.mxu0 }
 0x39c   : > { %v3652_v55 = vadd.f32 %v6536_v52, %v5325_v54  ;;  %5384 = vmatprep.mubr.msk.bf16.mxu1 %vm1586_vm2, %v3761_v50  ;;  %v3727_v59 = vmax.f32 %v3641_v48, 0.0 }
 0x39d   : > { %v3643_v58 = vpop.f32.mrf.mxu0  ;;  %5385 = vmatmul.mubr.msk.bf16.gmra.mxu1 %vm1586_vm2, %v3762_v51 }
 0x39e   : > { %v3644_v53 = vadd.f32 %v6536_v52, %v3643_v58  ;;  %v3730_v60 = vmax.f32 %v3652_v55, 0.0 }
 0x39f   : > { %v5328_v61 = vpop.f32.mrf.mxu0 }
 0x3a0   : > { %v3728_v62 = vmax.f32 %v3644_v53, 0.0  ;;  %v3764_v6 = vpack.c.bf16 %v3730_v60, %v3729_v57  ;;  %v3665_v23 = vadd.f32 %v6536_v52, %v5328_v61 }
 0x3a1   : > { %v3656_v63 = vpop.f32.mrf.mxu0 }
 0x3a2   : > { %v3763_v4 = vpack.c.bf16 %v3728_v62, %v3727_v59  ;;  %v3657_v7 = vadd.f32 %v6536_v52, %v3656_v63  ;;  %v3733_v2 = vmax.f32 %v3665_v23, 0.0 }
 0x3a3   : > { %v5329_v3 = vpop.f32.mrf.mxu0 }
 0x3a4   : > { %v3668_v8 = vadd.f32 %v6536_v52, %v5329_v3  ;;  %5388 = vmatprep.mubr.msk.bf16.mxu1 %vm1586_vm2, %v3763_v4  ;;  %v3731_v38 = vmax.f32 %v3657_v7, 0.0 }
 0x3a5   : > { %v3659_v10 = vpop.f32.mrf.mxu0  ;;  %5389 = vmatmul.mubr.msk.bf16.gmra.mxu1 %vm1586_vm2, %v3764_v6 }
 0x3a6   : > { %v3660_v12 = vadd.f32 %v6536_v52, %v3659_v10  ;;  %v3734_v14 = vmax.f32 %v3668_v8, 0.0 }
 0x3a8   : > { %v3732_v0 = vmax.f32 %v3660_v12, 0.0  ;;  %v3766_v18 = vpack.c.bf16 %v3734_v14, %v3733_v2 }
 0x3aa   : > { %v3765_v16 = vpack.c.bf16 %v3732_v0, %v3731_v38 }
 0x3ac   : > { %5392 = vmatprep.mubr.msk.bf16.mxu1 %vm1586_vm2, %v3765_v16 }
 0x3ad   : > { %5393 = vmatmul.mubr.msk.bf16.gmra.mxu1 %vm1586_vm2, %v3766_v18 }
 0x3f5   : > { %v5334_v19 = vpop.f32.mrf.mxu1 }
 0x3f6   : > { %v4182_v52 = vsel %vm2459_vm3, %v5334_v19, -inf }
 0x3f7   : > { %v3897_v21 = vpop.f32.mrf.mxu1 }
 0x3f8   : > { %v4152_v51 = vsel %vm2459_vm3, %v3897_v21, -inf }
 0x3f9   : > { %v5335_v17 = vpop.f32.mrf.mxu1 }
 0x3fa   : > { %v4197_v56 = vsel %vm2459_vm3, %v5335_v17, -inf }
 0x3fb   : > { %v3900_v24 = vpop.f32.mrf.mxu1 }
 0x3fc   : > { %v4167_v61 = vsel %vm2459_vm3, %v3900_v24, -inf }
 0x3fd   : > { %v5338_v28 = vpop.f32.mrf.mxu1 }
 0x3fe   : > { %v4242_v63 = vsel %vm2459_vm3, %v5338_v28, -inf }
 0x3ff   : > { %v3913_v31 = vpop.f32.mrf.mxu1 }
 0x400   : > { %v4212_v7 = vsel %vm2459_vm3, %v3913_v31, -inf }
 0x401   : > { %v5339_v36 = vpop.f32.mrf.mxu1 }
 0x402   : > { %v4257_v12 = vsel %vm2459_vm3, %v5339_v36, -inf }
 0x403   : > { %v3916_v40 = vpop.f32.mrf.mxu1 }
 0x404   : > { %v4227_v2 = vsel %vm2459_vm3, %v3916_v40, -inf }
 0x405   : > { %v5342_v32 = vpop.f32.mrf.mxu1 }
 0x406   : > { %v4183_v46 = vsel %vm2459_vm3, %v5342_v32, -inf }
 0x407   : > { %v4184_v49 = vmax.f32 %v4182_v52, %v4183_v46  ;;  %v3929_v50 = vpop.f32.mrf.mxu1 }
 0x408   : > { %v4153_v54 = vsel %vm2459_vm3, %v3929_v50, -inf }
 0x409   : > { %v4154_v48 = vmax.f32 %v4152_v51, %v4153_v54  ;;  %v5343_v55 = vpop.f32.mrf.mxu1 }
 0x40a   : > { %v4198_v58 = vsel %vm2459_vm3, %v5343_v55, -inf }
 0x40b   : > { %v4199_v53 = vmax.f32 %v4197_v56, %v4198_v58  ;;  %v3932_v60 = vpop.f32.mrf.mxu1 }
 0x40c   : > { %v4168_v59 = vsel %vm2459_vm3, %v3932_v60, -inf }
 0x40d   : > { %v4169_v62 = vmax.f32 %v4167_v61, %v4168_v59  ;;  %v5346_v57 = vpop.f32.mrf.mxu1 }
 0x40e   : > { %v4243_v4 = vsel %vm2459_vm3, %v5346_v57, -inf }
 0x40f   : > { %v4244_v6 = vmax.f32 %v4242_v63, %v4243_v4  ;;  %v3945_v3 = vpop.f32.mrf.mxu1 }
 0x410   : > { %v4213_v8 = vsel %vm2459_vm3, %v3945_v3, -inf }
 0x411   : > { %v4214_v23 = vmax.f32 %v4212_v7, %v4213_v8  ;;  %v5347_v10 = vpop.f32.mrf.mxu1 }
 0x412   : > { %v4258_v14 = vsel %vm2459_vm3, %v5347_v10, -inf }
 0x413   : > { %v4259_v38 = vmax.f32 %v4257_v12, %v4258_v14  ;;  %v3948_v0 = vpop.f32.mrf.mxu1 }
 0x414   : > { %v4228_v16 = vsel %vm2459_vm3, %v3948_v0, -inf }
 0x415   : > { %v4229_v18 = vmax.f32 %v4227_v2, %v4228_v16  ;;  %v5350_v19 = vpop.f32.mrf.mxu1 }
 0x416   : > { %v4185_v21 = vsel %vm2459_vm3, %v5350_v19, -inf }
 0x417   : > { %v6651_v17 = vmax.f32 %v4184_v49, %v4185_v21  ;;  %v3961_v24 = vpop.f32.mrf.mxu1 }
 0x418   : > { %v4155_v28 = vsel %vm2459_vm3, %v3961_v24, -inf }
 0x419   : > { %v6654_v31 = vmax.f32 %v4154_v48, %v4155_v28  ;;  %v5351_v36 = vpop.f32.mrf.mxu1 }
 0x41a   : > { %v4200_v32 = vsel %vm2459_vm3, %v5351_v36, -inf }
 0x41b   : > { %v6657_v52 = vmax.f32 %v4199_v53, %v4200_v32  ;;  %v3964_v46 = vpop.f32.mrf.mxu1 }
 0x41c   : > { %v4170_v40 = vsel %vm2459_vm3, %v3964_v46, -inf }
 0x41d   : > { %v6660_v50 = vmax.f32 %v4169_v62, %v4170_v40  ;;  %v5354_v51 = vpop.f32.mrf.mxu1 }
 0x41e   : > { %v4245_v54 = vsel %vm2459_vm3, %v5354_v51, -inf }
 0x41f   : > { %v6663_v49 = vmax.f32 %v4244_v6, %v4245_v54  ;;  %v3977_v55 = vpop.f32.mrf.mxu1 }
 0x420   : > { %v4215_v56 = vsel %vm2459_vm3, %v3977_v55, -inf }
 0x421   : > { %v6666_v48 = vmax.f32 %v4214_v23, %v4215_v56  ;;  %v5355_v58 = vpop.f32.mrf.mxu1 }
 0x422   : > { %v4260_v60 = vsel %vm2459_vm3, %v5355_v58, -inf }
 0x423   : > { %v6669_v53 = vmax.f32 %v4259_v38, %v4260_v60  ;;  %v3980_v61 = vpop.f32.mrf.mxu1 }
 0x424   : > { %v4230_v59 = vsel %vm2459_vm3, %v3980_v61, -inf }
 0x425   : > { %v6672_v62 = vmax.f32 %v4229_v18, %v4230_v59  ;;  %v5358_v57 = vpop.f32.mrf.mxu1 }
 0x426   : > { %v4187_v56 = vsel %vm2459_vm3, %v5358_v57, -inf }
 0x427   : > { %v3993_v63 = vpop.f32.mrf.mxu1  ;;  %v4188_v42 = vmax.f32 %v6651_v17, %v4187_v56 }
 0x428   : > { %v4157_v60 = vsel %vm2459_vm3, %v3993_v63, -inf }
 0x429   : > { %v5359_v4 = vpop.f32.mrf.mxu1  ;;  %v4158_v30 = vmax.f32 %v6654_v31, %v4157_v60 }
 0x42a   : > { %v4202_v61 = vsel %vm2459_vm3, %v5359_v4, -inf }
 0x42b   : > { %v3996_v6 = vpop.f32.mrf.mxu1  ;;  %v4203_v57 = vmax.f32 %v6657_v52, %v4202_v61 }
 0x42c   : > { %v4172_v59 = vsel %vm2459_vm3, %v3996_v6, -inf }
 0x42d   : > { %v5362_v3 = vpop.f32.mrf.mxu1  ;;  %v4173_v27 = vmax.f32 %v6660_v50, %v4172_v59 }
 0x42e   : > { %v4247_v47 = vsel %vm2459_vm3, %v5362_v3, -inf }
 0x42f   : > { %v4009_v7 = vpop.f32.mrf.mxu1  ;;  %v4248_v6 = vmax.f32 %v6663_v49, %v4247_v47 }
 0x430   : > { %v4217_v39 = vsel %vm2459_vm3, %v4009_v7, -inf }
 0x431   : > { %v5363_v8 = vpop.f32.mrf.mxu1  ;;  %v4218_v7 = vmax.f32 %v6666_v48, %v4217_v39 }
 0x432   : > { %v4262_v63 = vsel %vm2459_vm3, %v5363_v8, -inf }
 0x433   : > { %v4012_v10 = vpop.f32.mrf.mxu1  ;;  %v4263_v50 = vmax.f32 %v6669_v53, %v4262_v63 }
 0x434   : > { %v4232_v3 = vsel %vm2459_vm3, %v4012_v10, -inf }
 0x435   : > { %v5366_v23 = vpop.f32.mrf.mxu1  ;;  %v4233_v10 = vmax.f32 %v6672_v62, %v4232_v3 }
 0x436   : > { %v4189_v33 = vsel %vm2459_vm3, %v5366_v23, -inf }
 0x437   : > { %v4025_v12 = vpop.f32.mrf.mxu1  ;;  %v4190_v23 = vmax.f32 %v4188_v42, %v4189_v33 }
 0x438   : > { %v4159_v22 = vsel %vm2459_vm3, %v4025_v12, -inf }
 0x439   : > { %v5367_v14 = vpop.f32.mrf.mxu1  ;;  %v4160_v12 = vmax.f32 %v4158_v30, %v4159_v22 }
 0x43a   : > { %v4204_v31 = vsel %vm2459_vm3, %v5367_v14, -inf }
 0x43b   : > { %v4028_v0 = vpop.f32.mrf.mxu1  ;;  %v4205_v42 = vmax.f32 %v4203_v57, %v4204_v31 }
 0x43c   : > { %v4174_v52 = vsel %vm2459_vm3, %v4028_v0, -inf }
 0x43d   : > { %v5370_v2 = vpop.f32.mrf.mxu1  ;;  %v4175_v48 = vmax.f32 %v4173_v27, %v4174_v52 }
 0x43e   : > { %v4249_v8 = vsel %vm2459_vm3, %v5370_v2, -inf }
 0x43f   : > { %v4041_v38 = vpop.f32.mrf.mxu1  ;;  %v4250_v53 = vmax.f32 %v4248_v6, %v4249_v8 }
 0x441   : > { %v5371_v16 = vpop.f32.mrf.mxu1 }
 0x442   : > { %v4264_v62 = vsel %vm2459_vm3, %v5371_v16, -inf }
 0x443   : > { %v6674_v19 = vpop.f32.mrf.mxu1 }
 0x445   : > { %v5374_v21 = vpop.f32.mrf.mxu1 }
 0x446   : > { %v4191_v17 = vsel %vm2459_vm3, %v5374_v21, -inf  ;;  %v4219_v21 = vsel %vm2459_vm3, %v4041_v38, -inf }
 0x447   : > { %v4057_v18 = vpop.f32.mrf.mxu1  ;;  %v4192_v39 = vmax.f32 %v4190_v23, %v4191_v17 }
 0x448   : > { %v4161_v47 = vsel %vm2459_vm3, %v4057_v18, -inf }
 0x449   : > { %v5375_v24 = vpop.f32.mrf.mxu1  ;;  %v4162_v60 = vmax.f32 %v4160_v12, %v4161_v47  ;;  %v6847_v47 = vmax.f32 %v6473_v1, %v6499_v26 }
 0x44a   : > { %v4206_v14 = vsel %vm2459_vm3, %v5375_v24, -inf }
 0x44b   : > { %v4060_v28 = vpop.f32.mrf.mxu1  ;;  %v4207_v38 = vmax.f32 %v4205_v42, %v4206_v14 }
 0x44c   : > { %v4176_v2 = vsel %vm2459_vm3, %v4060_v28, -inf }
 0x44d   : > { %v5378_v36 = vpop.f32.mrf.mxu1  ;;  %v4177_v63 = vmax.f32 %v4175_v48, %v4176_v2  ;;  %v6848_v48 = vmax.f32 %v6476_v9, %v6504_v29  ;;  %v6849_v2 = vmax.f32 %v6479_v13, %v6509_v25 }
 0x44e   : > { %v4251_v27 = vsel %vm2459_vm3, %v5378_v36, -inf  ;;  %v6846_v36 = vmax.f32 %v6470_v20, %v6494_v34 }
 0x44f   : > { %v4073_v32 = vpop.f32.mrf.mxu1  ;;  %v4252_v31 = vmax.f32 %v4250_v53, %v4251_v27 }
 0x450   : > { %v4221_v16 = vsel %vm2459_vm3, %v4073_v32, -inf }
 0x451   : > { %v6676_v46 = vpop.f32.mrf.mxu1 }
 0x453   : > { %v6678_v40 = vpop.f32.mrf.mxu1 }
 0x454   : > { %v4236_v1 = vsel %vm2459_vm3, %v6678_v40, -inf }
 0x455   : > { %v5382_v51 = vpop.f32.mrf.mxu1 }
 0x456   : > { %v4193_v49 = vsel %vm2459_vm3, %v5382_v51, -inf  ;;  %v4220_v51 = vmax.f32 %v4218_v7, %v4219_v21 }
 0x457   : > { %v4089_v54 = vpop.f32.mrf.mxu1  ;;  %v4194_v18 = vmax.f32 %v4192_v39, %v4193_v49 }
 0x458   : > { %v4163_v0 = vsel %vm2459_vm3, %v4089_v54, -inf  ;;  %v4234_v54 = vsel %vm2459_vm3, %v6674_v19, -inf  ;;  %v4265_v19 = vmax.f32 %v4263_v50, %v4264_v62  ;;  %v4222_v20 = vmax.f32 %v4220_v51, %v4221_v16 }
 0x459   : > { %v5383_v55 = vpop.f32.mrf.mxu1  ;;  %v4164_v59 = vmax.f32 %v4162_v60, %v4163_v0  ;;  %v4235_v39 = vmax.f32 %v4233_v10, %v4234_v54 }
 0x45a   : > { %v4208_v22 = vsel %vm2459_vm3, %v5383_v55, -inf  ;;  %v6720_v55 = vld [vmem:[%s6839_s6] ss:$0 sm:$0xff] }
 0x45b   : > { %v4092_v58 = vpop.f32.mrf.mxu1  ;;  %v4209_v3 = vmax.f32 %v4207_v38, %v4208_v22 }
 0x45c   : > { %v4178_v28 = vsel %vm2459_vm3, %v4092_v58, -inf }
 0x45d   : > { %v5386_v45 = vpop.f32.mrf.mxu1  ;;  %v4179_v8 = vmax.f32 %v4177_v63, %v4178_v28  ;;  %v6851_v63 = vmax.f32 %v6485_v5, %v6519_v41 }
 0x45e   : > { %v4253_v58 = vsel %vm2459_vm3, %v5386_v45, -inf  ;;  %v4266_v45 = vsel %vm2459_vm3, %v6676_v46, -inf }
 0x45f   : > { %v4105_v4 = vpop.f32.mrf.mxu1  ;;  %v4254_v42 = vmax.f32 %v4252_v31, %v4253_v58 }
 0x460   : > { %v4223_v32 = vsel %vm2459_vm3, %v4105_v4, -inf }
 0x461   : > { %v5387_v56 = vpop.f32.mrf.mxu1  ;;  %v4224_v26 = vmax.f32 %v4222_v20, %v4223_v32 }
 0x462   : > { %v4268_v10 = vsel %vm2459_vm3, %v5387_v56, -inf }
 0x463   : > { %v4108_v33 = vpop.f32.mrf.mxu1 }
 0x464   : > { %v4238_v51 = vsel %vm2459_vm3, %v4108_v33, -inf }
 0x465   : > { %v5390_v61 = vpop.f32.mrf.mxu1 }
 0x466   : > { %v4195_v30 = vsel %vm2459_vm3, %v5390_v61, -inf  ;;  %v4267_v61 = vmax.f32 %v4265_v19, %v4266_v45  ;;  %v6852_v19 = vmax.f32 %v6488_v11, %v6524_v44 }
 0x467   : > { %v4196_v24 = vmax.f32 %v4194_v18, %v4195_v30  ;;  %v4121_v57 = vpop.f32.mrf.mxu1  ;;  %v6850_v30 = vmax.f32 %v6482_v15, %v6514_v37 }
 0x468   : > { %v4165_v6 = vsel %vm2459_vm3, %v4121_v57, -inf  ;;  %v4269_v13 = vmax.f32 %v4267_v61, %v4268_v10 }
 0x469   : > { %v4274_v17 = vmax.f32 %v6846_v36, %v4196_v24  ;;  %v4166_v7 = vmax.f32 %v4164_v59, %v4165_v6  ;;  %v5391_v23 = vpop.f32.mrf.mxu1  ;;  %v4237_v24 = vmax.f32 %v4235_v39, %v4236_v1 }
 0x46a   : > { %v4210_v52 = vsel %vm2459_vm3, %v5391_v23, -inf }
 0x46b   : > { %v4272_v49 = vmax.f32 %v6847_v47, %v4166_v7  ;;  %v4211_v12 = vmax.f32 %v4209_v3, %v4210_v52  ;;  %v4124_v21 = vpop.f32.mrf.mxu1  ;;  %v4288_v34 = vadd.f32 %v6720_v55, %v4274_v17  ;;  %v4239_v16 = vmax.f32 %v4237_v24, %v4238_v51 }
 0x46c   : > { %v4180_v50 = vsel %vm2459_vm3, %v4124_v21, -inf  ;;  %v6853_v47 = vmax.f32 %v6491_v35, %v6529_v43 }
 0x46d   : > { %v4275_v4 = vmax.f32 %v6848_v48, %v4211_v12  ;;  %v4181_v14 = vmax.f32 %v4179_v8, %v4180_v50  ;;  %v5394_v0 = vpop.f32.mrf.mxu1  ;;  %v4286_v60 = vadd.f32 %v6720_v55, %v4272_v49  ;;  %v4296_v40 = vmax.f32 %v4288_v34, 0.0 }
 0x46e   : > { %v4255_v53 = vsel %vm2459_vm3, %v5394_v0, -inf }
 0x46f   : > { %v4289_v46 = vadd.f32 %v6720_v55, %v4275_v4  ;;  %v4273_v9 = vmax.f32 %v6849_v2, %v4181_v14  ;;  %v4256_v29 = vmax.f32 %v4254_v42, %v4255_v53  ;;  %v4137_v18 = vpop.f32.mrf.mxu1  ;;  %v4294_v57 = vmax.f32 %v4286_v60, 0.0 }
 0x470   : > { %v4225_v62 = vsel %vm2459_vm3, %v4137_v18, -inf }
 0x471   : > { %v4297_v56 = vmax.f32 %v4289_v46, 0.0  ;;  %v4287_v22 = vadd.f32 %v6720_v55, %v4273_v9  ;;  %v4278_v38 = vmax.f32 %v6850_v30, %v4256_v29  ;;  %v4226_v27 = vmax.f32 %v4224_v26, %v4225_v62  ;;  %v5395_v59 = vpop.f32.mrf.mxu1 }
 0x472   : > { %v4270_v25 = vsel %vm2459_vm3, %v5395_v59, -inf }
 0x473   : > { %v4303_v54 = vpack.c.bf16 %v4297_v56, %v4296_v40  ;;  %v4295_v33 = vmax.f32 %v4287_v22, 0.0  ;;  %v4276_v28 = vmax.f32 %v6851_v63, %v4226_v27  ;;  %v4140_v6 = vpop.f32.mrf.mxu1  ;;  %v4271_v15 = vmax.f32 %v4269_v13, %v4270_v25 }
 0x474   : > { %v4240_v37 = vsel %vm2459_vm3, %v4140_v6, -inf  ;;  %v4292_v17 = vadd.f32 %v6720_v55, %v4278_v38 }
 0x475   : > { %v4310_v3 = vsel %vm2459_vm3, %v4303_v54, 0  ;;  %v4302_v36 = vpack.c.bf16 %v4295_v33, %v4294_v57  ;;  %v4279_v31 = vmax.f32 %v6852_v19, %v4271_v15  ;;  %v4241_v58 = vmax.f32 %v4239_v16, %v4240_v37 }
 0x476   : > { %v4790_v7 = vcombine.low %v4310_v3, %v4310_v3  ;;  %v4791_v23 = vcombine.high %v4310_v3, %v4310_v3  ;;  %v4290_v41 = vadd.f32 %v6720_v55, %v4276_v28  ;;  %v4300_v11 = vmax.f32 %v4292_v17, 0.0 }
 0x477   : > { %v4308_v5 = vsel %vm2459_vm3, %v4302_v36, 0  ;;  %v4293_v32 = vadd.f32 %v6720_v55, %v4279_v31  ;;  %v4277_v49 = vmax.f32 %v6853_v47, %v4241_v58 }
 0x478   : > { %4345 = vst [vmem:[%s846_s19 + $0x8] sm:$0xf] %v4790_v7  ;;  %4346 = vst [vmem:[%s846_s19 + $0xc] sm:$0xf] %v4791_v23  ;;  %v4788_v52 = vcombine.low %v4308_v5, %v4308_v5  ;;  %v4789_v8 = vcombine.high %v4308_v5, %v4308_v5  ;;  %v4298_v21 = vmax.f32 %v4290_v41, 0.0 }
 0x479   : > { %v4301_v44 = vmax.f32 %v4293_v32, 0.0  ;;  %v4291_v12 = vadd.f32 %v6720_v55, %v4277_v49 }
 0x47a   : > { %4343 = vst [vmem:[%s846_s19] sm:$0xf] %v4788_v52  ;;  %4344 = vst [vmem:[%s846_s19 + $0x4] sm:$0xf] %v4789_v8 }
 0x47b   : > { %v4305_v39 = vpack.c.bf16 %v4301_v44, %v4300_v11  ;;  %v4299_v20 = vmax.f32 %v4291_v12, 0.0 }
 0x47d   : > { %v4314_v34 = vsel %vm2459_vm3, %v4305_v39, 0  ;;  %v4304_v50 = vpack.c.bf16 %v4299_v20, %v4298_v21 }
 0x47e   : > { %v4794_v45 = vcombine.low %v4314_v34, %v4314_v34  ;;  %v4795_v35 = vcombine.high %v4314_v34, %v4314_v34 }
 0x47f   : > { %v4312_v43 = vsel %vm2459_vm3, %v4304_v50, 0 }
 0x480   : > { %4349 = vst [vmem:[%s846_s19 + $0x18] sm:$0xf] %v4794_v45  ;;  %4350 = vst [vmem:[%s846_s19 + $0x1c] sm:$0xf] %v4795_v35  ;;  %v4792_v55 = vcombine.low %v4312_v43, %v4312_v43  ;;  %v4793_v42 = vcombine.high %v4312_v43, %v4312_v43 }
 0x482   : > { %4347 = vst [vmem:[%s846_s19 + $0x10] sm:$0xf] %v4792_v55  ;;  %4348 = vst [vmem:[%s846_s19 + $0x14] sm:$0xf] %v4793_v42 }
 0x483   : > { %5552 = shalt.err (!%p5549_p7)
}
 0x484   : > { %s5553_s19 = scalar_lea.hbm %s6778_s10, 512  ;;  %s5557_s23 = scalar_lea.hbm %s6840_s7, 2048 }
 0x485   : > { %p5554_p10 = scmp.ne.s32.totalorder %s6778_s10, %s5553_s19  ;;  %p5558_p13 = scmp.lt.s32.totalorder %s6778_s10, %s6840_s7 }
 0x486   : > { %p5559_p0 = scmp.lt.s32.totalorder %s5557_s23, %s5553_s19 }
 0x487   : > { %p5555_p11 = pnand %p5554_p10, %p5736_p8 }
 0x488   : > { %p5560_p1 = por %p5559_p0, %p5558_p13 }
 0x489   : > { %p5556_p12 = pneg %p5555_p11 }
 0x48b   : > { %p5561_p2 = pnand %p5560_p1, %p5556_p12 }
 0x48d   : > { %5564 = shalt.err (!%p5561_p2)
}
 0x48e   : > { %s5634_s17 = smov 64   ;;  %s5635_s14 = smov 4  }
 0x48f   : > { %5398 = dma.vmem_to_hbm [thread:$0]  (%p5736_p8), %s6780_s28, 512, %s6778_s10, %s4352_s13, %s5634_s17, %s5634_s17, %s5635_s14  }
 0x490 PF: > { %p5404_p3 = scmp.ge.s32.totalorder %s5631_s8, 2  ;;  %s4382_s12 = sand.u32 1, %s5603_s24  }
 0x491   : > { %s4383_s19 = scalar_lea.sflag [#allocation4], %s4382_s12 }
 0x492   : > { %p5401_p4 = pnand %p5404_p3, %p5740_p9 }
 0x494   : > { %p5402_p5 = pneg %p5401_p4 }
 0x496   : > { %5598 = dma.done.wait (%p5402_p5), %s4383_s19, 512  }
 0x497   : > { %5600 = vsyncadd (%p5402_p5), %s4383_s19, 4294966784  ;;  %s20_s8 = sadd.s32 1, %s5631_s8   ;;  %s6854_s15 = sld [smem:[#allocation6_spill]] }
 0x498   : > { %p17_p6 = scmp.ge.s32.totalorder %s20_s8, 6   ;;  %s6855_s24 = smov %s5607_s25 }
 0x499   : > { %s6856_s25 = smov %s5611_s26  ;;  %s6857_s26 = smov %s5748_s20 }
 0x49a   : > { %s6858_s27 = smov %s5623_s29  ;;  %s6859_s28 = smov %s5627_s30 }
 0x49b   : > { %s6860_s29 = smov %s6863_s11  ;;  %19 = sbr.rel (!%p17_p6) target bundleno = 5 (0x5), region = 130 }
 0x49d   : > { %s6861_s30 = smov %s6854_s15 }
 0x4a0   :  { %4388 = vsyncpa [#allocation4], 1 }
 0x4a1   :  { %4390 = vsyncpa [#allocation4 + $0x1], 1 }

</bundles_post_ra>
